<compile_context>
chip_gen: v6e
topology: v6e:2x2x1
jax: 0.10.0
libtpu: 0.0.40
codegen_flags: <defaults>
</compile_context>

<pallas_src>
import functools

import jax
import jax.numpy as jnp
from jax.experimental import pallas as pl
from jax.experimental.pallas import tpu as pltpu


# ---------------------------------------------------------------------------
# Spherical-harmonics basis (port of gsplat _eval_sh_bases_fast, degrees 0..3)
# ---------------------------------------------------------------------------
def _eval_sh_bases(x, y, z, num_bases_to_use, axis):
    """Concat-based SH eval used by the pure-JAX reference."""
    cols = [None] * num_bases_to_use
    cols[0] = jnp.full_like(x, 0.2820947917738781)
    if num_bases_to_use > 1:
        fTmpA = -0.48860251190292
        cols[2] = -fTmpA * z
        cols[3] = fTmpA * x
        cols[1] = fTmpA * y
    if num_bases_to_use > 4:
        z2 = z * z
        fTmpB = -1.092548430592079 * z
        fTmpA2 = 0.5462742152960395
        fC1 = x * x - y * y
        fS1 = 2.0 * x * y
        cols[6] = 0.9461746957575601 * z2 - 0.3153915652525201
        cols[7] = fTmpB * x
        cols[5] = fTmpB * y
        cols[8] = fTmpA2 * fC1
        cols[4] = fTmpA2 * fS1
    if num_bases_to_use > 9:
        fTmpC = -2.285228997322329 * z2 + 0.4570457994644658
        fTmpB3 = 1.445305721320277 * z
        fTmpA3 = -0.5900435899266435
        fC2 = x * fC1 - y * fS1
        fS2 = x * fS1 + y * fC1
        cols[12] = z * (1.865881662950577 * z2 - 1.119528997770346)
        cols[13] = fTmpC * x
        cols[11] = fTmpC * y
        cols[14] = fTmpB3 * fC1
        cols[10] = fTmpB3 * fS1
        cols[15] = fTmpA3 * fC2
        cols[9] = fTmpA3 * fS2
    # TODO(synk): degree-4 SH bases (num_bases_to_use > 16) not implemented
    # (module default sh_degree=3 -> 16 bases).
    return jnp.concatenate(cols, axis=axis)


def _write_sh_rows(sh_ref, dn, num_bases_to_use):
    """Write SH basis rows (one per basis) directly into a VMEM scratch.

    dn: normalized directions, shape (3, L), splat-in-lanes.
    Avoids a 16-way sublane concatenate; squared terms computed packed.
    """
    dt = sh_ref.dtype
    x = dn[0:1, :]
    y = dn[1:2, :]
    z = dn[2:3, :]
    sh_ref[0:1, :] = jnp.full_like(x, 0.2820947917738781).astype(dt)
    if num_bases_to_use > 1:
        fTmpA = -0.48860251190292
        sh_ref[1:2, :] = (fTmpA * y).astype(dt)
        sh_ref[2:3, :] = (-fTmpA * z).astype(dt)
        sh_ref[3:4, :] = (fTmpA * x).astype(dt)
    if num_bases_to_use > 4:
        sq = dn * dn                                   # packed x^2, y^2, z^2
        x2 = sq[0:1, :]
        y2 = sq[1:2, :]
        z2 = sq[2:3, :]
        fTmpB = -1.092548430592079 * z
        fC1 = x2 - y2
        fS1 = 2.0 * x * y
        sh_ref[4:5, :] = (0.5462742152960395 * fS1).astype(dt)
        sh_ref[5:6, :] = (fTmpB * y).astype(dt)
        sh_ref[6:7, :] = (0.9461746957575601 * z2 - 0.3153915652525201).astype(dt)
        sh_ref[7:8, :] = (fTmpB * x).astype(dt)
        sh_ref[8:9, :] = (0.5462742152960395 * fC1).astype(dt)
    if num_bases_to_use > 9:
        fTmpC = -2.285228997322329 * z2 + 0.4570457994644658
        fTmpB3 = 1.445305721320277 * z
        fC2 = x * fC1 - y * fS1
        fS2 = x * fS1 + y * fC1
        sh_ref[9:10, :] = (-0.5900435899266435 * fS2).astype(dt)
        sh_ref[10:11, :] = (fTmpB3 * fS1).astype(dt)
        sh_ref[11:12, :] = (fTmpC * y).astype(dt)
        sh_ref[12:13, :] = (z * (1.865881662950577 * z2
                                 - 1.119528997770346)).astype(dt)
        sh_ref[13:14, :] = (fTmpC * x).astype(dt)
        sh_ref[14:15, :] = (fTmpB3 * fC1).astype(dt)
        sh_ref[15:16, :] = (-0.5900435899266435 * fC2).astype(dt)
    # TODO(synk): degree-4 SH bases (num_bases_to_use > 16) not implemented.


# ---------------------------------------------------------------------------
# Pallas kernel. One grid point = (splat tile n, camera block cb).
# All activations are feature-major: rows = feature/channel, lanes = splats.
# ---------------------------------------------------------------------------
def _vdc_kernel(*refs, num_bases_to_use, num_hidden, cam_block, mm_dtype,
                cache_hfeat):
    ft_ref, mc_ref, campos_ref, beff_ref, wfeat_ref, wsh_ref = refs[:6]
    hidden_refs = refs[6:6 + 2 * num_hidden]
    wout_ref = refs[6 + 2 * num_hidden]
    bout_ref = refs[7 + 2 * num_hidden]
    out_ref = refs[8 + 2 * num_hidden]
    sh_ref = refs[9 + 2 * num_hidden]                 # (Buse, L) f32 scratch
    hfeat_ref = refs[10 + 2 * num_hidden] if cache_hfeat else None

    def mm(w, x):
        # MXU matmul: cast operands to mm_dtype, accumulate in f32.
        return jnp.dot(w.astype(mm_dtype), x.astype(mm_dtype),
                       preferred_element_type=jnp.float32)

    # Camera-invariant partial product W_feat^T @ feat^T.
    if cache_hfeat:
        # Multiple camera blocks per splat tile: cache it in VMEM across the
        # inner ("arbitrary") camera-block axis.
        @pl.when(pl.program_id(1) == 0)
        def _():
            hfeat_ref[...] = mm(wfeat_ref[...], ft_ref[...]).astype(
                hfeat_ref.dtype)
        hfeat = hfeat_ref[...].astype(jnp.float32)
    else:
        # Single camera block: compute once per grid step, keep as a value
        # (no scratch round trip) -- the C==1 fast path.
        hfeat = mm(wfeat_ref[...], ft_ref[...])

    means = mc_ref[0:3, :]                             # (3, L)
    res_colors = mc_ref[3:6, :]                        # (3, L)

    # Unrolled camera loop: amortizes per-grid-step overhead, keeps the splat
    # tile + hfeat resident in VMEM across the whole camera block.
    for ci in range(cam_block):
        cam = campos_ref[ci]                           # (3, 1)
        d = means - cam                                # (3, L)
        # normalize(dim=-1) == d * rsqrt(max(||d||^2, 1e-24))
        inv = jax.lax.rsqrt(
            jnp.maximum(jnp.sum(d * d, axis=0, keepdims=True), 1e-24))
        dn = d * inv
        _write_sh_rows(sh_ref, dn, num_bases_to_use)

        # Input layer: cached feature term + SH term + per-camera effective
        # bias (b_in + embed @ W_in[:E], hoisted to the wrapper).
        h = hfeat + mm(wsh_ref[...], sh_ref[...]) + beff_ref[ci]
        h = jnp.maximum(h, 0.0)

        for i in range(num_hidden):
            wh_ref = hidden_refs[2 * i]
            bh_ref = hidden_refs[2 * i + 1]
            h = jnp.maximum(mm(wh_ref[...], h) + bh_ref[...], 0.0)

        logits = mm(wout_ref[...], h) + bout_ref[...]  # (3, L)
        rgb = jax.nn.sigmoid(logits) + res_colors      # residual colors
        out_ref[ci] = rgb.astype(out_ref.dtype)


# ---------------------------------------------------------------------------
# Wrapper (jitted so input prep / output relayout fuse with the kernel call).
# ---------------------------------------------------------------------------
@functools.partial(
    jax.jit,
    static_argnames=("sh_degree", "cur_sh_degree", "tile_n", "cam_block",
                     "mm_dtype"))
def view_dependent_color_mlp(features, means, colors, cam_2_world, embeds,
                             params, *, sh_degree=3, cur_sh_degree=3,
                             tile_n=2048, cam_block=4,
                             mm_dtype=jnp.bfloat16):
    N, F = features.shape
    C = cam_2_world.shape[0]
    E = embeds.shape[1]
    num_bases = (sh_degree + 1) ** 2
    num_bases_to_use = (cur_sh_degree + 1) ** 2

    w_in, b_in = params["w_in"], params["b_in"]
    w_hidden, b_hidden = params["w_hidden"], params["b_hidden"]
    w_out, b_out = params["w_out"], params["b_out"]
    num_hidden = len(w_hidden)
    W = w_in.shape[1]
    assert w_in.shape[0] == E + F + num_bases

    # ---- splat tile sizing -------------------------------------------------
    # Lane tile must be a multiple of 128. Per-step VMEM stays small (< a few
    # MiB) even at tile_n=4096, so no vmem_limit_bytes override is needed.
    n128 = ((N + 127) // 128) * 128
    tile_n = max(128, (min(int(tile_n), n128) // 128) * 128)
    if tile_n >= n128 and N > 128:
        # Keep >= 2 splat tiles so the "parallel" axis can shard across both
        # TensorCores on v7x (harmless on single-TC v5e/v6e).
        tile_n = max(128, ((n128 // 2 + 127) // 128) * 128)
    n_tiles = pl.cdiv(N, tile_n)
    n_pad = n_tiles * tile_n

    # ---- camera blocking ---------------------------------------------------
    c_blk = max(1, min(int(cam_block), C))
    n_cblk = pl.cdiv(C, c_blk)
    c_pad = n_cblk * c_blk
    cache_hfeat = n_cblk > 1

    grid = (n_tiles, n_cblk)        # splat tiles outer, camera blocks inner

    f32 = jnp.float32

    # Camera-invariant splat data, transposed to splat-in-lanes, zero padded.
    feat_t = jnp.pad(features.T.astype(mm_dtype), ((0, 0), (0, n_pad - N)))
    mc_t = jnp.concatenate(
        [means.T.astype(f32), colors.T.astype(f32), jnp.zeros((2, N), f32)],
        axis=0)                                                  # (8, N)
    mc_t = jnp.pad(mc_t, ((0, 0), (0, n_pad - N)))               # (8, n_pad)

    # Per-camera small operands (padded to c_pad cameras).
    campos = cam_2_world[:, :3, 3:4].astype(f32)                 # (C, 3, 1)
    campos = jnp.pad(campos, ((0, c_pad - C), (0, 0), (0, 0)))
    # Effective input-layer bias: b_in + embed @ W_in[:E] (hoisted matmul).
    b_eff = b_in.astype(f32) + embeds.astype(f32) @ w_in[:E].astype(f32)
    b_eff = jnp.broadcast_to(b_eff, (C, W))
    b_eff = jnp.pad(b_eff, ((0, c_pad - C), (0, 0)))[:, :, None]  # (c_pad,W,1)

    # Weights: pre-sliced (no in-kernel slicing) and transposed (feature-major).
    w_feat_t = w_in[E:E + F].T.astype(mm_dtype)                  # (W, F)
    w_sh_t = w_in[E + F:E + F + num_bases_to_use].T.astype(mm_dtype)
    w_out_t = w_out.T.astype(mm_dtype)                           # (3, W)
    b_out_c = b_out.T.astype(f32)                                # (3, 1)

    const = lambda a: pl.BlockSpec(a.shape, lambda n, cb: (0,) * a.ndim)

    in_specs = [
        pl.BlockSpec((F, tile_n), lambda n, cb: (0, n)),         # feat_t
        pl.BlockSpec((8, tile_n), lambda n, cb: (0, n)),         # means|colors
        pl.BlockSpec((c_blk, 3, 1), lambda n, cb: (cb, 0, 0)),   # campos
        pl.BlockSpec((c_blk, W, 1), lambda n, cb: (cb, 0, 0)),   # b_eff
        const(w_feat_t), const(w_sh_t),
    ]
    operands = [feat_t, mc_t, campos, b_eff, w_feat_t, w_sh_t]
    for wh, bh in zip(w_hidden, b_hidden):
        wh_t = wh.T.astype(mm_dtype)                             # (W, W)
        bh_c = bh.T.astype(f32)                                  # (W, 1)
        in_specs += [const(wh_t), const(bh_c)]
        operands += [wh_t, bh_c]
    in_specs += [const(w_out_t), const(b_out_c)]
    operands += [w_out_t, b_out_c]

    scratch_shapes = [pltpu.VMEM((num_bases_to_use, tile_n), jnp.float32)]
    if cache_hfeat:
        scratch_shapes.append(pltpu.VMEM((W, tile_n), mm_dtype))

    kernel = functools.partial(
        _vdc_kernel, num_bases_to_use=num_bases_to_use,
        num_hidden=num_hidden, cam_block=c_blk, mm_dtype=mm_dtype,
        cache_hfeat=cache_hfeat)

    out = pl.pallas_call(
        kernel,
        out_shape=jax.ShapeDtypeStruct((c_pad, 3, n_pad), jnp.float32),
        grid=grid,
        in_specs=in_specs,
        out_specs=pl.BlockSpec((c_blk, 3, tile_n), lambda n, cb: (cb, 0, n)),
        scratch_shapes=scratch_shapes,
        compiler_params=pltpu.CompilerParams(
            # splat axis parallel (megacore shards it on v7x); camera-block
            # axis must stay sequential/innermost for the hfeat cache + the
            # splat-tile DMA reuse.
            dimension_semantics=("parallel", "arbitrary")),
    )(*operands)

    # Back to the PyTorch-module layout (C, N, 3); drop padding. Fuses with
    # the rest of this jitted wrapper (consumers wanting channel-major can
    # take out[:C, :, :N] directly and skip the transpose).
    return jnp.transpose(out[:C, :, :N], (0, 2, 1))


# ---------------------------------------------------------------------------
# Pure-JAX reference (mirrors the PyTorch forward)
# ---------------------------------------------------------------------------
def reference(features, means, colors, cam_2_world, embeds, params,
              *, sh_degree=3, cur_sh_degree=3):
    C = cam_2_world.shape[0]
    N = means.shape[0]
    num_bases = (sh_degree + 1) ** 2
    num_bases_to_use = (cur_sh_degree + 1) ** 2
    campos = cam_2_world[:, :3, 3]
    dirs = means[None, :, :] - campos[:, None, :]                 # (C, N, 3)
    norm = jnp.sqrt(jnp.sum(dirs * dirs, axis=-1, keepdims=True))
    dirs = dirs / jnp.maximum(norm, 1e-12)
    x, y, z = dirs[..., 0:1], dirs[..., 1:2], dirs[..., 2:3]
    sh = _eval_sh_bases(x, y, z, num_bases_to_use, axis=-1)       # (C, N, Buse)
    if num_bases_to_use < num_bases:
        sh = jnp.concatenate(
            [sh, jnp.zeros((C, N, num_bases - num_bases_to_use), sh.dtype)],
            axis=-1)
    emb = jnp.broadcast_to(embeds[:, None, :], (C, N, embeds.shape[1]))
    feat = jnp.broadcast_to(features[None, :, :], (C, N, features.shape[1]))
    h = jnp.concatenate([emb, feat, sh], axis=-1)
    h = jnp.maximum(h @ params["w_in"] + params["b_in"], 0.0)
    for wh, bh in zip(params["w_hidden"], params["b_hidden"]):
        h = jnp.maximum(h @ wh + bh, 0.0)
    logits = h @ params["w_out"] + params["b_out"]
    return jax.nn.sigmoid(logits) + colors[None, :, :]


# ---------------------------------------------------------------------------
# Deterministic parameter init (shapes from the module __init__)
# ---------------------------------------------------------------------------
def init_params(key, feature_dim, num_cameras, embed_dim=16, sh_degree=3,
                mlp_width=64, mlp_depth=2):
    num_bases = (sh_degree + 1) ** 2
    d_in = embed_dim + feature_dim + num_bases

    def linear(k, fan_in, fan_out):
        bound = 1.0 / jnp.sqrt(jnp.float32(fan_in))
        kw, kb = jax.random.split(k)
        w = jax.random.uniform(kw, (fan_in, fan_out), jnp.float32, -bound, bound)
        b = jax.random.uniform(kb, (1, fan_out), jnp.float32, -bound, bound)
        return w, b

    keys = jax.random.split(key, mlp_depth + 2)
    embed_table = jax.random.normal(keys[0], (num_cameras, embed_dim),
                                    jnp.float32)
    w_in, b_in = linear(keys[1], d_in, mlp_width)
    w_hidden, b_hidden = [], []
    for i in range(mlp_depth - 1):
        wh, bh = linear(keys[2 + i], mlp_width, mlp_width)
        w_hidden.append(wh)
        b_hidden.append(bh)
    w_out, b_out = linear(keys[mlp_depth + 1], mlp_width, 3)
    params = dict(w_in=w_in, b_in=b_in, w_hidden=w_hidden, b_hidden=b_hidden,
                  w_out=w_out, b_out=b_out)
    return embed_table, params


if __name__ == "__main__":
    # Small, module-consistent shapes (N exercises padding + 2 splat tiles).
    N = 1000          # n_splats
    F = 32            # feature_dim
    C = 2             # cameras in this forward
    NUM_CAMERAS = 3   # embedding table size
    EMBED_DIM = 16
    SH_DEGREE = 3
    MLP_WIDTH = 64
    MLP_DEPTH = 2
    CUR_SH_DEGREE = 3

    key = jax.random.PRNGKey(0)
    k_feat, k_means, k_colors, k_cam, k_params = jax.random.split(key, 5)

    features = jax.random.normal(k_feat, (N, F), jnp.float32)
    means = jax.random.normal(k_means, (N, 3), jnp.float32) * 2.0
    colors = jax.random.uniform(k_colors, (N, 3), jnp.float32)

    # cam_2_world: identity rotation + random translation
    trans = jax.random.normal(k_cam, (C, 3), jnp.float32)
    cam_2_world = jnp.tile(jnp.eye(4, dtype=jnp.float32)[None], (C, 1, 1))
    cam_2_world = cam_2_world.at[:, :3, 3].set(trans)

    camera_ids = jnp.array([0, 2], dtype=jnp.int32)

    embed_table, params = init_params(
        k_params, F, NUM_CAMERAS, EMBED_DIM, SH_DEGREE, MLP_WIDTH, MLP_DEPTH)
    embeds = embed_table[camera_ids]              # (C, EMBED_DIM) glue lookup

    ref = reference(features, means, colors, cam_2_world, embeds, params,
                    sh_degree=SH_DEGREE, cur_sh_degree=CUR_SH_DEGREE)

    # f32-matmul path, camera-blocked (no hfeat scratch) -- tight tolerance.
    out_f32 = view_dependent_color_mlp(
        features, means, colors, cam_2_world, embeds, params,
        sh_degree=SH_DEGREE, cur_sh_degree=CUR_SH_DEGREE,
        mm_dtype=jnp.float32)
    out_f32 = jax.block_until_ready(out_f32)
    assert out_f32.shape == (C, N, 3)
    if not jnp.allclose(out_f32, ref, atol=1e-4, rtol=1e-4):
        raise AssertionError("Pallas kernel (f32, blocked) mismatch vs reference")

    # f32 path with cam_block=1: exercises the cached-hfeat multi-camera-step
    # path -- tight tolerance.
    out_f32c = view_dependent_color_mlp(
        features, means, colors, cam_2_world, embeds, params,
        sh_degree=SH_DEGREE, cur_sh_degree=CUR_SH_DEGREE,
        cam_block=1, mm_dtype=jnp.float32)
    out_f32c = jax.block_until_ready(out_f32c)
    assert out_f32c.shape == (C, N, 3)
    if not jnp.allclose(out_f32c, ref, atol=1e-4, rtol=1e-4):
        raise AssertionError("Pallas kernel (f32, cached) mismatch vs reference")

    # Default bf16-at-MXU path (f32 accumulation, elementwise stays f32).
    out_bf16 = view_dependent_color_mlp(
        features, means, colors, cam_2_world, embeds, params,
        sh_degree=SH_DEGREE, cur_sh_degree=CUR_SH_DEGREE)
    out_bf16 = jax.block_until_ready(out_bf16)
    assert out_bf16.shape == (C, N, 3)
    if not jnp.allclose(out_bf16, ref, atol=1.5e-2, rtol=1.5e-2):
        raise AssertionError("Pallas kernel (bf16) mismatch vs JAX reference")

    print("KERNEL_OK")
</pallas_src>

<mosaic_0001>
module attributes {stable_mosaic.version = 11 : i64} {
  func.func @_vdc_kernel(%arg0: i32, %arg1: i32, %arg2: memref<32x512xf32, #tpu.memory_space<vmem>>, %arg3: memref<8x512xf32, #tpu.memory_space<vmem>>, %arg4: memref<2x3x1xf32, #tpu.memory_space<vmem>>, %arg5: memref<2x64x1xf32, #tpu.memory_space<vmem>>, %arg6: memref<64x32xf32, #tpu.memory_space<vmem>>, %arg7: memref<64x16xf32, #tpu.memory_space<vmem>>, %arg8: memref<64x64xf32, #tpu.memory_space<vmem>>, %arg9: memref<64x1xf32, #tpu.memory_space<vmem>>, %arg10: memref<3x64xf32, #tpu.memory_space<vmem>>, %arg11: memref<3x1xf32, #tpu.memory_space<vmem>>, %arg12: memref<2x3x512xf32, #tpu.memory_space<vmem>>, %arg13: memref<16x512xf32, #tpu.memory_space<vmem>>) attributes {dimension_semantics = [#tpu.dimension_semantics<parallel>, #tpu.dimension_semantics<arbitrary>], iteration_bounds = array<i64: 2, 1>, scalar_prefetch = 0 : i64, scratch_operands = 1 : i64, tpu.core_type = #tpu.core_type<tc>, window_params = [{transform_indices = @transform_0, window_bounds = array<i64: 32, 512>}, {transform_indices = @transform_1, window_bounds = array<i64: 8, 512>}, {transform_indices = @transform_2, window_bounds = array<i64: 2, 3, 1>}, {transform_indices = @transform_3, window_bounds = array<i64: 2, 64, 1>}, {pipeline_mode = #tpu.pipeline_mode<synchronous>, transform_indices = @transform_4, window_bounds = array<i64: 64, 32>}, {pipeline_mode = #tpu.pipeline_mode<synchronous>, transform_indices = @transform_5, window_bounds = array<i64: 64, 16>}, {pipeline_mode = #tpu.pipeline_mode<synchronous>, transform_indices = @transform_6, window_bounds = array<i64: 64, 64>}, {pipeline_mode = #tpu.pipeline_mode<synchronous>, transform_indices = @transform_7, window_bounds = array<i64: 64, 1>}, {pipeline_mode = #tpu.pipeline_mode<synchronous>, transform_indices = @transform_8, window_bounds = array<i64: 3, 64>}, {pipeline_mode = #tpu.pipeline_mode<synchronous>, transform_indices = @transform_9, window_bounds = array<i64: 3, 1>}, {transform_indices = @transform_10, window_bounds = array<i64: 2, 3, 512>}]} {
    %c0 = arith.constant 0 : index
    %c0_0 = arith.constant 0 : index
    %0 = vector.load %arg6[%c0, %c0_0] : memref<64x32xf32, #tpu.memory_space<vmem>>, vector<64x32xf32>
    %c0_1 = arith.constant 0 : index
    %c0_2 = arith.constant 0 : index
    %1 = vector.load %arg2[%c0_1, %c0_2] : memref<32x512xf32, #tpu.memory_space<vmem>>, vector<32x512xf32>
    %cst = arith.constant dense<0.000000e+00> : vector<64x512xf32>
    %2 = tpu.matmul %0, %1, %cst {dimension_numbers = #tpu.dot_dimension_numbers<[1], [0], [0], [1], [0, 0, 1, 1], [], []>} : vector<64x32xf32>, vector<32x512xf32>, vector<64x512xf32> -> vector<64x512xf32>
    %c0_3 = arith.constant 0 : index
    %c0_4 = arith.constant 0 : index
    %3 = vector.load %arg3[%c0_3, %c0_4] : memref<8x512xf32, #tpu.memory_space<vmem>>, vector<3x512xf32>
    %c3 = arith.constant 3 : index
    %c0_5 = arith.constant 0 : index
    %4 = vector.load %arg3[%c3, %c0_5] : memref<8x512xf32, #tpu.memory_space<vmem>>, vector<3x512xf32>
    %c0_6 = arith.constant 0 : index
    %c0_7 = arith.constant 0 : index
    %c0_8 = arith.constant 0 : index
    %5 = vector.load %arg4[%c0_6, %c0_7, %c0_8] : memref<2x3x1xf32, #tpu.memory_space<vmem>>, vector<1x3x1xf32>
    %6 = vector.shape_cast %5 : vector<1x3x1xf32> to vector<3x1xf32>
    %7 = vector.broadcast %6 : vector<3x1xf32> to vector<3x512xf32>
    %8 = arith.subf %3, %7 : vector<3x512xf32>
    %9 = arith.mulf %8, %8 : vector<3x512xf32>
    %cst_9 = arith.constant dense<0.000000e+00> : vector<512xf32>
    %10 = vector.multi_reduction <add>, %9, %cst_9 [0] : vector<3x512xf32> to vector<512xf32>
    %11 = vector.shape_cast %10 : vector<512xf32> to vector<1x512xf32>
    %cst_10 = arith.constant 1.000000e-24 : f32
    %12 = vector.broadcast %cst_10 : f32 to vector<1x512xf32>
    %13 = arith.maximumf %11, %12 : vector<1x512xf32>
    %14 = math.rsqrt %13 : vector<1x512xf32>
    %15 = vector.broadcast %14 : vector<1x512xf32> to vector<3x512xf32>
    %16 = arith.mulf %8, %15 : vector<3x512xf32>
    %17 = vector.extract_strided_slice %16 {offsets = [0, 0], sizes = [1, 512], strides = [1, 1]} : vector<3x512xf32> to vector<1x512xf32>
    %18 = vector.extract_strided_slice %16 {offsets = [1, 0], sizes = [1, 512], strides = [1, 1]} : vector<3x512xf32> to vector<1x512xf32>
    %19 = vector.extract_strided_slice %16 {offsets = [2, 0], sizes = [1, 512], strides = [1, 1]} : vector<3x512xf32> to vector<1x512xf32>
    %cst_11 = arith.constant 0.282094806 : f32
    %20 = vector.broadcast %cst_11 : f32 to vector<1x512xf32>
    %c0_12 = arith.constant 0 : index
    %c0_13 = arith.constant 0 : index
    %21 = vector.load %arg13[%c0_12, %c0_13] : memref<16x512xf32, #tpu.memory_space<vmem>>, vector<1x512xf32>
    tpu.vector_store %arg13[%c0_12, %c0_13], %20 {strides = array<i32>} : memref<16x512xf32, #tpu.memory_space<vmem>>, vector<1x512xf32>,
    %cst_14 = arith.constant -0.488602519 : f32
    %22 = vector.broadcast %cst_14 : f32 to vector<1x512xf32>
    %23 = arith.mulf %22, %18 : vector<1x512xf32>
    %c1 = arith.constant 1 : index
    %c0_15 = arith.constant 0 : index
    %24 = vector.load %arg13[%c1, %c0_15] : memref<16x512xf32, #tpu.memory_space<vmem>>, vector<1x512xf32>
    tpu.vector_store %arg13[%c1, %c0_15], %23 {strides = array<i32>} : memref<16x512xf32, #tpu.memory_space<vmem>>, vector<1x512xf32>,
    %cst_16 = arith.constant 0.488602519 : f32
    %25 = vector.broadcast %cst_16 : f32 to vector<1x512xf32>
    %26 = arith.mulf %25, %19 : vector<1x512xf32>
    %c2 = arith.constant 2 : index
    %c0_17 = arith.constant 0 : index
    %27 = vector.load %arg13[%c2, %c0_17] : memref<16x512xf32, #tpu.memory_space<vmem>>, vector<1x512xf32>
    tpu.vector_store %arg13[%c2, %c0_17], %26 {strides = array<i32>} : memref<16x512xf32, #tpu.memory_space<vmem>>, vector<1x512xf32>,
    %cst_18 = arith.constant -0.488602519 : f32
    %28 = vector.broadcast %cst_18 : f32 to vector<1x512xf32>
    %29 = arith.mulf %28, %17 : vector<1x512xf32>
    %c3_19 = arith.constant 3 : index
    %c0_20 = arith.constant 0 : index
    %30 = vector.load %arg13[%c3_19, %c0_20] : memref<16x512xf32, #tpu.memory_space<vmem>>, vector<1x512xf32>
    tpu.vector_store %arg13[%c3_19, %c0_20], %29 {strides = array<i32>} : memref<16x512xf32, #tpu.memory_space<vmem>>, vector<1x512xf32>,
    %31 = arith.mulf %16, %16 : vector<3x512xf32>
    %32 = vector.extract_strided_slice %31 {offsets = [0, 0], sizes = [1, 512], strides = [1, 1]} : vector<3x512xf32> to vector<1x512xf32>
    %33 = vector.extract_strided_slice %31 {offsets = [1, 0], sizes = [1, 512], strides = [1, 1]} : vector<3x512xf32> to vector<1x512xf32>
    %34 = vector.extract_strided_slice %31 {offsets = [2, 0], sizes = [1, 512], strides = [1, 1]} : vector<3x512xf32> to vector<1x512xf32>
    %cst_21 = arith.constant -1.09254849 : f32
    %35 = vector.broadcast %cst_21 : f32 to vector<1x512xf32>
    %36 = arith.mulf %35, %19 : vector<1x512xf32>
    %37 = arith.subf %32, %33 : vector<1x512xf32>
    %cst_22 = arith.constant 2.000000e+00 : f32
    %38 = vector.broadcast %cst_22 : f32 to vector<1x512xf32>
    %39 = arith.mulf %38, %17 : vector<1x512xf32>
    %40 = arith.mulf %39, %18 : vector<1x512xf32>
    %cst_23 = arith.constant 0.546274245 : f32
    %41 = vector.broadcast %cst_23 : f32 to vector<1x512xf32>
    %42 = arith.mulf %41, %40 : vector<1x512xf32>
    %c4 = arith.constant 4 : index
    %c0_24 = arith.constant 0 : index
    %43 = vector.load %arg13[%c4, %c0_24] : memref<16x512xf32, #tpu.memory_space<vmem>>, vector<1x512xf32>
    tpu.vector_store %arg13[%c4, %c0_24], %42 {strides = array<i32>} : memref<16x512xf32, #tpu.memory_space<vmem>>, vector<1x512xf32>,
    %44 = arith.mulf %36, %18 : vector<1x512xf32>
    %c5 = arith.constant 5 : index
    %c0_25 = arith.constant 0 : index
    %45 = vector.load %arg13[%c5, %c0_25] : memref<16x512xf32, #tpu.memory_space<vmem>>, vector<1x512xf32>
    tpu.vector_store %arg13[%c5, %c0_25], %44 {strides = array<i32>} : memref<16x512xf32, #tpu.memory_space<vmem>>, vector<1x512xf32>,
    %cst_26 = arith.constant 0.946174681 : f32
    %46 = vector.broadcast %cst_26 : f32 to vector<1x512xf32>
    %47 = arith.mulf %46, %34 : vector<1x512xf32>
    %cst_27 = arith.constant 0.31539157 : f32
    %48 = vector.broadcast %cst_27 : f32 to vector<1x512xf32>
    %49 = arith.subf %47, %48 : vector<1x512xf32>
    %c6 = arith.constant 6 : index
    %c0_28 = arith.constant 0 : index
    %50 = vector.load %arg13[%c6, %c0_28] : memref<16x512xf32, #tpu.memory_space<vmem>>, vector<1x512xf32>
    tpu.vector_store %arg13[%c6, %c0_28], %49 {strides = array<i32>} : memref<16x512xf32, #tpu.memory_space<vmem>>, vector<1x512xf32>,
    %51 = arith.mulf %36, %17 : vector<1x512xf32>
    %c7 = arith.constant 7 : index
    %c0_29 = arith.constant 0 : index
    %52 = vector.load %arg13[%c7, %c0_29] : memref<16x512xf32, #tpu.memory_space<vmem>>, vector<1x512xf32>
    tpu.vector_store %arg13[%c7, %c0_29], %51 {strides = array<i32>} : memref<16x512xf32, #tpu.memory_space<vmem>>, vector<1x512xf32>,
    %cst_30 = arith.constant 0.546274245 : f32
    %53 = vector.broadcast %cst_30 : f32 to vector<1x512xf32>
    %54 = arith.mulf %53, %37 : vector<1x512xf32>
    %c8 = arith.constant 8 : index
    %c0_31 = arith.constant 0 : index
    %55 = vector.load %arg13[%c8, %c0_31] : memref<16x512xf32, #tpu.memory_space<vmem>>, vector<1x512xf32>
    tpu.vector_store %arg13[%c8, %c0_31], %54 {strides = array<i32>} : memref<16x512xf32, #tpu.memory_space<vmem>>, vector<1x512xf32>,
    %cst_32 = arith.constant -2.28522897 : f32
    %56 = vector.broadcast %cst_32 : f32 to vector<1x512xf32>
    %57 = arith.mulf %56, %34 : vector<1x512xf32>
    %cst_33 = arith.constant 0.457045794 : f32
    %58 = vector.broadcast %cst_33 : f32 to vector<1x512xf32>
    %59 = arith.addf %57, %58 : vector<1x512xf32>
    %cst_34 = arith.constant 1.44530571 : f32
    %60 = vector.broadcast %cst_34 : f32 to vector<1x512xf32>
    %61 = arith.mulf %60, %19 : vector<1x512xf32>
    %62 = arith.mulf %17, %37 : vector<1x512xf32>
    %63 = arith.mulf %18, %40 : vector<1x512xf32>
    %64 = arith.subf %62, %63 : vector<1x512xf32>
    %65 = arith.mulf %17, %40 : vector<1x512xf32>
    %66 = arith.mulf %18, %37 : vector<1x512xf32>
    %67 = arith.addf %65, %66 : vector<1x512xf32>
    %cst_35 = arith.constant -0.590043604 : f32
    %68 = vector.broadcast %cst_35 : f32 to vector<1x512xf32>
    %69 = arith.mulf %68, %67 : vector<1x512xf32>
    %c9 = arith.constant 9 : index
    %c0_36 = arith.constant 0 : index
    %70 = vector.load %arg13[%c9, %c0_36] : memref<16x512xf32, #tpu.memory_space<vmem>>, vector<1x512xf32>
    tpu.vector_store %arg13[%c9, %c0_36], %69 {strides = array<i32>} : memref<16x512xf32, #tpu.memory_space<vmem>>, vector<1x512xf32>,
    %71 = arith.mulf %61, %40 : vector<1x512xf32>
    %c10 = arith.constant 10 : index
    %c0_37 = arith.constant 0 : index
    %72 = vector.load %arg13[%c10, %c0_37] : memref<16x512xf32, #tpu.memory_space<vmem>>, vector<1x512xf32>
    tpu.vector_store %arg13[%c10, %c0_37], %71 {strides = array<i32>} : memref<16x512xf32, #tpu.memory_space<vmem>>, vector<1x512xf32>,
    %73 = arith.mulf %59, %18 : vector<1x512xf32>
    %c11 = arith.constant 11 : index
    %c0_38 = arith.constant 0 : index
    %74 = vector.load %arg13[%c11, %c0_38] : memref<16x512xf32, #tpu.memory_space<vmem>>, vector<1x512xf32>
    tpu.vector_store %arg13[%c11, %c0_38], %73 {strides = array<i32>} : memref<16x512xf32, #tpu.memory_space<vmem>>, vector<1x512xf32>,
    %cst_39 = arith.constant 1.86588168 : f32
    %75 = vector.broadcast %cst_39 : f32 to vector<1x512xf32>
    %76 = arith.mulf %75, %34 : vector<1x512xf32>
    %cst_40 = arith.constant 1.11952901 : f32
    %77 = vector.broadcast %cst_40 : f32 to vector<1x512xf32>
    %78 = arith.subf %76, %77 : vector<1x512xf32>
    %79 = arith.mulf %19, %78 : vector<1x512xf32>
    %c12 = arith.constant 12 : index
    %c0_41 = arith.constant 0 : index
    %80 = vector.load %arg13[%c12, %c0_41] : memref<16x512xf32, #tpu.memory_space<vmem>>, vector<1x512xf32>
    tpu.vector_store %arg13[%c12, %c0_41], %79 {strides = array<i32>} : memref<16x512xf32, #tpu.memory_space<vmem>>, vector<1x512xf32>,
    %81 = arith.mulf %59, %17 : vector<1x512xf32>
    %c13 = arith.constant 13 : index
    %c0_42 = arith.constant 0 : index
    %82 = vector.load %arg13[%c13, %c0_42] : memref<16x512xf32, #tpu.memory_space<vmem>>, vector<1x512xf32>
    tpu.vector_store %arg13[%c13, %c0_42], %81 {strides = array<i32>} : memref<16x512xf32, #tpu.memory_space<vmem>>, vector<1x512xf32>,
    %83 = arith.mulf %61, %37 : vector<1x512xf32>
    %c14 = arith.constant 14 : index
    %c0_43 = arith.constant 0 : index
    %84 = vector.load %arg13[%c14, %c0_43] : memref<16x512xf32, #tpu.memory_space<vmem>>, vector<1x512xf32>
    tpu.vector_store %arg13[%c14, %c0_43], %83 {strides = array<i32>} : memref<16x512xf32, #tpu.memory_space<vmem>>, vector<1x512xf32>,
    %cst_44 = arith.constant -0.590043604 : f32
    %85 = vector.broadcast %cst_44 : f32 to vector<1x512xf32>
    %86 = arith.mulf %85, %64 : vector<1x512xf32>
    %c15 = arith.constant 15 : index
    %c0_45 = arith.constant 0 : index
    %87 = vector.load %arg13[%c15, %c0_45] : memref<16x512xf32, #tpu.memory_space<vmem>>, vector<1x512xf32>
    tpu.vector_store %arg13[%c15, %c0_45], %86 {strides = array<i32>} : memref<16x512xf32, #tpu.memory_space<vmem>>, vector<1x512xf32>,
    %c0_46 = arith.constant 0 : index
    %c0_47 = arith.constant 0 : index
    %88 = vector.load %arg7[%c0_46, %c0_47] : memref<64x16xf32, #tpu.memory_space<vmem>>, vector<64x16xf32>
    %c0_48 = arith.constant 0 : index
    %c0_49 = arith.constant 0 : index
    %89 = vector.load %arg13[%c0_48, %c0_49] : memref<16x512xf32, #tpu.memory_space<vmem>>, vector<16x512xf32>
    %cst_50 = arith.constant dense<0.000000e+00> : vector<64x512xf32>
    %90 = tpu.matmul %88, %89, %cst_50 {dimension_numbers = #tpu.dot_dimension_numbers<[1], [0], [0], [1], [0, 0, 1, 1], [], []>} : vector<64x16xf32>, vector<16x512xf32>, vector<64x512xf32> -> vector<64x512xf32>
    %91 = arith.addf %2, %90 : vector<64x512xf32>
    %c0_51 = arith.constant 0 : index
    %c0_52 = arith.constant 0 : index
    %c0_53 = arith.constant 0 : index
    %92 = vector.load %arg5[%c0_51, %c0_52, %c0_53] : memref<2x64x1xf32, #tpu.memory_space<vmem>>, vector<1x64x1xf32>
    %93 = vector.shape_cast %92 : vector<1x64x1xf32> to vector<64x1xf32>
    %94 = vector.broadcast %93 : vector<64x1xf32> to vector<64x512xf32>
    %95 = arith.addf %91, %94 : vector<64x512xf32>
    %cst_54 = arith.constant 0.000000e+00 : f32
    %96 = vector.broadcast %cst_54 : f32 to vector<64x512xf32>
    %97 = arith.maximumf %95, %96 : vector<64x512xf32>
    %c0_55 = arith.constant 0 : index
    %c0_56 = arith.constant 0 : index
    %98 = vector.load %arg8[%c0_55, %c0_56] : memref<64x64xf32, #tpu.memory_space<vmem>>, vector<64x64xf32>
    %cst_57 = arith.constant dense<0.000000e+00> : vector<64x512xf32>
    %99 = tpu.matmul %98, %97, %cst_57 {dimension_numbers = #tpu.dot_dimension_numbers<[1], [0], [0], [1], [0, 0, 1, 1], [], []>} : vector<64x64xf32>, vector<64x512xf32>, vector<64x512xf32> -> vector<64x512xf32>
    %c0_58 = arith.constant 0 : index
    %c0_59 = arith.constant 0 : index
    %100 = vector.load %arg9[%c0_58, %c0_59] : memref<64x1xf32, #tpu.memory_space<vmem>>, vector<64x1xf32>
    %101 = vector.broadcast %100 : vector<64x1xf32> to vector<64x512xf32>
    %102 = arith.addf %99, %101 : vector<64x512xf32>
    %cst_60 = arith.constant 0.000000e+00 : f32
    %103 = vector.broadcast %cst_60 : f32 to vector<64x512xf32>
    %104 = arith.maximumf %102, %103 : vector<64x512xf32>
    %c0_61 = arith.constant 0 : index
    %c0_62 = arith.constant 0 : index
    %105 = vector.load %arg10[%c0_61, %c0_62] : memref<3x64xf32, #tpu.memory_space<vmem>>, vector<3x64xf32>
    %cst_63 = arith.constant dense<0.000000e+00> : vector<3x512xf32>
    %106 = tpu.matmul %105, %104, %cst_63 {dimension_numbers = #tpu.dot_dimension_numbers<[1], [0], [0], [1], [0, 0, 1, 1], [], []>} : vector<3x64xf32>, vector<64x512xf32>, vector<3x512xf32> -> vector<3x512xf32>
    %c0_64 = arith.constant 0 : index
    %c0_65 = arith.constant 0 : index
    %107 = vector.load %arg11[%c0_64, %c0_65] : memref<3x1xf32, #tpu.memory_space<vmem>>, vector<3x1xf32>
    %108 = vector.broadcast %107 : vector<3x1xf32> to vector<3x512xf32>
    %109 = arith.addf %106, %108 : vector<3x512xf32>
    %110 = arith.negf %109 : vector<3x512xf32>
    %111 = math.exp %110 : vector<3x512xf32>
    %cst_66 = arith.constant 1.000000e+00 : f32
    %112 = vector.broadcast %cst_66 : f32 to vector<3x512xf32>
    %113 = arith.addf %112, %111 : vector<3x512xf32>
    %114 = arith.divf %112, %113 : vector<3x512xf32>
    %115 = arith.addf %114, %4 : vector<3x512xf32>
    %c0_67 = arith.constant 0 : index
    %c0_68 = arith.constant 0 : index
    %c0_69 = arith.constant 0 : index
    %116 = vector.load %arg12[%c0_67, %c0_68, %c0_69] : memref<2x3x512xf32, #tpu.memory_space<vmem>>, vector<1x3x512xf32>
    %117 = vector.shape_cast %116 : vector<1x3x512xf32> to vector<3x512xf32>
    %118 = vector.shape_cast %115 : vector<3x512xf32> to vector<1x3x512xf32>
    tpu.vector_store %arg12[%c0_67, %c0_68, %c0_69], %118 {strides = array<i32>} : memref<2x3x512xf32, #tpu.memory_space<vmem>>, vector<1x3x512xf32>,
    %c1_70 = arith.constant 1 : index
    %c0_71 = arith.constant 0 : index
    %c0_72 = arith.constant 0 : index
    %119 = vector.load %arg4[%c1_70, %c0_71, %c0_72] : memref<2x3x1xf32, #tpu.memory_space<vmem>>, vector<1x3x1xf32>
    %120 = vector.shape_cast %119 : vector<1x3x1xf32> to vector<3x1xf32>
    %121 = vector.broadcast %120 : vector<3x1xf32> to vector<3x512xf32>
    %122 = arith.subf %3, %121 : vector<3x512xf32>
    %123 = arith.mulf %122, %122 : vector<3x512xf32>
    %cst_73 = arith.constant dense<0.000000e+00> : vector<512xf32>
    %124 = vector.multi_reduction <add>, %123, %cst_73 [0] : vector<3x512xf32> to vector<512xf32>
    %125 = vector.shape_cast %124 : vector<512xf32> to vector<1x512xf32>
    %cst_74 = arith.constant 1.000000e-24 : f32
    %126 = vector.broadcast %cst_74 : f32 to vector<1x512xf32>
    %127 = arith.maximumf %125, %126 : vector<1x512xf32>
    %128 = math.rsqrt %127 : vector<1x512xf32>
    %129 = vector.broadcast %128 : vector<1x512xf32> to vector<3x512xf32>
    %130 = arith.mulf %122, %129 : vector<3x512xf32>
    %131 = vector.extract_strided_slice %130 {offsets = [0, 0], sizes = [1, 512], strides = [1, 1]} : vector<3x512xf32> to vector<1x512xf32>
    %132 = vector.extract_strided_slice %130 {offsets = [1, 0], sizes = [1, 512], strides = [1, 1]} : vector<3x512xf32> to vector<1x512xf32>
    %133 = vector.extract_strided_slice %130 {offsets = [2, 0], sizes = [1, 512], strides = [1, 1]} : vector<3x512xf32> to vector<1x512xf32>
    %cst_75 = arith.constant 0.282094806 : f32
    %134 = vector.broadcast %cst_75 : f32 to vector<1x512xf32>
    %c0_76 = arith.constant 0 : index
    %c0_77 = arith.constant 0 : index
    %135 = vector.load %arg13[%c0_76, %c0_77] : memref<16x512xf32, #tpu.memory_space<vmem>>, vector<1x512xf32>
    tpu.vector_store %arg13[%c0_76, %c0_77], %134 {strides = array<i32>} : memref<16x512xf32, #tpu.memory_space<vmem>>, vector<1x512xf32>,
    %cst_78 = arith.constant -0.488602519 : f32
    %136 = vector.broadcast %cst_78 : f32 to vector<1x512xf32>
    %137 = arith.mulf %136, %132 : vector<1x512xf32>
    %c1_79 = arith.constant 1 : index
    %c0_80 = arith.constant 0 : index
    %138 = vector.load %arg13[%c1_79, %c0_80] : memref<16x512xf32, #tpu.memory_space<vmem>>, vector<1x512xf32>
    tpu.vector_store %arg13[%c1_79, %c0_80], %137 {strides = array<i32>} : memref<16x512xf32, #tpu.memory_space<vmem>>, vector<1x512xf32>,
    %cst_81 = arith.constant 0.488602519 : f32
    %139 = vector.broadcast %cst_81 : f32 to vector<1x512xf32>
    %140 = arith.mulf %139, %133 : vector<1x512xf32>
    %c2_82 = arith.constant 2 : index
    %c0_83 = arith.constant 0 : index
    %141 = vector.load %arg13[%c2_82, %c0_83] : memref<16x512xf32, #tpu.memory_space<vmem>>, vector<1x512xf32>
    tpu.vector_store %arg13[%c2_82, %c0_83], %140 {strides = array<i32>} : memref<16x512xf32, #tpu.memory_space<vmem>>, vector<1x512xf32>,
    %cst_84 = arith.constant -0.488602519 : f32
    %142 = vector.broadcast %cst_84 : f32 to vector<1x512xf32>
    %143 = arith.mulf %142, %131 : vector<1x512xf32>
    %c3_85 = arith.constant 3 : index
    %c0_86 = arith.constant 0 : index
    %144 = vector.load %arg13[%c3_85, %c0_86] : memref<16x512xf32, #tpu.memory_space<vmem>>, vector<1x512xf32>
    tpu.vector_store %arg13[%c3_85, %c0_86], %143 {strides = array<i32>} : memref<16x512xf32, #tpu.memory_space<vmem>>, vector<1x512xf32>,
    %145 = arith.mulf %130, %130 : vector<3x512xf32>
    %146 = vector.extract_strided_slice %145 {offsets = [0, 0], sizes = [1, 512], strides = [1, 1]} : vector<3x512xf32> to vector<1x512xf32>
    %147 = vector.extract_strided_slice %145 {offsets = [1, 0], sizes = [1, 512], strides = [1, 1]} : vector<3x512xf32> to vector<1x512xf32>
    %148 = vector.extract_strided_slice %145 {offsets = [2, 0], sizes = [1, 512], strides = [1, 1]} : vector<3x512xf32> to vector<1x512xf32>
    %cst_87 = arith.constant -1.09254849 : f32
    %149 = vector.broadcast %cst_87 : f32 to vector<1x512xf32>
    %150 = arith.mulf %149, %133 : vector<1x512xf32>
    %151 = arith.subf %146, %147 : vector<1x512xf32>
    %cst_88 = arith.constant 2.000000e+00 : f32
    %152 = vector.broadcast %cst_88 : f32 to vector<1x512xf32>
    %153 = arith.mulf %152, %131 : vector<1x512xf32>
    %154 = arith.mulf %153, %132 : vector<1x512xf32>
    %cst_89 = arith.constant 0.546274245 : f32
    %155 = vector.broadcast %cst_89 : f32 to vector<1x512xf32>
    %156 = arith.mulf %155, %154 : vector<1x512xf32>
    %c4_90 = arith.constant 4 : index
    %c0_91 = arith.constant 0 : index
    %157 = vector.load %arg13[%c4_90, %c0_91] : memref<16x512xf32, #tpu.memory_space<vmem>>, vector<1x512xf32>
    tpu.vector_store %arg13[%c4_90, %c0_91], %156 {strides = array<i32>} : memref<16x512xf32, #tpu.memory_space<vmem>>, vector<1x512xf32>,
    %158 = arith.mulf %150, %132 : vector<1x512xf32>
    %c5_92 = arith.constant 5 : index
    %c0_93 = arith.constant 0 : index
    %159 = vector.load %arg13[%c5_92, %c0_93] : memref<16x512xf32, #tpu.memory_space<vmem>>, vector<1x512xf32>
    tpu.vector_store %arg13[%c5_92, %c0_93], %158 {strides = array<i32>} : memref<16x512xf32, #tpu.memory_space<vmem>>, vector<1x512xf32>,
    %cst_94 = arith.constant 0.946174681 : f32
    %160 = vector.broadcast %cst_94 : f32 to vector<1x512xf32>
    %161 = arith.mulf %160, %148 : vector<1x512xf32>
    %cst_95 = arith.constant 0.31539157 : f32
    %162 = vector.broadcast %cst_95 : f32 to vector<1x512xf32>
    %163 = arith.subf %161, %162 : vector<1x512xf32>
    %c6_96 = arith.constant 6 : index
    %c0_97 = arith.constant 0 : index
    %164 = vector.load %arg13[%c6_96, %c0_97] : memref<16x512xf32, #tpu.memory_space<vmem>>, vector<1x512xf32>
    tpu.vector_store %arg13[%c6_96, %c0_97], %163 {strides = array<i32>} : memref<16x512xf32, #tpu.memory_space<vmem>>, vector<1x512xf32>,
    %165 = arith.mulf %150, %131 : vector<1x512xf32>
    %c7_98 = arith.constant 7 : index
    %c0_99 = arith.constant 0 : index
    %166 = vector.load %arg13[%c7_98, %c0_99] : memref<16x512xf32, #tpu.memory_space<vmem>>, vector<1x512xf32>
    tpu.vector_store %arg13[%c7_98, %c0_99], %165 {strides = array<i32>} : memref<16x512xf32, #tpu.memory_space<vmem>>, vector<1x512xf32>,
    %cst_100 = arith.constant 0.546274245 : f32
    %167 = vector.broadcast %cst_100 : f32 to vector<1x512xf32>
    %168 = arith.mulf %167, %151 : vector<1x512xf32>
    %c8_101 = arith.constant 8 : index
    %c0_102 = arith.constant 0 : index
    %169 = vector.load %arg13[%c8_101, %c0_102] : memref<16x512xf32, #tpu.memory_space<vmem>>, vector<1x512xf32>
    tpu.vector_store %arg13[%c8_101, %c0_102], %168 {strides = array<i32>} : memref<16x512xf32, #tpu.memory_space<vmem>>, vector<1x512xf32>,
    %cst_103 = arith.constant -2.28522897 : f32
    %170 = vector.broadcast %cst_103 : f32 to vector<1x512xf32>
    %171 = arith.mulf %170, %148 : vector<1x512xf32>
    %cst_104 = arith.constant 0.457045794 : f32
    %172 = vector.broadcast %cst_104 : f32 to vector<1x512xf32>
    %173 = arith.addf %171, %172 : vector<1x512xf32>
    %cst_105 = arith.constant 1.44530571 : f32
    %174 = vector.broadcast %cst_105 : f32 to vector<1x512xf32>
    %175 = arith.mulf %174, %133 : vector<1x512xf32>
    %176 = arith.mulf %131, %151 : vector<1x512xf32>
    %177 = arith.mulf %132, %154 : vector<1x512xf32>
    %178 = arith.subf %176, %177 : vector<1x512xf32>
    %179 = arith.mulf %131, %154 : vector<1x512xf32>
    %180 = arith.mulf %132, %151 : vector<1x512xf32>
    %181 = arith.addf %179, %180 : vector<1x512xf32>
    %cst_106 = arith.constant -0.590043604 : f32
    %182 = vector.broadcast %cst_106 : f32 to vector<1x512xf32>
    %183 = arith.mulf %182, %181 : vector<1x512xf32>
    %c9_107 = arith.constant 9 : index
    %c0_108 = arith.constant 0 : index
    %184 = vector.load %arg13[%c9_107, %c0_108] : memref<16x512xf32, #tpu.memory_space<vmem>>, vector<1x512xf32>
    tpu.vector_store %arg13[%c9_107, %c0_108], %183 {strides = array<i32>} : memref<16x512xf32, #tpu.memory_space<vmem>>, vector<1x512xf32>,
    %185 = arith.mulf %175, %154 : vector<1x512xf32>
    %c10_109 = arith.constant 10 : index
    %c0_110 = arith.constant 0 : index
    %186 = vector.load %arg13[%c10_109, %c0_110] : memref<16x512xf32, #tpu.memory_space<vmem>>, vector<1x512xf32>
    tpu.vector_store %arg13[%c10_109, %c0_110], %185 {strides = array<i32>} : memref<16x512xf32, #tpu.memory_space<vmem>>, vector<1x512xf32>,
    %187 = arith.mulf %173, %132 : vector<1x512xf32>
    %c11_111 = arith.constant 11 : index
    %c0_112 = arith.constant 0 : index
    %188 = vector.load %arg13[%c11_111, %c0_112] : memref<16x512xf32, #tpu.memory_space<vmem>>, vector<1x512xf32>
    tpu.vector_store %arg13[%c11_111, %c0_112], %187 {strides = array<i32>} : memref<16x512xf32, #tpu.memory_space<vmem>>, vector<1x512xf32>,
    %cst_113 = arith.constant 1.86588168 : f32
    %189 = vector.broadcast %cst_113 : f32 to vector<1x512xf32>
    %190 = arith.mulf %189, %148 : vector<1x512xf32>
    %cst_114 = arith.constant 1.11952901 : f32
    %191 = vector.broadcast %cst_114 : f32 to vector<1x512xf32>
    %192 = arith.subf %190, %191 : vector<1x512xf32>
    %193 = arith.mulf %133, %192 : vector<1x512xf32>
    %c12_115 = arith.constant 12 : index
    %c0_116 = arith.constant 0 : index
    %194 = vector.load %arg13[%c12_115, %c0_116] : memref<16x512xf32, #tpu.memory_space<vmem>>, vector<1x512xf32>
    tpu.vector_store %arg13[%c12_115, %c0_116], %193 {strides = array<i32>} : memref<16x512xf32, #tpu.memory_space<vmem>>, vector<1x512xf32>,
    %195 = arith.mulf %173, %131 : vector<1x512xf32>
    %c13_117 = arith.constant 13 : index
    %c0_118 = arith.constant 0 : index
    %196 = vector.load %arg13[%c13_117, %c0_118] : memref<16x512xf32, #tpu.memory_space<vmem>>, vector<1x512xf32>
    tpu.vector_store %arg13[%c13_117, %c0_118], %195 {strides = array<i32>} : memref<16x512xf32, #tpu.memory_space<vmem>>, vector<1x512xf32>,
    %197 = arith.mulf %175, %151 : vector<1x512xf32>
    %c14_119 = arith.constant 14 : index
    %c0_120 = arith.constant 0 : index
    %198 = vector.load %arg13[%c14_119, %c0_120] : memref<16x512xf32, #tpu.memory_space<vmem>>, vector<1x512xf32>
    tpu.vector_store %arg13[%c14_119, %c0_120], %197 {strides = array<i32>} : memref<16x512xf32, #tpu.memory_space<vmem>>, vector<1x512xf32>,
    %cst_121 = arith.constant -0.590043604 : f32
    %199 = vector.broadcast %cst_121 : f32 to vector<1x512xf32>
    %200 = arith.mulf %199, %178 : vector<1x512xf32>
    %c15_122 = arith.constant 15 : index
    %c0_123 = arith.constant 0 : index
    %201 = vector.load %arg13[%c15_122, %c0_123] : memref<16x512xf32, #tpu.memory_space<vmem>>, vector<1x512xf32>
    tpu.vector_store %arg13[%c15_122, %c0_123], %200 {strides = array<i32>} : memref<16x512xf32, #tpu.memory_space<vmem>>, vector<1x512xf32>,
    %c0_124 = arith.constant 0 : index
    %c0_125 = arith.constant 0 : index
    %202 = vector.load %arg7[%c0_124, %c0_125] : memref<64x16xf32, #tpu.memory_space<vmem>>, vector<64x16xf32>
    %c0_126 = arith.constant 0 : index
    %c0_127 = arith.constant 0 : index
    %203 = vector.load %arg13[%c0_126, %c0_127] : memref<16x512xf32, #tpu.memory_space<vmem>>, vector<16x512xf32>
    %cst_128 = arith.constant dense<0.000000e+00> : vector<64x512xf32>
    %204 = tpu.matmul %202, %203, %cst_128 {dimension_numbers = #tpu.dot_dimension_numbers<[1], [0], [0], [1], [0, 0, 1, 1], [], []>} : vector<64x16xf32>, vector<16x512xf32>, vector<64x512xf32> -> vector<64x512xf32>
    %205 = arith.addf %2, %204 : vector<64x512xf32>
    %c1_129 = arith.constant 1 : index
    %c0_130 = arith.constant 0 : index
    %c0_131 = arith.constant 0 : index
    %206 = vector.load %arg5[%c1_129, %c0_130, %c0_131] : memref<2x64x1xf32, #tpu.memory_space<vmem>>, vector<1x64x1xf32>
    %207 = vector.shape_cast %206 : vector<1x64x1xf32> to vector<64x1xf32>
    %208 = vector.broadcast %207 : vector<64x1xf32> to vector<64x512xf32>
    %209 = arith.addf %205, %208 : vector<64x512xf32>
    %cst_132 = arith.constant 0.000000e+00 : f32
    %210 = vector.broadcast %cst_132 : f32 to vector<64x512xf32>
    %211 = arith.maximumf %209, %210 : vector<64x512xf32>
    %c0_133 = arith.constant 0 : index
    %c0_134 = arith.constant 0 : index
    %212 = vector.load %arg8[%c0_133, %c0_134] : memref<64x64xf32, #tpu.memory_space<vmem>>, vector<64x64xf32>
    %cst_135 = arith.constant dense<0.000000e+00> : vector<64x512xf32>
    %213 = tpu.matmul %212, %211, %cst_135 {dimension_numbers = #tpu.dot_dimension_numbers<[1], [0], [0], [1], [0, 0, 1, 1], [], []>} : vector<64x64xf32>, vector<64x512xf32>, vector<64x512xf32> -> vector<64x512xf32>
    %c0_136 = arith.constant 0 : index
    %c0_137 = arith.constant 0 : index
    %214 = vector.load %arg9[%c0_136, %c0_137] : memref<64x1xf32, #tpu.memory_space<vmem>>, vector<64x1xf32>
    %215 = vector.broadcast %214 : vector<64x1xf32> to vector<64x512xf32>
    %216 = arith.addf %213, %215 : vector<64x512xf32>
    %cst_138 = arith.constant 0.000000e+00 : f32
    %217 = vector.broadcast %cst_138 : f32 to vector<64x512xf32>
    %218 = arith.maximumf %216, %217 : vector<64x512xf32>
    %c0_139 = arith.constant 0 : index
    %c0_140 = arith.constant 0 : index
    %219 = vector.load %arg10[%c0_139, %c0_140] : memref<3x64xf32, #tpu.memory_space<vmem>>, vector<3x64xf32>
    %cst_141 = arith.constant dense<0.000000e+00> : vector<3x512xf32>
    %220 = tpu.matmul %219, %218, %cst_141 {dimension_numbers = #tpu.dot_dimension_numbers<[1], [0], [0], [1], [0, 0, 1, 1], [], []>} : vector<3x64xf32>, vector<64x512xf32>, vector<3x512xf32> -> vector<3x512xf32>
    %c0_142 = arith.constant 0 : index
    %c0_143 = arith.constant 0 : index
    %221 = vector.load %arg11[%c0_142, %c0_143] : memref<3x1xf32, #tpu.memory_space<vmem>>, vector<3x1xf32>
    %222 = vector.broadcast %221 : vector<3x1xf32> to vector<3x512xf32>
    %223 = arith.addf %220, %222 : vector<3x512xf32>
    %224 = arith.negf %223 : vector<3x512xf32>
    %225 = math.exp %224 : vector<3x512xf32>
    %cst_144 = arith.constant 1.000000e+00 : f32
    %226 = vector.broadcast %cst_144 : f32 to vector<3x512xf32>
    %227 = arith.addf %226, %225 : vector<3x512xf32>
    %228 = arith.divf %226, %227 : vector<3x512xf32>
    %229 = arith.addf %228, %4 : vector<3x512xf32>
    %c1_145 = arith.constant 1 : index
    %c0_146 = arith.constant 0 : index
    %c0_147 = arith.constant 0 : index
    %230 = vector.load %arg12[%c1_145, %c0_146, %c0_147] : memref<2x3x512xf32, #tpu.memory_space<vmem>>, vector<1x3x512xf32>
    %231 = vector.shape_cast %230 : vector<1x3x512xf32> to vector<3x512xf32>
    %232 = vector.shape_cast %229 : vector<3x512xf32> to vector<1x3x512xf32>
    tpu.vector_store %arg12[%c1_145, %c0_146, %c0_147], %232 {strides = array<i32>} : memref<2x3x512xf32, #tpu.memory_space<vmem>>, vector<1x3x512xf32>,
    return
  }
  func.func @transform_0(%arg0: i32, %arg1: i32) -> (i32, i32) {
    %c0_i32 = arith.constant 0 : i32
    %c0_i32_0 = arith.constant 0 : i32
    return %c0_i32, %arg0 : i32, i32
  }
  func.func @transform_1(%arg0: i32, %arg1: i32) -> (i32, i32) {
    %c0_i32 = arith.constant 0 : i32
    %c0_i32_0 = arith.constant 0 : i32
    return %c0_i32, %arg0 : i32, i32
  }
  func.func @transform_2(%arg0: i32, %arg1: i32) -> (i32, i32, i32) {
    %c0_i32 = arith.constant 0 : i32
    %c0_i32_0 = arith.constant 0 : i32
    %c0_i32_1 = arith.constant 0 : i32
    return %arg1, %c0_i32, %c0_i32_0 : i32, i32, i32
  }
  func.func @transform_3(%arg0: i32, %arg1: i32) -> (i32, i32, i32) {
    %c0_i32 = arith.constant 0 : i32
    %c0_i32_0 = arith.constant 0 : i32
    %c0_i32_1 = arith.constant 0 : i32
    return %arg1, %c0_i32, %c0_i32_0 : i32, i32, i32
  }
  func.func @transform_4(%arg0: i32, %arg1: i32) -> (i32, i32) {
    %c0_i32 = arith.constant 0 : i32
    %c0_i32_0 = arith.constant 0 : i32
    %c0_i32_1 = arith.constant 0 : i32
    return %c0_i32, %c0_i32_0 : i32, i32
  }
  func.func @transform_5(%arg0: i32, %arg1: i32) -> (i32, i32) {
    %c0_i32 = arith.constant 0 : i32
    %c0_i32_0 = arith.constant 0 : i32
    %c0_i32_1 = arith.constant 0 : i32
    return %c0_i32, %c0_i32_0 : i32, i32
  }
  func.func @transform_6(%arg0: i32, %arg1: i32) -> (i32, i32) {
    %c0_i32 = arith.constant 0 : i32
    %c0_i32_0 = arith.constant 0 : i32
    %c0_i32_1 = arith.constant 0 : i32
    return %c0_i32, %c0_i32_0 : i32, i32
  }
  func.func @transform_7(%arg0: i32, %arg1: i32) -> (i32, i32) {
    %c0_i32 = arith.constant 0 : i32
    %c0_i32_0 = arith.constant 0 : i32
    %c0_i32_1 = arith.constant 0 : i32
    return %c0_i32, %c0_i32_0 : i32, i32
  }
  func.func @transform_8(%arg0: i32, %arg1: i32) -> (i32, i32) {
    %c0_i32 = arith.constant 0 : i32
    %c0_i32_0 = arith.constant 0 : i32
    %c0_i32_1 = arith.constant 0 : i32
    return %c0_i32, %c0_i32_0 : i32, i32
  }
  func.func @transform_9(%arg0: i32, %arg1: i32) -> (i32, i32) {
    %c0_i32 = arith.constant 0 : i32
    %c0_i32_0 = arith.constant 0 : i32
    %c0_i32_1 = arith.constant 0 : i32
    return %c0_i32, %c0_i32_0 : i32, i32
  }
  func.func @transform_10(%arg0: i32, %arg1: i32) -> (i32, i32, i32) {
    %c0_i32 = arith.constant 0 : i32
    %c0_i32_0 = arith.constant 0 : i32
    return %arg1, %c0_i32, %arg0 : i32, i32, i32
  }
}

</mosaic_0001>

<bundles_post_ra>
// kernel: view_dependent_color_mlp.1
= control target key start
LH: loop header
LB: loop body
LE: loop exit
PB: predicated region body
PF: predicated region fallthrough
CT: control target
= control target key end

     0   :  { %s4641_s13 = smov 0   ;;  %s4643_s14 = smov 0   ;;  %s6208_s0 = inlined_call_operand.vmem [shape: f32[32,1024], index: 0, kind: input, shape index: {}]   ;;  %s6209_s1 = inlined_call_operand.vmem [shape: f32[8,1024], index: 1, kind: input, shape index: {}]   ;;  %s6210_s2 = inlined_call_operand.vmem [shape: f32[2,3,1], index: 2, kind: input, shape index: {}]   ;;  %s6211_s3 = inlined_call_operand.vmem [shape: f32[2,64,1], index: 3, kind: input, shape index: {}]   ;;  %s6212_s4 = inlined_call_operand.vmem [shape: f32[64,32], index: 4, kind: input, shape index: {}]   ;;  %s6213_s5 = inlined_call_operand.vmem [shape: f32[64,16], index: 5, kind: input, shape index: {}]   ;;  %s6214_s6 = inlined_call_operand.vmem [shape: f32[64,64], index: 6, kind: input, shape index: {}]   ;;  %s6215_s7 = inlined_call_operand.vmem [shape: f32[64,1], index: 7, kind: input, shape index: {}]   ;;  %s6216_s8 = inlined_call_operand.vmem [shape: f32[3,64], index: 8, kind: input, shape index: {}]   ;;  %s6217_s9 = inlined_call_operand.vmem [shape: f32[3,1], index: 9, kind: input, shape index: {}]   ;;  %s6218_s10 = inlined_call_operand.vmem [shape: f32[2,3,1024], index: 10, kind: output, shape index: {}]  }
   0x1   :  { %s4645_s15 = smov 0   ;;  %s4647_s16 = smov 0  }
   0x2   :  { %s4649_s17 = smov 0  }
   0x3 LB: > { %s32_s18 = sadd.s32 1, %s4576_s16  ;;  %s4308_s19 = sadd.s32 4294967295, %s4580_s17   ;;  %s4580_s17 = sphi %s4649_s17, %s20_s17   ;;  %s4576_s16 = sphi %s4647_s16, %s6358_s16   ;;  %s4572_s15 = sphi %s4645_s15, %s6357_s15   ;;  %s4568_s14 = sphi %s4643_s14, %s6356_s14   ;;  %s4564_s13 = sphi %s4641_s13, %s6355_s13  }
   0x4   : > { %p34_p0 = scmp.ge.s32.totalorder %s32_s18, 2  ;;  %p46_p1 = scmp.ne.s32.totalorder %s4568_s14, %s4564_s13 }
   0x5   : > { %p47_p2 = scmp.eq.s32.totalorder %s4580_s17, 0  ;;  %p282_p4 = scmp.eq.s32.totalorder %s4308_s19, 1 }
   0x6   : > { %s6360_s18 = smov (%p34_p0, %s32_s18), 0  ;;  %s39_s21 = sadd.s32 1, %s4568_s14 }
   0x7   : > { %p48_p3 = por %p47_p2, %p46_p1  ;;  %s36_s20 = ssub.s32 %s4576_s16, %s6360_s18 }
   0x8   : > { %p37_p5 = scmp.eq.s32.totalorder %s36_s20, 0  ;;  %p4676_p6 = por %p282_p4, %p46_p1 }
   0x9   : > { %p4313_p7 = scmp.ge.s32.totalorder %s4580_s17, 2 }
   0xa   : > { %s4681_s23 = scalar_select %p37_p5, %s4568_s14, %s39_s21  }
   0xb   : > { %341 = sbr.rel (%p4313_p7) target bundleno = 28 (0x1c), region = 48 }
  0x10   : > { %344 = sbr.rel (!%p48_p3) target bundleno = 28 (0x1c), region = 52  ;;  %s346_s24 = sand.u32 (%p48_p3), 1, %s4568_s14  }
  0x11   : > { %s4446_s25 = sshll.u32 (%p48_p3), %s4576_s16, 5  ;;  %s4314_s26 = sshll.u32 (%p48_p3), %s346_s24, 7 }
  0x12   : > { %s4689_s29 = scalar_lea.vmem (%p48_p3), %s6208_s0, %s4446_s25  ;;  %s348_s30 = scalar_lea.vmem (%p48_p3), [#allocation3], %s4314_s26 }
  0x13   : > { %v364_v0 = vld [vmem:[%s4689_s29] sm:$0xff] (%p48_p3)  ;;  %v366_v1 = vld [vmem:[%s4689_s29 + $0x8] sm:$0xff] (%p48_p3)  ;;  %v368_v2 = vld [vmem:[%s4689_s29 + $0x10] sm:$0xff] (%p48_p3) }
  0x14   : > { %365 = vst [vmem:[%s348_s30] sm:$0xff] (%p48_p3), %v364_v0  ;;  %367 = vst [vmem:[%s348_s30 + $0x8] sm:$0xff] (%p48_p3), %v366_v1  ;;  %v370_v3 = vld [vmem:[%s4689_s29 + $0x18] sm:$0xff] (%p48_p3)  ;;  %v372_v4 = vld [vmem:[%s4689_s29 + $0x40] sm:$0xff] (%p48_p3) }
  0x15   : > { %369 = vst [vmem:[%s348_s30 + $0x10] sm:$0xff] %v368_v2  ;;  %v374_v5 = vld [vmem:[%s4689_s29 + $0x48] sm:$0xff]  ;;  %371 = vst [vmem:[%s348_s30 + $0x18] sm:$0xff] %v370_v3  ;;  %v376_v6 = vld [vmem:[%s4689_s29 + $0x50] sm:$0xff] }
  0x16   : > { %373 = vst [vmem:[%s348_s30 + $0x20] sm:$0xff] %v372_v4  ;;  %375 = vst [vmem:[%s348_s30 + $0x28] sm:$0xff] %v374_v5  ;;  %v378_v7 = vld [vmem:[%s4689_s29 + $0x58] sm:$0xff]  ;;  %v380_v8 = vld [vmem:[%s4689_s29 + $0x80] sm:$0xff] }
  0x17   : > { %377 = vst [vmem:[%s348_s30 + $0x30] sm:$0xff] %v376_v6  ;;  %379 = vst [vmem:[%s348_s30 + $0x38] sm:$0xff] %v378_v7  ;;  %v382_v9 = vld [vmem:[%s4689_s29 + $0x88] sm:$0xff]  ;;  %v384_v10 = vld [vmem:[%s4689_s29 + $0x90] sm:$0xff] }
  0x18   : > { %381 = vst [vmem:[%s348_s30 + $0x40] sm:$0xff] %v380_v8  ;;  %v386_v11 = vld [vmem:[%s4689_s29 + $0x98] sm:$0xff]  ;;  %383 = vst [vmem:[%s348_s30 + $0x48] sm:$0xff] %v382_v9  ;;  %v388_v12 = vld [vmem:[%s4689_s29 + $0xc0] sm:$0xff] }
  0x19   : > { %385 = vst [vmem:[%s348_s30 + $0x50] sm:$0xff] %v384_v10  ;;  %387 = vst [vmem:[%s348_s30 + $0x58] sm:$0xff] %v386_v11  ;;  %v390_v13 = vld [vmem:[%s4689_s29 + $0xc8] sm:$0xff]  ;;  %v392_v14 = vld [vmem:[%s4689_s29 + $0xd0] sm:$0xff] }
  0x1a   : > { %389 = vst [vmem:[%s348_s30 + $0x60] sm:$0xff] %v388_v12  ;;  %391 = vst [vmem:[%s348_s30 + $0x68] sm:$0xff] %v390_v13  ;;  %v394_v15 = vld [vmem:[%s4689_s29 + $0xd8] sm:$0xff] }
  0x1b   : > { %393 = vst [vmem:[%s348_s30 + $0x70] sm:$0xff] %v392_v14  ;;  %395 = vst [vmem:[%s348_s30 + $0x78] sm:$0xff] %v394_v15 }
  0x1c PF: > { %p4317_p8 = scmp.ge.s32.totalorder %s4580_s17, 1  ;;  %p409_p9 = scmp.lt.s32.totalorder %s4580_s17, 3 }
  0x1e   : > { %p410_p10 = pnand %p4317_p8, %p409_p9 }
  0x20   : > { %413 = sbr.rel (%p410_p10) target bundleno = 1509 (0x5e5), region = 79 }
  0x25   : > { %v773_v16 = vld [vmem:[%s6210_s2] sm:$0x7]  ;;  %v4582_v17 = vmov 0   ;;  %v1837_v18 = vld [vmem:[%s6211_s3 + $0x38] sm:$0xff]  ;;  %v1832_v20 = vld [vmem:[%s6211_s3 + $0x10] sm:$0xff]  ;;  %s416_s19 = sand.u32 1, %s4564_s13   ;;  %v828_v56 = vlaneseq }
  0x26   : > { %4492 = vset.pattern.permute.xlu0 %v4582_v17  ;;  %4493 = vset.pattern.permute.xlu1 %v4582_v17  ;;  %v1834_v19 = vld [vmem:[%s6211_s3 + $0x20] sm:$0xff]  ;;  %v4727_v22 = vld [vmem:[%s6215_s7 + $0x38] sm:$0xff]  ;;  %v4733_v23 = vld [vmem:[%s6215_s7 + $0x28] sm:$0xff]  ;;  %s4318_s24 = sshll.u32 %s416_s19, 7  ;;  %vm514_vm0 = vcmask 261120   ;;  %v6219_v45 = vmov 0.0  }
  0x27   : > { %776 = vperm.xlu0 %4492, %v773_v16   ;;  %v1830_v21 = vld [vmem:[%s6211_s3] sm:$0xff]  ;;  %v4740_v24 = vld [vmem:[%s6215_s7 + $0x18] sm:$0xff]  ;;  %s4744_s25 = scalar_lea.vmem [#allocation3], %s4318_s24  ;;  %v4754_v29 = vld [vmem:[%s6215_s7 + $0x8] sm:$0xff]  ;;  %603 = vmatprep.mubr.f32.mxu0 %v6219_v45  ;;  %vm4847_vm1 = vcmp.lt.s32.totalorder %v828_v56, 512  ;;  %s4320_s12 = sshll.u32 %s4572_s15, 2 }
  0x28   : > { %v511_v25 = vld [vmem:[%s4744_s25 + $0x68] sm:$0xff]  ;;  %v513_v26 = vld [vmem:[%s4744_s25 + $0x78] sm:$0xff]  ;;  %v510_v27 = vld [vmem:[%s4744_s25 + $0x60] sm:$0xff]  ;;  %716 = vmatprep.mubr.f32.mxu1 %v6219_v45  ;;  %v6221_v58 = vmov 0.2820948   ;;  %p470_p11 = scmp.lt.s32.totalorder %s4320_s12, 7 }
  0x29   : > { %563 = vmatprep.subr.mxu0 %v511_v25  ;;  %v512_v28 = vld [vmem:[%s4744_s25 + $0x70] sm:$0xff]  ;;  %676 = vmatprep.subr.mxu1 %v513_v26  ;;  %v507_v30 = vld [vmem:[%s4744_s25 + $0x48] sm:$0xff]  ;;  %v509_v31 = vld [vmem:[%s4744_s25 + $0x58] sm:$0xff]  ;;  %832 = vst.msk [vmem:[#allocation2] ss:$8 sm:$0xf] %vm4847_vm1, %v6221_v58 }
  0x2a   : > { %564 = vmatpush1.msra.mxu0 %v510_v27  ;;  %677 = vmatpush1.msra.mxu1 %v512_v28  ;;  %v506_v32 = vld [vmem:[%s4744_s25 + $0x40] sm:$0xff]  ;;  %v508_v33 = vld [vmem:[%s4744_s25 + $0x50] sm:$0xff]  ;;  %v503_v34 = vld [vmem:[%s4744_s25 + $0x28] sm:$0xff]  ;;  %s6362_s12 = smov (!%p470_p11, %s4320_s12), 7  ;;  %vm787_vm2 = vcmask 1042432   ;;  %vm1547_vm3 = vcmask 130048  }
  0x2b   : > { %1875 = vperm.xlu0 %4492, %v1837_v18   ;;  %565 = vmatprep.subr.mxu0 %v507_v30  ;;  %v505_v35 = vld [vmem:[%s4744_s25 + $0x38] sm:$0xff]  ;;  %v502_v36 = vld [vmem:[%s4744_s25 + $0x20] sm:$0xff]  ;;  %v504_v37 = vld [vmem:[%s4744_s25 + $0x30] sm:$0xff]  ;;  %s4321_s20 = sshll.u32 %s6362_s12, 3  ;;  %vm1998_vm4 = vcmask 523264   ;;  %s4447_s29 = sshll.u32 (%p4676_p6), %s4572_s15, 4 }
  0x2c   : > { %678 = vmatprep.subr.mxu1 %v509_v31  ;;  %566 = vmatpush1.msra.mxu0 %v506_v32  ;;  %v499_v38 = vld [vmem:[%s4744_s25 + $0x8] sm:$0xff]  ;;  %v4416_v39 = vld [vmem:[%s6211_s3 + $0x78] sm:$0xff]  ;;  %v498_v41 = vld [vmem:[%s4744_s25] sm:$0xff]  ;;  %s4174_s12 = scalar_lea.vmem (%p4676_p6), %s6218_s10, %s4447_s29 }
  0x2d   : > { %679 = vmatpush1.msra.mxu1 %v508_v33  ;;  %567 = vmatprep.subr.mxu0 %v503_v34  ;;  %v501_v40 = vld [vmem:[%s4744_s25 + $0x18] sm:$0xff]  ;;  %v500_v42 = vld [vmem:[%s4744_s25 + $0x10] sm:$0xff]  ;;  %v490_v43 = vld [vmem:[%s6212_s4] sm:$0xff]  ;;  %s4858_s25 = scalar_lea.vmem %s6209_s1, %s4321_s20 }
  0x2e   : > { %680 = vmatprep.subr.mxu1 %v505_v35  ;;  %568 = vmatpush1.msra.mxu0 %v502_v36  ;;  %v4414_v44 = vld [vmem:[%s6211_s3 + $0x68] sm:$0xff]  ;;  %v4412_v47 = vld [vmem:[%s6211_s3 + $0x58] sm:$0xff]  ;;  %v492_v48 = vld [vmem:[%s6212_s4 + $0x10] sm:$0xff] }
  0x2f   : > { %1860 = vperm.xlu0 %4492, %v1834_v19   ;;  %681 = vmatpush1.msra.mxu1 %v504_v37  ;;  %v491_v46 = vld [vmem:[%s6212_s4 + $0x8] sm:$0xff]  ;;  %v493_v50 = vld [vmem:[%s6212_s4 + $0x18] sm:$0xff]  ;;  %v494_v51 = vld [vmem:[%s6212_s4 + $0x20] sm:$0xff] }
  0x30   : > { %569 = vmatprep.subr.mxu0 %v499_v38  ;;  %682 = vmatprep.subr.mxu1 %v501_v40  ;;  %v4410_v49 = vld [vmem:[%s6211_s3 + $0x48] sm:$0xff]  ;;  %v496_v53 = vld [vmem:[%s6212_s4 + $0x30] sm:$0xff]  ;;  %v497_v54 = vld [vmem:[%s6212_s4 + $0x38] sm:$0xff] }
  0x31   : > { %570 = vmatpush1.msra.mxu0 %v498_v41  ;;  %683 = vmatpush1.msra.mxu1 %v500_v42  ;;  %v495_v52 = vld [vmem:[%s6212_s4 + $0x28] sm:$0xff]  ;;  %v2282_v55 = vld [vmem:[%s6217_s9] sm:$0x7]  ;;  %v4867_v61 = vld [vmem:[%s4858_s25 + $0x10] sm:$0x7] }
  0x32   : > { %4322 = vmatmul.mubr.msk.f32.vlgmr.msra.gmra.mxu0 %vm514_vm0, %v490_v43  ;;  %4330 = vmatmul.mubr.msk.f32.vlgmr.msra.gmra.mxu1 %vm514_vm0, %v490_v43  ;;  %v4861_v59 = vld [vmem:[%s4858_s25] sm:$0x7]  ;;  %v4864_v60 = vld [vmem:[%s4858_s25 + $0x8] sm:$0x7]  ;;  %v4870_v62 = vld [vmem:[%s4858_s25 + $0x18] sm:$0x7] }
  0x33   : > { %1850 = vperm.xlu0 %4492, %v1832_v20   ;;  %609 = vmatprep.mubr.f32.mxu0 %v6219_v45  ;;  %v1836_v40 = vld [vmem:[%s6211_s3 + $0x30] sm:$0xff]  ;;  %v1835_v41 = vld [vmem:[%s6211_s3 + $0x28] sm:$0xff]  ;;  %v1833_v42 = vld [vmem:[%s6211_s3 + $0x18] sm:$0xff]  ;;  %v4585_v43 = vmov 1966171168  }
  0x34   : > { %722 = vmatprep.mubr.f32.mxu1 %v6219_v45  ;;  %1870 = vperm.xlu1 %4493, %v1836_v40  }
  0x36   : > { %4323 = vmatmul.mubr.msk.f32.gmra.mxu0 %vm514_vm0, %v491_v46  ;;  %4331 = vmatmul.mubr.msk.f32.gmra.mxu1 %vm514_vm0, %v491_v46  ;;  %v1831_v46 = vld [vmem:[%s6211_s3 + $0x8] sm:$0xff] }
  0x37   : > { %1840 = vperm.xlu0 %4492, %v1830_v21   ;;  %615 = vmatprep.mubr.f32.mxu0 %v6219_v45 }
  0x38   : > { %728 = vmatprep.mubr.f32.mxu1 %v6219_v45  ;;  %1865 = vperm.xlu1 %4493, %v1835_v41  }
  0x3a   : > { %4324 = vmatmul.mubr.msk.f32.gmra.mxu0 %vm514_vm0, %v492_v48  ;;  %4332 = vmatmul.mubr.msk.f32.gmra.mxu1 %vm514_vm0, %v492_v48  ;;  %v848_v48 = vshrl.u32 %v828_v56, 7 }
  0x3b   : > { %1995 = vperm.xlu0 %4492, %v4727_v22   ;;  %621 = vmatprep.mubr.f32.mxu0 %v6219_v45 }
  0x3c   : > { %734 = vmatprep.mubr.f32.mxu1 %v6219_v45  ;;  %1855 = vperm.xlu1 %4493, %v1833_v42  }
  0x3e   : > { %4325 = vmatmul.mubr.msk.f32.gmra.mxu0 %vm514_vm0, %v493_v50  ;;  %4333 = vmatmul.mubr.msk.f32.gmra.mxu1 %vm514_vm0, %v493_v50  ;;  %v4384_v50 = vld [vmem:[%s6210_s2 + $0x4] sm:$0x7] }
  0x3f   : > { %1985 = vperm.xlu0 %4492, %v4733_v23   ;;  %627 = vmatprep.mubr.f32.mxu0 %v6219_v45 }
  0x40   : > { %740 = vmatprep.mubr.f32.mxu1 %v6219_v45  ;;  %1845 = vperm.xlu1 %4493, %v1831_v46  }
  0x42   : > { %4326 = vmatmul.mubr.msk.f32.gmra.mxu0 %vm514_vm0, %v494_v51  ;;  %4334 = vmatmul.mubr.msk.f32.gmra.mxu1 %vm514_vm0, %v494_v51 }
  0x43   : > { %1975 = vperm.xlu0 %4492, %v4740_v24   ;;  %633 = vmatprep.mubr.f32.mxu0 %v6219_v45 }
  0x44   : > { %746 = vmatprep.mubr.f32.mxu1 %v6219_v45  ;;  %2487 = vperm.xlu1 %4493, %v4384_v50  }
  0x46   : > { %4327 = vmatmul.mubr.msk.f32.gmra.mxu0 %vm514_vm0, %v495_v52  ;;  %4335 = vmatmul.mubr.msk.f32.gmra.mxu1 %vm514_vm0, %v495_v52 }
  0x47   : > { %1965 = vperm.xlu0 %4492, %v4754_v29   ;;  %639 = vmatprep.mubr.f32.mxu0 %v6219_v45 }
  0x48   : > { %752 = vmatprep.mubr.f32.mxu1 %v6219_v45 }
  0x4a   : > { %4328 = vmatmul.mubr.msk.f32.gmra.mxu0 %vm514_vm0, %v496_v53  ;;  %4336 = vmatmul.mubr.msk.f32.gmra.mxu1 %vm514_vm0, %v496_v53 }
  0x4b   : > { %3566 = vperm.xlu0 %4492, %v4416_v39   ;;  %645 = vmatprep.mubr.f32.mxu0 %v6219_v45 }
  0x4c   : > { %758 = vmatprep.mubr.f32.mxu1 %v6219_v45 }
  0x4e   : > { %4329 = vmatmul.mubr.msk.f32.gmra.mxu0 %vm514_vm0, %v497_v54  ;;  %4337 = vmatmul.mubr.msk.f32.gmra.mxu1 %vm514_vm0, %v497_v54 }
  0x4f   : > { %3556 = vperm.xlu0 %4492, %v4414_v44   ;;  %1636 = vmatprep.mubr.f32.mxu0 %v6219_v45  ;;  %v845_v44 = vunpack.c.l.s4 %v4585_v43 }
  0x50   : > { %1749 = vmatprep.mubr.f32.mxu1 %v6219_v45 }
  0x53   : > { %3546 = vperm.xlu0 %4492, %v4412_v47   ;;  %v846_v47 = vunpack.c.0.s8 %v845_v44 }
  0x57   : > { %3536 = vperm.xlu0 %4492, %v4410_v49  }
  0x5b   : > { %3686 = vperm.xlu0 %4492, %v4727_v22  }
  0x5f   : > { %3676 = vperm.xlu0 %4492, %v4733_v23  }
  0x63   : > { %3666 = vperm.xlu0 %4492, %v4740_v24  }
  0x67   : > { %3656 = vperm.xlu0 %4492, %v4754_v29  }
  0x6b   : > { %2285 = vperm.xlu0 %4492, %v2282_v55   ;;  %v4908_v55 = vsub.s32 %v846_v47, %v848_v48 }
  0xa2   : > { %v777_v63 = vpop.permute.xlu0 %776 }
  0xa3   : > { %v779_v0 = vsub.f32 %v4861_v59, %v777_v63  ;;  %v780_v1 = vsub.f32 %v4864_v60, %v777_v63  ;;  %v4875_v2 = vsub.f32 %v4867_v61, %v777_v63  ;;  %v4878_v3 = vsub.f32 %v4870_v62, %v777_v63 }
  0xa5   : > { %v783_v4 = vmul.f32 %v779_v0, %v779_v0  ;;  %v784_v5 = vmul.f32 %v780_v1, %v780_v1  ;;  %v785_v6 = vmul.f32 %v4875_v2, %v4875_v2  ;;  %v786_v7 = vmul.f32 %v4878_v3, %v4878_v3 }
  0xa7   : > { %v788_v8 = vsel %vm787_vm2, %v783_v4, 0.0  ;;  %v795_v9 = vsel %vm787_vm2, %v784_v5, 0.0  ;;  %v802_v10 = vsel %vm787_vm2, %v785_v6, 0.0  ;;  %v809_v11 = vsel %vm787_vm2, %v786_v7, 0.0 }
  0xa8   : > { %v789_v12 = vrot.slane %v788_v8, 4  ;;  %v796_v13 = vrot.slane %v795_v9, 4  ;;  %v803_v14 = vrot.slane %v802_v10, 4  ;;  %v810_v15 = vrot.slane %v809_v11, 4 }
  0xaa   : > { %v790_v16 = vadd.f32 %v789_v12, %v788_v8  ;;  %v797_v17 = vadd.f32 %v796_v13, %v795_v9  ;;  %v804_v18 = vadd.f32 %v803_v14, %v802_v10  ;;  %v811_v19 = vadd.f32 %v810_v15, %v809_v11  ;;  %v4931_v8 = vld [vmem:[%s6215_s7 + $0x30] sm:$0xff] }
  0xab   : > { %1990 = vperm.xlu1 %4493, %v4931_v8  }
  0xac   : > { %v791_v20 = vrot.slane %v790_v16, 2  ;;  %v798_v21 = vrot.slane %v797_v17, 2  ;;  %v805_v22 = vrot.slane %v804_v18, 2  ;;  %v812_v23 = vrot.slane %v811_v19, 2 }
  0xae   : > { %v792_v24 = vadd.f32 %v791_v20, %v790_v16  ;;  %v799_v25 = vadd.f32 %v798_v21, %v797_v17  ;;  %v806_v26 = vadd.f32 %v805_v22, %v804_v18  ;;  %v813_v27 = vadd.f32 %v812_v23, %v811_v19 }
  0xb0   : > { %v793_v28 = vrot.slane %v792_v24, 1  ;;  %v800_v29 = vrot.slane %v799_v25, 1  ;;  %v807_v30 = vrot.slane %v806_v26, 1  ;;  %v814_v31 = vrot.slane %v813_v27, 1 }
  0xb2   : > { %v794_v32 = vadd.f32 %v793_v28, %v792_v24  ;;  %v801_v33 = vadd.f32 %v800_v29, %v799_v25  ;;  %v808_v34 = vadd.f32 %v807_v30, %v806_v26  ;;  %v815_v35 = vadd.f32 %v814_v31, %v813_v27  ;;  %v4967_v24 = vld [vmem:[%s6215_s7 + $0x20] sm:$0xff] }
  0xb3   : > { %1980 = vperm.xlu1 %4493, %v4967_v24  }
  0xb4   : > { %v816_v36 = vmax.f32 %v794_v32, 1e-24  ;;  %v817_v37 = vmax.f32 %v801_v33, 1e-24  ;;  %v818_v38 = vmax.f32 %v808_v34, 1e-24 }
  0xb5   : > { %v819_v39 = vmax.f32 %v815_v35, 1e-24  ;;  %v4984_v33 = vld [vmem:[%s6215_s7 + $0x10] sm:$0xff] }
  0xb6   : > { %4494 = vrsqrt.f32 %v816_v36 }
  0xb7   : > { %4496 = vrsqrt.f32 %v817_v37  ;;  %1970 = vperm.xlu1 %4493, %v4984_v33  }
  0xb8   : > { %4498 = vrsqrt.f32 %v818_v38 }
  0xb9   : > { %4500 = vrsqrt.f32 %v819_v39 }
  0xc3   : > { %v4495_v49 = vpop.eup %4494 }
  0xc4   : > { %v4497_v51 = vpop.eup %4496  ;;  %v4904_v52 = vmul.f32 %v4495_v49, %v779_v0 }
  0xc5   : > { %v4499_v53 = vpop.eup %4498  ;;  %v4906_v54 = vmul.f32 %v4497_v51, %v780_v1 }
  0xc6   : > { %v4501_v63 = vpop.eup %4500  ;;  %v4911_v4 = vmul.f32 %v4499_v53, %v4875_v2  ;;  %v4915_v56 = vmul.f32 %v4904_v52, %v4904_v52  ;;  %v943_v5 = vmul.f32 2.0, %v4904_v52  ;;  %v951_v6 = vrot.slane %v4904_v52, 1 }
  0xc7   : > { %v4920_v0 = vmul.f32 %v4501_v63, %v4878_v3  ;;  %v4924_v1 = vmul.f32 %v4906_v54, %v4906_v54  ;;  %v944_v7 = vmul.f32 2.0, %v4906_v54  ;;  %v952_v2 = vrot.slane %v4906_v54, 1 }
  0xc8   : > { %v4935_v9 = vmul.f32 %v4911_v4, %v4911_v4  ;;  %v931_v3 = vrot.slane %v4915_v56, 1  ;;  %v945_v10 = vmul.f32 2.0, %v4911_v4  ;;  %v953_v11 = vrot.slane %v4911_v4, 1 }
  0xc9   : > { %v4942_v12 = vmul.f32 %v4920_v0, %v4920_v0  ;;  %v932_v13 = vrot.slane %v4924_v1, 1  ;;  %v946_v14 = vmul.f32 2.0, %v4920_v0  ;;  %v954_v15 = vrot.slane %v4920_v0, 1 }
  0xca   : > { %v933_v16 = vrot.slane %v4935_v9, 1  ;;  %v4949_v17 = vsub.f32 %v4915_v56, %v931_v3  ;;  %v4951_v18 = vmul.f32 %v951_v6, %v943_v5  ;;  %v4953_v19 = vmul.f32 %v952_v2, %v944_v7 }
  0xcb   : > { %v934_v20 = vrot.slane %v4942_v12, 1  ;;  %v4958_v21 = vsub.f32 %v4924_v1, %v932_v13  ;;  %v4960_v22 = vmul.f32 %v953_v11, %v945_v10  ;;  %v4962_v23 = vmul.f32 %v954_v15, %v946_v14  ;;  %v5027_v10 = vld [vmem:[%s6215_s7] sm:$0xff] }
  0xcc   : > { %v4970_v25 = vsub.f32 %v4935_v9, %v933_v16  ;;  %v999_v26 = vrot.slane %v4904_v52, 7  ;;  %v1130_v36 = vmul.f32 0.54627424, %v4949_v17  ;;  %v1166_v40 = vmul.f32 -2.285229, %v4915_v56  ;;  %1960 = vperm.xlu1 %4493, %v5027_v10  }
  0xcd   : > { %v4976_v29 = vsub.f32 %v4942_v12, %v934_v20  ;;  %v1131_v37 = vmul.f32 0.54627424, %v4958_v21  ;;  %v1178_v41 = vmul.f32 %v4949_v17, %v4904_v52  ;;  %v1167_v43 = vmul.f32 -2.285229, %v4924_v1 }
  0xce   : > { %v1132_v38 = vmul.f32 0.54627424, %v4970_v25  ;;  %v1168_v44 = vmul.f32 -2.285229, %v4935_v9  ;;  %v1169_v46 = vmul.f32 -2.285229, %v4942_v12  ;;  %v1179_v3 = vmul.f32 %v4958_v21, %v4906_v54 }
  0xcf   : > { %v1133_v39 = vmul.f32 0.54627424, %v4976_v29  ;;  %v1138_v42 = vcombine.low %v1130_v36, %v1131_v37  ;;  %v4999_v48 = vadd.f32 0.4570458, %v1166_v40  ;;  %v5002_v49 = vmul.f32 1.4453057, %v4904_v52 }
  0xd0   : > { %v5005_v50 = vmul.f32 1.4453057, %v4906_v54  ;;  %v5008_v53 = vadd.f32 0.4570458, %v1167_v43  ;;  %v5010_v63 = vadd.f32 0.4570458, %v1168_v44  ;;  %v1180_v11 = vmul.f32 %v4970_v25, %v4911_v4 }
  0xd1   : > { %v1139_v47 = vcombine.low %v1132_v38, %v1133_v39  ;;  %v1146_v51 = vrot.slane %v1138_v42, %v4908_v55  ;;  %v5012_v5 = vadd.f32 0.4570458, %v1169_v46  ;;  %v5017_v7 = vmul.f32 1.4453057, %v4911_v4 }
  0xd2   : > { %v5020_v2 = vmul.f32 1.4453057, %v4920_v0  ;;  %v1181_v13 = vmul.f32 %v4976_v29, %v4920_v0  ;;  %v1186_v14 = vrot.slane %v4951_v18, 7  ;;  %v1187_v15 = vrot.slane %v4953_v19, 7 }
  0xd3   : > { %v1153_v6 = vrot.slane %v1139_v47, %v4908_v55  ;;  %v1188_v20 = vrot.slane %v4960_v22, 7  ;;  %v1189_v36 = vrot.slane %v4962_v23, 7  ;;  %v1214_v37 = vmul.f32 %v4951_v18, %v4904_v52 }
  0xd4   : > { %v1194_v38 = vmul.f32 %v1186_v14, %v4904_v52  ;;  %v1195_v39 = vmul.f32 %v1187_v15, %v4906_v54  ;;  %v1215_v40 = vmul.f32 %v4953_v19, %v4906_v54  ;;  %v1216_v42 = vmul.f32 %v4960_v22, %v4911_v4 }
  0xd5   : > { %v1154_v16 = vcombine.low %v1146_v51, %v1153_v6  ;;  %v1196_v44 = vmul.f32 %v1188_v20, %v4911_v4  ;;  %v1197_v46 = vmul.f32 %v1189_v36, %v4920_v0  ;;  %v1217_v47 = vmul.f32 %v4962_v23, %v4920_v0  ;;  %v4415_v51 = vld [vmem:[%s6211_s3 + $0x70] sm:$0xff] }
  0xd6   : > { %v1202_v6 = vrot.slane %v1194_v38, 1  ;;  %v1203_v14 = vrot.slane %v1195_v39, 1  ;;  %v1222_v15 = vrot.slane %v4949_v17, 7  ;;  %v1223_v45 = vrot.slane %v4958_v21, 7  ;;  %3561 = vperm.xlu1 %4493, %v4415_v51  }
  0xd7   : > { %v1161_v43 = vrot.slane %v1154_v16, %v4908_v55  ;;  %v1204_v16 = vrot.slane %v1196_v44, 1  ;;  %v1205_v20 = vrot.slane %v1197_v46, 1  ;;  %v1224_v36 = vrot.slane %v4970_v25, 7 }
  0xd8   : > { %v1225_v58 = vrot.slane %v4976_v29, 7  ;;  %v5060_v35 = vsub.f32 %v1178_v41, %v1202_v6  ;;  %v5062_v34 = vsub.f32 %v1179_v3, %v1203_v14  ;;  %v1230_v38 = vmul.f32 %v1222_v15, %v4904_v52  ;;  %v4413_v41 = vld [vmem:[%s6211_s3 + $0x60] sm:$0xff] }
  0xd9   : > { %1164 = vst.msk [vmem:[#allocation2 + $0x20] ss:$8 sm:$0xf] %vm4847_vm1, %v1161_v43  ;;  %v1231_v39 = vmul.f32 %v1223_v45, %v4906_v54  ;;  %v5066_v32 = vsub.f32 %v1180_v11, %v1204_v16  ;;  %v5068_v31 = vsub.f32 %v1181_v13, %v1205_v20  ;;  %v1232_v43 = vmul.f32 %v1224_v36, %v4911_v4 }
  0xda   : > { %v1233_v44 = vmul.f32 %v1225_v58, %v4920_v0  ;;  %v1238_v46 = vrot.slane %v1230_v38, 1  ;;  %v1286_v6 = vrot.slane %v4951_v18, 6  ;;  %v1287_v14 = vrot.slane %v4953_v19, 6  ;;  %3551 = vperm.xlu1 %4493, %v4413_v41  }
  0xdb   : > { %v1239_v3 = vrot.slane %v1231_v39, 1  ;;  %v1240_v45 = vrot.slane %v1232_v43, 1  ;;  %v1288_v11 = vrot.slane %v4960_v22, 6  ;;  %v1289_v13 = vrot.slane %v4962_v23, 6  ;;  %v4411_v43 = vld [vmem:[%s6211_s3 + $0x50] sm:$0xff] }
  0xdc   : > { %v1241_v51 = vrot.slane %v1233_v44, 1  ;;  %v1246_v15 = vadd.f32 %v1238_v46, %v1214_v37  ;;  %v1294_v58 = vmul.f32 %v1286_v6, %v5002_v49  ;;  %v1295_v20 = vmul.f32 %v1287_v14, %v5005_v50 }
  0xdd   : > { %v1247_v16 = vadd.f32 %v1239_v3, %v1215_v40  ;;  %v1248_v36 = vadd.f32 %v1240_v45, %v1216_v42  ;;  %v1296_v39 = vmul.f32 %v1288_v11, %v5017_v7  ;;  %v1297_v30 = vmul.f32 %v1289_v13, %v5020_v2 }
  0xde   : > { %v1249_v38 = vadd.f32 %v1241_v51, %v1217_v47  ;;  %v1250_v44 = vmul.f32 -0.5900436, %v1246_v15  ;;  %v1302_v27 = vcombine.low %v1294_v58, %v1295_v20  ;;  %v1331_v37 = vmul.f32 %v4999_v48, %v999_v26  ;;  %3541 = vperm.xlu1 %4493, %v4411_v43  }
  0xdf   : > { %v1251_v28 = vmul.f32 -0.5900436, %v1247_v16  ;;  %v1252_v40 = vmul.f32 -0.5900436, %v1248_v36  ;;  %v1303_v41 = vcombine.low %v1296_v39, %v1297_v30  ;;  %v6257_v42 = vrot.slane %v4906_v54, 7 }
  0xe0   : > { %v1253_v46 = vmul.f32 -0.5900436, %v1249_v38  ;;  %v1310_v6 = vrot.slane %v1302_v27, %v4908_v55  ;;  %v6258_v14 = vrot.slane %v4911_v4, 7  ;;  %v6259_v51 = vrot.slane %v4920_v0, 7 }
  0xe1   : > { %v1332_v47 = vmul.f32 %v5008_v53, %v6257_v42  ;;  %v1258_v3 = vcombine.low %v1250_v44, %v1251_v28  ;;  %v1317_v15 = vrot.slane %v1303_v41, %v4908_v55  ;;  %v1368_v16 = vmul.f32 1.8658817, %v4915_v56  ;;  %v4409_v28 = vld [vmem:[%s6211_s3 + $0x40] sm:$0xff] }
  0xe2   : > { %v1333_v45 = vmul.f32 %v5010_v63, %v6258_v14  ;;  %v1334_v11 = vmul.f32 %v5012_v5, %v6259_v51  ;;  %v1259_v13 = vcombine.low %v1252_v40, %v1253_v46  ;;  %v1369_v20 = vmul.f32 1.8658817, %v4924_v1  ;;  %3531 = vperm.xlu1 %4493, %v4409_v28  }
  0xe3   : > { %v1339_v30 = vcombine.low %v1331_v37, %v1332_v47  ;;  %v1266_v27 = vrot.slane %v1258_v3, %v4908_v55  ;;  %v1370_v36 = vmul.f32 1.8658817, %v4935_v9  ;;  %v1318_v39 = vcombine.low %v1310_v6, %v1317_v15 }
  0xe4   : > { %v1340_v58 = vcombine.low %v1333_v45, %v1334_v11  ;;  %v1273_v38 = vrot.slane %v1259_v13, %v4908_v55  ;;  %v1371_v44 = vmul.f32 1.8658817, %v4942_v12  ;;  %v4342_v40 = vadd.f32 -1.119529, %v1368_v16 }
  0xe5   : > { %v1347_v43 = vrot.slane %v1339_v30, %v4908_v55  ;;  %v4343_v46 = vadd.f32 -1.119529, %v1369_v20  ;;  %v4344_v41 = vadd.f32 -1.119529, %v1370_v36  ;;  %v1325_v47 = vrot.slane %v1318_v39, %v4908_v55 }
  0xe6   : > { %v1354_v37 = vrot.slane %v1340_v58, %v4908_v55  ;;  %v1274_v42 = vcombine.low %v1266_v27, %v1273_v38  ;;  %v4345_v3 = vadd.f32 -1.119529, %v1371_v44  ;;  %v6260_v14 = vrot.slane %v4904_v52, 6  ;;  %3681 = vperm.xlu1 %4493, %v4931_v8  }
  0xe7   : > { %v1376_v6 = vmul.f32 %v4342_v40, %v4904_v52  ;;  %v1377_v11 = vmul.f32 %v4343_v46, %v4906_v54  ;;  %v1378_v13 = vmul.f32 %v4344_v41, %v4911_v4  ;;  %v1326_v30 = vcombine.high %v1325_v47, %v1325_v47 }
  0xe8   : > { %v1413_v45 = vmul.f32 %v4999_v48, %v6260_v14  ;;  %v1355_v51 = vcombine.low %v1347_v43, %v1354_v37  ;;  %v1281_v15 = vrot.slane %v1274_v42, %v4908_v55  ;;  %v1379_v16 = vmul.f32 %v4345_v3, %v4920_v0 }
  0xe9   : > { %v6261_v28 = vrot.slane %v4906_v54, 6  ;;  %v1384_v20 = vcombine.low %v1376_v6, %v1377_v11  ;;  %v6262_v48 = vrot.slane %v4911_v4, 6  ;;  %v6263_v38 = vrot.slane %v4920_v0, 6  ;;  %1329 = vst.msk [vmem:[#allocation2 + $0x22] ss:$8 sm:$0xf] %vm4847_vm1, %v1326_v30 }
  0xea   : > { %v1362_v58 = vrot.slane %v1355_v51, %v4908_v55  ;;  %1284 = vst.msk [vmem:[#allocation2 + $0x21] ss:$8 sm:$0xf] %vm4847_vm1, %v1281_v15  ;;  %v1450_v44 = vrot.slane %v4949_v17, 6  ;;  %v1451_v37 = vrot.slane %v4958_v21, 6  ;;  %v1453_v42 = vrot.slane %v4976_v29, 6  ;;  %3671 = vperm.xlu1 %4493, %v4967_v24  }
  0xeb   : > { %v1414_v27 = vmul.f32 %v5008_v53, %v6261_v28  ;;  %v1415_v36 = vmul.f32 %v5010_v63, %v6262_v48  ;;  %v1416_v39 = vmul.f32 %v5012_v5, %v6263_v38  ;;  %v1385_v53 = vcombine.low %v1378_v13, %v1379_v16 }
  0xec   : > { %v1363_v40 = vcombine.high %v1362_v58, %v1362_v58  ;;  %v1392_v63 = vrot.slane %v1384_v20, %v4908_v55  ;;  %v1452_v5 = vrot.slane %v4970_v25, 6  ;;  %v1458_v47 = vmul.f32 %v1450_v44, %v5002_v49 }
  0xed   : > { %v1421_v43 = vcombine.low %v1413_v45, %v1414_v27  ;;  %v1422_v46 = vcombine.low %v1415_v36, %v1416_v39  ;;  %v1399_v8 = vrot.slane %v1385_v53, %v4908_v55  ;;  %v1459_v21 = vmul.f32 %v1451_v37, %v5005_v50 }
  0xee   : > { %1366 = vst.msk [vmem:[#allocation2 + $0x23] ss:$8 sm:$0xf] %vm4847_vm1, %v1363_v40  ;;  %v1460_v3 = vmul.f32 %v1452_v5, %v5017_v7  ;;  %v1495_v14 = vmul.f32 -0.5900436, %v5060_v35  ;;  %v1461_v45 = vmul.f32 %v1453_v42, %v5020_v2  ;;  %3661 = vperm.xlu1 %4493, %v4984_v33  }
  0xef   : > { %v1429_v41 = vrot.slane %v1421_v43, %v4908_v55  ;;  %v1436_v17 = vrot.slane %v1422_v46, %v4908_v55  ;;  %v1400_v25 = vcombine.low %v1392_v63, %v1399_v8  ;;  %v1496_v29 = vmul.f32 -0.5900436, %v5062_v34  ;;  %v3972_v8 = vld [vmem:[%s6217_s9] sm:$0x7] }
  0xf0   : > { %v1497_v49 = vmul.f32 -0.5900436, %v5066_v32  ;;  %v1466_v6 = vcombine.low %v1458_v47, %v1459_v21  ;;  %v1498_v11 = vmul.f32 -0.5900436, %v5068_v31  ;;  %v834_v13 = vmul.f32 -0.48860252, %v4904_v52 }
  0xf1   : > { %v1437_v51 = vcombine.low %v1429_v41, %v1436_v17  ;;  %v1407_v50 = vrot.slane %v1400_v25, %v4908_v55  ;;  %v1467_v7 = vcombine.low %v1460_v3, %v1461_v45  ;;  %v1503_v15 = vcombine.low %v1495_v14, %v1496_v29 }
  0xf2   : > { %v835_v35 = vmul.f32 -0.48860252, %v4906_v54  ;;  %v1474_v2 = vrot.slane %v1466_v6, %v4908_v55  ;;  %v1504_v30 = vcombine.low %v1497_v49, %v1498_v11  ;;  %v836_v34 = vmul.f32 -0.48860252, %v4911_v4  ;;  %3651 = vperm.xlu1 %4493, %v5027_v10  }
  0xf3   : > { %v1444_v24 = vrot.slane %v1437_v51, %v4908_v55  ;;  %v1408_v32 = vcombine.high %v1407_v50, %v1407_v50  ;;  %v1481_v31 = vrot.slane %v1467_v7, %v4908_v55  ;;  %v1511_v16 = vrot.slane %v1503_v15, %v4908_v55 }
  0xf4   : > { %v837_v28 = vmul.f32 -0.48860252, %v4920_v0  ;;  %v1518_v58 = vrot.slane %v1504_v30, %v4908_v55  ;;  %v842_v20 = vcombine.low %v834_v13, %v835_v35  ;;  %v870_v48 = vmul.f32 0.48860252, %v4904_v52 }
  0xf5   : > { %v1445_v27 = vcombine.high %v1444_v24, %v1444_v24  ;;  %1411 = vst.msk [vmem:[#allocation2 + $0x24] ss:$8 sm:$0xf] %vm4847_vm1, %v1408_v32  ;;  %v1482_v36 = vcombine.low %v1474_v2, %v1481_v31  ;;  %v871_v33 = vmul.f32 0.48860252, %v4906_v54 }
  0xf6   : > { %v843_v38 = vcombine.low %v836_v34, %v837_v28  ;;  %v872_v39 = vmul.f32 0.48860252, %v4911_v4  ;;  %v1519_v53 = vcombine.low %v1511_v16, %v1518_v58  ;;  %v850_v43 = vrot.slane %v842_v20, %v4908_v55  ;;  %3975 = vperm.xlu1 %4493, %v3972_v8  }
  0xf7   : > { %1448 = vst.msk [vmem:[#allocation2 + $0x25] ss:$8 sm:$0xf] %vm4847_vm1, %v1445_v27  ;;  %v873_v44 = vmul.f32 0.48860252, %v4920_v0  ;;  %v1489_v40 = vrot.slane %v1482_v36, %v4908_v55  ;;  %v878_v46 = vcombine.low %v870_v48, %v871_v33 }
  0xf8   : > { %v923_v37 = vmul.f32 -1.0925485, %v4904_v52  ;;  %v857_v63 = vrot.slane %v843_v38, %v4908_v55  ;;  %v924_v5 = vmul.f32 -1.0925485, %v4906_v54  ;;  %v1526_v41 = vrot.slane %v1519_v53, %v4908_v55 }
  0xf9   : > { %v879_v42 = vcombine.low %v872_v39, %v873_v44  ;;  %v925_v47 = vmul.f32 -1.0925485, %v4911_v4  ;;  %v926_v17 = vmul.f32 -1.0925485, %v4920_v0  ;;  %v1490_v21 = vcombine.high %v1489_v40, %v1489_v40 }
  0xfa   : > { %v858_v10 = vcombine.high %v850_v43, %v857_v63  ;;  %v886_v3 = vrot.slane %v878_v46, %v4908_v55  ;;  %v907_v14 = vcombine.low %v850_v43, %v857_v63  ;;  %1529 = vst.msk [vmem:[#allocation2 + $0x27] ss:$8 sm:$0xf] %vm4847_vm1, %v1526_v41  ;;  %v963_v45 = vmul.f32 0.54627424, %v4951_v18 }
  0xfb   : > { %v893_v25 = vrot.slane %v879_v42, %v4908_v55  ;;  %v964_v29 = vmul.f32 0.54627424, %v4953_v19  ;;  %v965_v49 = vmul.f32 0.54627424, %v4960_v22  ;;  %v966_v11 = vmul.f32 0.54627424, %v4962_v23 }
  0xfc   : > { %1493 = vst.msk [vmem:[#allocation2 + $0x26] ss:$8 sm:$0xf] %vm4847_vm1, %v1490_v21  ;;  %v865_v51 = vrot.slane %v858_v10, %v4908_v55  ;;  %v914_v6 = vrot.slane %v907_v14, %v4908_v55  ;;  %v1007_v13 = vmul.f32 %v999_v26, %v923_v37  ;;  %v6264_v18 = vrot.slane %v4906_v54, 7 }
  0xfd   : > { %v894_v50 = vcombine.low %v886_v3, %v893_v25  ;;  %v971_v7 = vcombine.low %v963_v45, %v964_v29  ;;  %v6265_v22 = vrot.slane %v4911_v4, 7  ;;  %v972_v35 = vcombine.low %v965_v49, %v966_v11 }
  0xfe   : > { %v1008_v19 = vmul.f32 %v6264_v18, %v924_v5  ;;  %868 = vst.msk [vmem:[#allocation2 + $0x1] ss:$8 sm:$0xf] %vm4847_vm1, %v865_v51  ;;  %917 = vst.msk [vmem:[#allocation2 + $0x3] ss:$8 sm:$0xf] %vm4847_vm1, %v914_v6 }
  0xff   : > { %v1009_v15 = vmul.f32 %v6265_v22, %v925_v47  ;;  %v6266_v23 = vrot.slane %v4920_v0, 7  ;;  %v1044_v26 = vmul.f32 0.9461747, %v4915_v56  ;;  %v1045_v2 = vmul.f32 0.9461747, %v4924_v1 }
 0x100   : > { %v901_v30 = vrot.slane %v894_v50, %v4908_v55  ;;  %v979_v34 = vrot.slane %v971_v7, %v4908_v55  ;;  %v1015_v32 = vcombine.low %v1007_v13, %v1008_v19  ;;  %v1046_v31 = vmul.f32 0.9461747, %v4935_v9  ;;  %v1531_v50 = vld [vmem:[%s6213_s5] sm:$0xff] }
 0x101   : > { %v1010_v24 = vmul.f32 %v6266_v23, %v926_v17  ;;  %v986_v16 = vrot.slane %v972_v35, %v4908_v55  ;;  %v1047_v27 = vmul.f32 0.9461747, %v4942_v12  ;;  %v4338_v58 = vadd.f32 -0.31539157, %v1044_v26  ;;  %v1533_v35 = vld [vmem:[%s6213_s5 + $0x10] sm:$0xff]  ;;  %v1534_v23 = vld [vmem:[%s6213_s5 + $0x18] sm:$0xff] }
 0x102   : > { %v902_v20 = vcombine.high %v901_v30, %v901_v30  ;;  %v1023_v48 = vrot.slane %v1015_v32, %v4908_v55  ;;  %v4339_v36 = vadd.f32 -0.31539157, %v1045_v2  ;;  %v4340_v56 = vadd.f32 -0.31539157, %v1046_v31  ;;  %v1536_v26 = vld [vmem:[%s6213_s5 + $0x28] sm:$0xff]  ;;  %v1537_v2 = vld [vmem:[%s6213_s5 + $0x30] sm:$0xff] }
 0x103   : > { %v1016_v28 = vcombine.low %v1009_v15, %v1010_v24  ;;  %v987_v38 = vcombine.low %v979_v34, %v986_v16  ;;  %v4341_v33 = vadd.f32 -0.31539157, %v1047_v27  ;;  %v6267_v39 = vrot.slane %v4904_v52, 6  ;;  %v1544_v43 = vld [vmem:[#allocation2 + $0x28] sm:$0xff]  ;;  %v1546_v9 = vld [vmem:[#allocation2 + $0x38] sm:$0xff]  ;;  %v1543_v44 = vld [vmem:[#allocation2 + $0x20] sm:$0xff]  ;;  %v5299_v34 = vpop.permute.xlu1 %1870 }
 0x104   : > { %905 = vst.msk [vmem:[#allocation2 + $0x2] ss:$8 sm:$0xf] %vm4847_vm1, %v902_v20  ;;  %v1056_v12 = vcombine.low %v4338_v58, %v4339_v36  ;;  %v6268_v40 = vrot.slane %v4906_v54, 6  ;;  %v6269_v46 = vrot.slane %v4911_v4, 6  ;;  %v6270_v41 = vrot.slane %v4920_v0, 6  ;;  %1600 = vmatprep.subr.mxu0 %v1544_v43  ;;  %1713 = vmatprep.subr.mxu1 %v1546_v9 }
 0x105   : > { %v1030_v1 = vrot.slane %v1016_v28, %v4908_v55  ;;  %v1093_v53 = vmul.f32 %v6267_v39, %v923_v37  ;;  %v1545_v52 = vld [vmem:[#allocation2 + $0x30] sm:$0xff]  ;;  %v994_v37 = vrot.slane %v987_v38, %v4908_v55  ;;  %v1057_v10 = vcombine.low %v4340_v56, %v4341_v33  ;;  %1601 = vmatpush1.msra.mxu0 %v1543_v44  ;;  %v1532_v15 = vld [vmem:[%s6213_s5 + $0x8] sm:$0xff]  ;;  %v1535_v24 = vld [vmem:[%s6213_s5 + $0x20] sm:$0xff] }
 0x106   : > { %v1094_v63 = vmul.f32 %v6268_v40, %v924_v5  ;;  %v1095_v8 = vmul.f32 %v6269_v46, %v925_v47  ;;  %v1096_v42 = vmul.f32 %v6270_v41, %v926_v17  ;;  %1714 = vmatpush1.msra.mxu1 %v1545_v52  ;;  %v1064_v3 = vrot.slane %v1056_v12, %v4908_v55  ;;  %v1538_v30 = vld [vmem:[%s6213_s5 + $0x38] sm:$0xff] }
 0x107   : > { %v1031_v21 = vcombine.low %v1023_v48, %v1030_v1  ;;  %997 = vst.msk [vmem:[#allocation2 + $0x4] ss:$8 sm:$0xf] %vm4847_vm1, %v994_v37  ;;  %v1071_v0 = vrot.slane %v1057_v10, %v4908_v55  ;;  %v6271_v19 = vmov 0.2820948   ;;  %v6272_v22 = vmov 0.0   ;;  %v5303_v32 = vpop.permute.xlu1 %1865 }
 0x108   : > { %v1101_v14 = vcombine.low %v1093_v53, %v1094_v63  ;;  %v1102_v54 = vcombine.low %v1095_v8, %v1096_v42  ;;  %6273 = vst [vmem:[#allocation5_spill] sm:$0xff] %v5299_v34  ;;  %6274 = vst [vmem:[#allocation6_spill] sm:$0xff] %v5303_v32 }
 0x109   : > { %v1038_v4 = vrot.slane %v1031_v21, %v4908_v55  ;;  %v1072_v25 = vcombine.low %v1064_v3, %v1071_v0 }
 0x10a   : > { %v1109_v5 = vrot.slane %v1101_v14, %v4908_v55  ;;  %v1116_v47 = vrot.slane %v1102_v54, %v4908_v55 }
 0x10b   : > { %v1039_v17 = vcombine.high %v1038_v4, %v1038_v4  ;;  %v1079_v29 = vrot.slane %v1072_v25, %v4908_v55  ;;  %v5307_v31 = vpop.permute.xlu1 %1855 }
 0x10c   : > { %v1117_v45 = vcombine.low %v1109_v5, %v1116_v47  ;;  %6275 = vst [vmem:[#allocation7_spill] sm:$0xff] %v5307_v31 }
 0x10d   : > { %1042 = vst.msk [vmem:[#allocation2 + $0x5] ss:$8 sm:$0xf] %vm4847_vm1, %v1039_v17  ;;  %v1080_v51 = vcombine.high %v1079_v29, %v1079_v29 }
 0x10e   : > { %v1124_v49 = vrot.slane %v1117_v45, %v4908_v55 }
 0x10f   : > { %1083 = vst.msk [vmem:[#allocation2 + $0x6] ss:$8 sm:$0xf] %vm4847_vm1, %v1080_v51  ;;  %v5309_v16 = vpop.permute.xlu1 %1845 }
 0x110   : > { %v1125_v6 = vcombine.high %v1124_v49, %v1124_v49  ;;  %6276 = vst [vmem:[#allocation8_spill] sm:$0xff] %v5309_v16 }
 0x112   : > { %1128 = vst.msk [vmem:[#allocation2 + $0x7] ss:$8 sm:$0xf] %vm4847_vm1, %v1125_v6 }
 0x113   : > { %v2488_v28 = vpop.permute.xlu1 %2487 }
 0x114   : > { %v2490_v27 = vsub.f32 %v4861_v59, %v2488_v28  ;;  %v2491_v58 = vsub.f32 %v4864_v60, %v2488_v28  ;;  %v2492_v20 = vsub.f32 %v4867_v61, %v2488_v28  ;;  %v2493_v48 = vsub.f32 %v4870_v62, %v2488_v28 }
 0x116   : > { %v2494_v36 = vmul.f32 %v2490_v27, %v2490_v27  ;;  %v2495_v56 = vmul.f32 %v2491_v58, %v2491_v58  ;;  %v2496_v38 = vmul.f32 %v2492_v20, %v2492_v20  ;;  %v2497_v1 = vmul.f32 %v2493_v48, %v2493_v48 }
 0x118   : > { %v2498_v33 = vsel %vm787_vm2, %v2494_v36, 0.0  ;;  %v2505_v39 = vsel %vm787_vm2, %v2495_v56, 0.0  ;;  %v2512_v53 = vsel %vm787_vm2, %v2496_v38, 0.0  ;;  %v2519_v9 = vsel %vm787_vm2, %v2497_v1, 0.0 }
 0x119   : > { %v1540_v11 = vld [vmem:[#allocation2 + $0x8] sm:$0xff]  ;;  %v1542_v13 = vld [vmem:[#allocation2 + $0x18] sm:$0xff]  ;;  %v1539_v7 = vld [vmem:[#allocation2] sm:$0xff]  ;;  %v2499_v43 = vrot.slane %v2498_v33, 4  ;;  %v2506_v59 = vrot.slane %v2505_v39, 4  ;;  %v2513_v44 = vrot.slane %v2512_v53, 4 }
 0x11a   : > { %1602 = vmatprep.subr.mxu0 %v1540_v11  ;;  %1715 = vmatprep.subr.mxu1 %v1542_v13  ;;  %v1541_v18 = vld [vmem:[#allocation2 + $0x10] sm:$0xff]  ;;  %v2520_v60 = vrot.slane %v2519_v9, 4 }
 0x11b   : > { %1603 = vmatpush1.msra.mxu0 %v1539_v7  ;;  %1716 = vmatpush1.msra.mxu1 %v1541_v18  ;;  %2538 = vst.msk [vmem:[#allocation2] ss:$8 sm:$0xf] %vm4847_vm1, %v6271_v19  ;;  %v2500_v12 = vadd.f32 %v2499_v43, %v2498_v33  ;;  %v2507_v61 = vadd.f32 %v2506_v59, %v2505_v39 }
 0x11c   : > { %4346 = vmatmul.mubr.msk.f32.vlgmr.msra.gmra.mxu0 %vm1547_vm3, %v1531_v50  ;;  %4354 = vmatmul.mubr.msk.f32.vlgmr.msra.gmra.mxu1 %vm1547_vm3, %v1531_v50  ;;  %v2514_v40 = vadd.f32 %v2513_v44, %v2512_v53  ;;  %v2521_v62 = vadd.f32 %v2520_v60, %v2519_v9 }
 0x11d   : > { %1642 = vmatprep.mubr.f32.mxu0 %v6272_v22  ;;  %1755 = vmatprep.mubr.f32.mxu1 %v6272_v22  ;;  %v2501_v63 = vrot.slane %v2500_v12, 2  ;;  %v2508_v46 = vrot.slane %v2507_v61, 2 }
 0x11e   : > { %v2515_v8 = vrot.slane %v2514_v40, 2  ;;  %v2522_v41 = vrot.slane %v2521_v62, 2 }
 0x11f   : > { %v2502_v42 = vadd.f32 %v2501_v63, %v2500_v12  ;;  %v2509_v52 = vadd.f32 %v2508_v46, %v2507_v61 }
 0x120   : > { %4347 = vmatmul.mubr.msk.f32.gmra.mxu0 %vm1547_vm3, %v1532_v15  ;;  %4355 = vmatmul.mubr.msk.f32.gmra.mxu1 %vm1547_vm3, %v1532_v15  ;;  %v2516_v37 = vadd.f32 %v2515_v8, %v2514_v40  ;;  %v2523_v21 = vadd.f32 %v2522_v41, %v2521_v62 }
 0x121   : > { %1648 = vmatprep.mubr.f32.mxu0 %v6272_v22  ;;  %1761 = vmatprep.mubr.f32.mxu1 %v6272_v22  ;;  %v2503_v10 = vrot.slane %v2502_v42, 1  ;;  %v2510_v3 = vrot.slane %v2509_v52, 1 }
 0x122   : > { %v2517_v14 = vrot.slane %v2516_v37, 1  ;;  %v2524_v54 = vrot.slane %v2523_v21, 1 }
 0x123   : > { %v2504_v4 = vadd.f32 %v2503_v10, %v2502_v42  ;;  %v2511_v0 = vadd.f32 %v2510_v3, %v2509_v52 }
 0x124   : > { %4348 = vmatmul.mubr.msk.f32.gmra.mxu0 %vm1547_vm3, %v1533_v35  ;;  %4356 = vmatmul.mubr.msk.f32.gmra.mxu1 %vm1547_vm3, %v1533_v35  ;;  %v2518_v5 = vadd.f32 %v2517_v14, %v2516_v37  ;;  %v2525_v47 = vadd.f32 %v2524_v54, %v2523_v21 }
 0x125   : > { %1654 = vmatprep.mubr.f32.mxu0 %v6272_v22  ;;  %1767 = vmatprep.mubr.f32.mxu1 %v6272_v22  ;;  %v2526_v17 = vmax.f32 %v2504_v4, 1e-24  ;;  %v2527_v25 = vmax.f32 %v2511_v0, 1e-24 }
 0x126   : > { %v2528_v45 = vmax.f32 %v2518_v5, 1e-24  ;;  %v2529_v29 = vmax.f32 %v2525_v47, 1e-24 }
 0x127   : > { %4502 = vrsqrt.f32 %v2526_v17 }
 0x128   : > { %4349 = vmatmul.mubr.msk.f32.gmra.mxu0 %vm1547_vm3, %v1534_v23  ;;  %4357 = vmatmul.mubr.msk.f32.gmra.mxu1 %vm1547_vm3, %v1534_v23  ;;  %4504 = vrsqrt.f32 %v2527_v25 }
 0x129   : > { %1660 = vmatprep.mubr.f32.mxu0 %v6272_v22  ;;  %1773 = vmatprep.mubr.f32.mxu1 %v6272_v22  ;;  %4506 = vrsqrt.f32 %v2528_v45 }
 0x12a   : > { %4508 = vrsqrt.f32 %v2529_v29 }
 0x12c   : > { %4350 = vmatmul.mubr.msk.f32.gmra.mxu0 %vm1547_vm3, %v1535_v24  ;;  %4358 = vmatmul.mubr.msk.f32.gmra.mxu1 %vm1547_vm3, %v1535_v24 }
 0x12d   : > { %1666 = vmatprep.mubr.f32.mxu0 %v6272_v22  ;;  %1779 = vmatprep.mubr.f32.mxu1 %v6272_v22 }
 0x130   : > { %4351 = vmatmul.mubr.msk.f32.gmra.mxu0 %vm1547_vm3, %v1536_v26  ;;  %4359 = vmatmul.mubr.msk.f32.gmra.mxu1 %vm1547_vm3, %v1536_v26 }
 0x131   : > { %1672 = vmatprep.mubr.f32.mxu0 %v6272_v22  ;;  %1785 = vmatprep.mubr.f32.mxu1 %v6272_v22 }
 0x134   : > { %4352 = vmatmul.mubr.msk.f32.gmra.mxu0 %vm1547_vm3, %v1537_v2  ;;  %4360 = vmatmul.mubr.msk.f32.gmra.mxu1 %vm1547_vm3, %v1537_v2  ;;  %v4503_v49 = vpop.eup %4502 }
 0x135   : > { %1678 = vmatprep.mubr.f32.mxu0 %v6272_v22  ;;  %1791 = vmatprep.mubr.f32.mxu1 %v6272_v22  ;;  %v4505_v51 = vpop.eup %4504  ;;  %v5319_v13 = vmul.f32 %v4503_v49, %v2490_v27 }
 0x136   : > { %v4507_v6 = vpop.eup %4506  ;;  %v5321_v50 = vmul.f32 %v4505_v51, %v2491_v58 }
 0x137   : > { %v4509_v11 = vpop.eup %4508  ;;  %v5323_v7 = vmul.f32 %v4507_v6, %v2492_v20  ;;  %v5329_v19 = vmul.f32 %v5319_v13, %v5319_v13  ;;  %v2646_v28 = vmul.f32 2.0, %v5319_v13  ;;  %v2654_v1 = vrot.slane %v5319_v13, 1 }
 0x138   : > { %4353 = vmatmul.mubr.msk.f32.gmra.mxu0 %vm1547_vm3, %v1538_v30  ;;  %4361 = vmatmul.mubr.msk.f32.gmra.mxu1 %vm1547_vm3, %v1538_v30  ;;  %v5325_v18 = vmul.f32 %v4509_v11, %v2493_v48  ;;  %v5333_v15 = vmul.f32 %v5321_v50, %v5321_v50  ;;  %v2647_v27 = vmul.f32 2.0, %v5321_v50  ;;  %v2655_v33 = vrot.slane %v5321_v50, 1 }
 0x139   : > { %2087 = vmatprep.mubr.f32.mxu0 %v6272_v22  ;;  %2200 = vmatprep.mubr.f32.mxu1 %v6272_v22  ;;  %v5337_v35 = vmul.f32 %v5323_v7, %v5323_v7  ;;  %v2634_v24 = vrot.slane %v5329_v19, 1  ;;  %v2648_v58 = vmul.f32 2.0, %v5323_v7  ;;  %v2656_v39 = vrot.slane %v5323_v7, 1 }
 0x13a   : > { %v5341_v23 = vmul.f32 %v5325_v18, %v5325_v18  ;;  %v2635_v26 = vrot.slane %v5333_v15, 1  ;;  %v2649_v38 = vmul.f32 2.0, %v5325_v18  ;;  %v2657_v53 = vrot.slane %v5325_v18, 1 }
 0x13b   : > { %v2636_v2 = vrot.slane %v5337_v35, 1  ;;  %v5351_v20 = vsub.f32 %v5329_v19, %v2634_v24  ;;  %v5370_v44 = vmul.f32 %v2654_v1, %v2646_v28  ;;  %v5372_v60 = vmul.f32 %v2655_v33, %v2647_v27 }
 0x13c   : > { %v2637_v30 = vrot.slane %v5341_v23, 1  ;;  %v5354_v48 = vsub.f32 %v5333_v15, %v2635_v26  ;;  %v5374_v12 = vmul.f32 %v2656_v39, %v2648_v58  ;;  %v2701_v40 = vrot.slane %v5319_v13, 7 }
 0x13d   : > { %v5357_v36 = vsub.f32 %v5337_v35, %v2636_v2  ;;  %v2920_v43 = vrot.slane %v5351_v20, 7  ;;  %v2702_v62 = vrot.slane %v5321_v50, 7  ;;  %v5385_v37 = vmul.f32 %v2657_v53, %v2649_v38 }
 0x13e   : > { %v5360_v56 = vsub.f32 %v5341_v23, %v2637_v30  ;;  %v2921_v9 = vrot.slane %v5354_v48, 7  ;;  %v2864_v21 = vmul.f32 -2.285229, %v5329_v19  ;;  %v2865_v10 = vmul.f32 -2.285229, %v5333_v15 }
 0x13f   : > { %v2922_v59 = vrot.slane %v5357_v36, 7  ;;  %v2866_v3 = vmul.f32 -2.285229, %v5337_v35  ;;  %v2867_v14 = vmul.f32 -2.285229, %v5341_v23  ;;  %v2876_v0 = vmul.f32 %v5351_v20, %v5319_v13 }
 0x140   : > { %v2923_v61 = vrot.slane %v5360_v56, 7  ;;  %v5392_v54 = vmul.f32 1.4453057, %v5319_v13  ;;  %v5395_v4 = vmul.f32 1.4453057, %v5321_v50  ;;  %v2877_v25 = vmul.f32 %v5354_v48, %v5321_v50 }
 0x141   : > { %v5399_v5 = vadd.f32 0.4570458, %v2864_v21  ;;  %v5401_v47 = vadd.f32 0.4570458, %v2865_v10  ;;  %v5403_v17 = vadd.f32 0.4570458, %v2866_v3  ;;  %v2878_v51 = vmul.f32 %v5357_v36, %v5323_v7 }
 0x142   : > { %v5407_v45 = vadd.f32 0.4570458, %v2867_v14  ;;  %v5410_v29 = vmul.f32 1.4453057, %v5323_v7  ;;  %v5413_v49 = vmul.f32 1.4453057, %v5325_v18  ;;  %v2879_v26 = vmul.f32 %v5360_v56, %v5325_v18 }
 0x143   : > { %v2829_v6 = vmul.f32 0.54627424, %v5351_v20  ;;  %v2830_v11 = vmul.f32 0.54627424, %v5354_v48  ;;  %v2831_v24 = vmul.f32 0.54627424, %v5357_v36  ;;  %v2912_v27 = vmul.f32 %v5370_v44, %v5319_v13 }
 0x144   : > { %v2832_v2 = vmul.f32 0.54627424, %v5360_v56  ;;  %v2884_v30 = vrot.slane %v5370_v44, 7  ;;  %v2885_v28 = vrot.slane %v5372_v60, 7  ;;  %v2886_v38 = vrot.slane %v5374_v12, 7 }
 0x145   : > { %v2837_v58 = vcombine.low %v2829_v6, %v2830_v11  ;;  %v2887_v1 = vrot.slane %v5385_v37, 7  ;;  %v2913_v33 = vmul.f32 %v5372_v60, %v5321_v50  ;;  %v2914_v10 = vmul.f32 %v5374_v12, %v5323_v7 }
 0x146   : > { %v2838_v39 = vcombine.low %v2831_v24, %v2832_v2  ;;  %v2892_v53 = vmul.f32 %v2884_v30, %v5319_v13  ;;  %v2893_v21 = vmul.f32 %v2885_v28, %v5321_v50  ;;  %v2894_v14 = vmul.f32 %v2886_v38, %v5323_v7 }
 0x147   : > { %v2845_v3 = vrot.slane %v2837_v58, %v4908_v55  ;;  %v2895_v6 = vmul.f32 %v2887_v1, %v5325_v18  ;;  %v2915_v11 = vmul.f32 %v5385_v37, %v5325_v18  ;;  %v2928_v2 = vmul.f32 %v2920_v43, %v5319_v13 }
 0x148   : > { %v2852_v52 = vrot.slane %v2838_v39, %v4908_v55  ;;  %v2900_v42 = vrot.slane %v2892_v53, 1  ;;  %v2901_v24 = vrot.slane %v2893_v21, 1  ;;  %v2902_v30 = vrot.slane %v2894_v14, 1 }
 0x149   : > { %v2903_v28 = vrot.slane %v2895_v6, 1  ;;  %v2929_v41 = vmul.f32 %v2921_v9, %v5321_v50  ;;  %v2930_v8 = vmul.f32 %v2922_v59, %v5323_v7  ;;  %v2931_v1 = vmul.f32 %v2923_v61, %v5325_v18 }
 0x14a   : > { %v2853_v58 = vcombine.low %v2845_v3, %v2852_v52  ;;  %v5444_v46 = vsub.f32 %v2876_v0, %v2900_v42  ;;  %v5446_v38 = vsub.f32 %v2877_v25, %v2901_v24  ;;  %v5449_v63 = vsub.f32 %v2878_v51, %v2902_v30 }
 0x14b   : > { %v5451_v39 = vsub.f32 %v2879_v26, %v2903_v28  ;;  %v2936_v53 = vrot.slane %v2928_v2, 1  ;;  %v2937_v21 = vrot.slane %v2929_v41, 1  ;;  %v2938_v14 = vrot.slane %v2930_v8, 1 }
 0x14c   : > { %v2860_v43 = vrot.slane %v2853_v58, %v4908_v55  ;;  %v2939_v6 = vrot.slane %v2931_v1, 1  ;;  %v2983_v9 = vrot.slane %v5370_v44, 6  ;;  %v2984_v42 = vrot.slane %v5372_v60, 6 }
 0x14d   : > { %v2944_v59 = vadd.f32 %v2936_v53, %v2912_v27  ;;  %v2945_v52 = vadd.f32 %v2937_v21, %v2913_v33  ;;  %v2985_v0 = vrot.slane %v5374_v12, 6  ;;  %v2946_v61 = vadd.f32 %v2938_v14, %v2914_v10  ;;  %v5473_v53 = vpop.f32.mrf.mxu0  ;;  %v5475_v21 = vpop.f32.mrf.mxu1 }
 0x14e   : > { %2862 = vst.msk [vmem:[#allocation2 + $0x20] ss:$8 sm:$0xf] %vm4847_vm1, %v2860_v43  ;;  %v2947_v25 = vadd.f32 %v2939_v6, %v2915_v11  ;;  %v2986_v51 = vrot.slane %v5385_v37, 6  ;;  %v2991_v41 = vmul.f32 %v2983_v9, %v5392_v54  ;;  %v2992_v3 = vmul.f32 %v2984_v42, %v5395_v4  ;;  %6278 = vst [vmem:[#allocation9_spill] sm:$0xff] %v5475_v21 }
 0x14f   : > { %v2948_v26 = vmul.f32 -0.5900436, %v2944_v59  ;;  %v2949_v8 = vmul.f32 -0.5900436, %v2945_v52  ;;  %v2993_v27 = vmul.f32 %v2985_v0, %v5410_v29  ;;  %v2950_v33 = vmul.f32 -0.5900436, %v2946_v61 }
 0x150   : > { %v2951_v24 = vmul.f32 -0.5900436, %v2947_v25  ;;  %v2994_v2 = vmul.f32 %v2986_v51, %v5413_v49  ;;  %v3027_v30 = vmul.f32 %v5399_v5, %v2701_v40  ;;  %v2999_v11 = vcombine.low %v2991_v41, %v2992_v3 }
 0x151   : > { %v2956_v10 = vcombine.low %v2948_v26, %v2949_v8  ;;  %v3028_v28 = vmul.f32 %v5401_v47, %v2702_v62  ;;  %v6277_v58 = vrot.slane %v5323_v7, 7  ;;  %v6279_v6 = vrot.slane %v5325_v18, 7 }
 0x152   : > { %v2957_v43 = vcombine.low %v2950_v33, %v2951_v24  ;;  %v3000_v14 = vcombine.low %v2993_v27, %v2994_v2  ;;  %v3063_v59 = vmul.f32 1.8658817, %v5329_v19  ;;  %v3007_v42 = vrot.slane %v2999_v11, %v4908_v55  ;;  %v5489_v24 = vpop.f32.mrf.mxu0  ;;  %v5491_v2 = vpop.f32.mrf.mxu1 }
 0x153   : > { %v3029_v1 = vmul.f32 %v5403_v17, %v6277_v58  ;;  %v3030_v9 = vmul.f32 %v5407_v45, %v6279_v6  ;;  %v2964_v52 = vrot.slane %v2956_v10, %v4908_v55  ;;  %v3035_v0 = vcombine.low %v3027_v30, %v3028_v28 }
 0x154   : > { %v3064_v61 = vmul.f32 1.8658817, %v5333_v15  ;;  %v2971_v25 = vrot.slane %v2957_v43, %v4908_v55  ;;  %v3014_v51 = vrot.slane %v3000_v14, %v4908_v55  ;;  %v3065_v26 = vmul.f32 1.8658817, %v5337_v35 }
 0x155   : > { %v3036_v41 = vcombine.low %v3029_v1, %v3030_v9  ;;  %v3043_v8 = vrot.slane %v3035_v0, %v4908_v55  ;;  %v3066_v3 = vmul.f32 1.8658817, %v5341_v23  ;;  %v4389_v27 = vadd.f32 -1.119529, %v3063_v59 }
 0x156   : > { %v4390_v33 = vadd.f32 -1.119529, %v3064_v61  ;;  %v2972_v30 = vcombine.low %v2964_v52, %v2971_v25  ;;  %v3015_v10 = vcombine.low %v3007_v42, %v3014_v51  ;;  %v4391_v28 = vadd.f32 -1.119529, %v3065_v26 }
 0x157   : > { %v3050_v11 = vrot.slane %v3036_v41, %v4908_v55  ;;  %v4392_v58 = vadd.f32 -1.119529, %v3066_v3  ;;  %v3071_v1 = vmul.f32 %v4389_v27, %v5319_v13  ;;  %v6280_v14 = vrot.slane %v5319_v13, 6  ;;  %v5509_v3 = vpop.f32.mrf.mxu0 }
 0x158   : > { %v3072_v43 = vmul.f32 %v4390_v33, %v5321_v50  ;;  %v2979_v9 = vrot.slane %v2972_v30, %v4908_v55  ;;  %v3022_v59 = vrot.slane %v3015_v10, %v4908_v55  ;;  %v3073_v52 = vmul.f32 %v4391_v28, %v5323_v7 }
 0x159   : > { %v3107_v6 = vmul.f32 %v5399_v5, %v6280_v14  ;;  %v3051_v0 = vcombine.low %v3043_v8, %v3050_v11  ;;  %v3074_v42 = vmul.f32 %v4392_v58, %v5325_v18  ;;  %v6281_v25 = vrot.slane %v5321_v50, 6  ;;  %v5511_v5 = vpop.f32.mrf.mxu1 }
 0x15a   : > { %v3079_v61 = vcombine.low %v3071_v1, %v3072_v43  ;;  %v6282_v41 = vrot.slane %v5323_v7, 6  ;;  %6283 = vst [vmem:[#allocation10_spill] sm:$0xff] %v5511_v5  ;;  %2981 = vst.msk [vmem:[#allocation2 + $0x21] ss:$8 sm:$0xf] %vm4847_vm1, %v2979_v9  ;;  %v3023_v8 = vcombine.high %v3022_v59, %v3022_v59  ;;  %v6284_v33 = vrot.slane %v5325_v18, 6 }
 0x15b   : > { %v3108_v51 = vmul.f32 %v5401_v47, %v6281_v25  ;;  %v3058_v27 = vrot.slane %v3051_v0, %v4908_v55  ;;  %v3143_v47 = vrot.slane %v5351_v20, 6  ;;  %v3080_v10 = vcombine.low %v3073_v52, %v3074_v42 }
 0x15c   : > { %v3109_v26 = vmul.f32 %v5403_v17, %v6282_v41  ;;  %v3110_v30 = vmul.f32 %v5407_v45, %v6284_v33  ;;  %v3087_v11 = vrot.slane %v3079_v61, %v4908_v55  ;;  %v3144_v28 = vrot.slane %v5354_v48, 6  ;;  %3025 = vst.msk [vmem:[#allocation2 + $0x22] ss:$8 sm:$0xf] %vm4847_vm1, %v3023_v8  ;;  %v5532_v48 = vpop.f32.mrf.mxu1 }
 0x15d   : > { %v3115_v17 = vcombine.low %v3107_v6, %v3108_v51  ;;  %v3059_v58 = vcombine.high %v3058_v27, %v3058_v27  ;;  %v3145_v43 = vrot.slane %v5357_v36, 6  ;;  %v3146_v14 = vrot.slane %v5360_v56, 6  ;;  %v5530_v6 = vpop.f32.mrf.mxu0  ;;  %6286 = vst [vmem:[#allocation12_spill] sm:$0xff] %v5532_v48 }
 0x15e   : > { %v3116_v1 = vcombine.low %v3109_v26, %v3110_v30  ;;  %v3094_v9 = vrot.slane %v3080_v10, %v4908_v55  ;;  %v3151_v20 = vmul.f32 %v3143_v47, %v5392_v54  ;;  %v3152_v59 = vmul.f32 %v3144_v28, %v5395_v4  ;;  %6285 = vst [vmem:[#allocation11_spill] sm:$0xff] %v5530_v6  ;;  %v5549_v33 = vpop.f32.mrf.mxu1 }
 0x15f   : > { %v3123_v45 = vrot.slane %v3115_v17, %v4908_v55  ;;  %3061 = vst.msk [vmem:[#allocation2 + $0x23] ss:$8 sm:$0xf] %vm4847_vm1, %v3059_v58  ;;  %v3153_v36 = vmul.f32 %v3145_v43, %v5410_v29  ;;  %v3154_v56 = vmul.f32 %v3146_v14, %v5413_v49  ;;  %v3187_v52 = vmul.f32 -0.5900436, %v5444_v46  ;;  %v5547_v46 = vpop.f32.mrf.mxu0 }
 0x160   : > { %v3130_v0 = vrot.slane %v3116_v1, %v4908_v55  ;;  %v3095_v42 = vcombine.low %v3087_v11, %v3094_v9  ;;  %v3159_v61 = vcombine.low %v3151_v20, %v3152_v59  ;;  %v3188_v54 = vmul.f32 -0.5900436, %v5446_v38  ;;  %6287 = vst [vmem:[#allocation13_spill] sm:$0xff] %v5547_v46 }
 0x161   : > { %v3189_v4 = vmul.f32 -0.5900436, %v5449_v63  ;;  %v3160_v51 = vcombine.low %v3153_v36, %v3154_v56  ;;  %v3190_v41 = vmul.f32 -0.5900436, %v5451_v39  ;;  %v2540_v26 = vmul.f32 -0.48860252, %v5319_v13  ;;  %v5563_v59 = vpop.f32.mrf.mxu0 }
 0x162   : > { %v3131_v25 = vcombine.low %v3123_v45, %v3130_v0  ;;  %v3102_v8 = vrot.slane %v3095_v42, %v4908_v55  ;;  %v3167_v29 = vrot.slane %v3159_v61, %v4908_v55  ;;  %v3195_v27 = vcombine.low %v3187_v52, %v3188_v54  ;;  %6288 = vst [vmem:[#allocation14_spill] sm:$0xff] %v5563_v59  ;;  %v5565_v0 = vpop.f32.mrf.mxu1 }
 0x163   : > { %v2541_v49 = vmul.f32 -0.48860252, %v5321_v50  ;;  %v3174_v63 = vrot.slane %v3160_v51, %v4908_v55  ;;  %v3196_v30 = vcombine.low %v3189_v4, %v3190_v41  ;;  %v2542_v39 = vmul.f32 -0.48860252, %v5323_v7 }
 0x164   : > { %v3138_v38 = vrot.slane %v3131_v25, %v4908_v55  ;;  %v3103_v47 = vcombine.high %v3102_v8, %v3102_v8  ;;  %v3203_v10 = vrot.slane %v3195_v27, %v4908_v55  ;;  %v2543_v11 = vmul.f32 -0.48860252, %v5325_v18 }
 0x165   : > { %v2548_v17 = vcombine.low %v2540_v26, %v2541_v49  ;;  %v3175_v58 = vcombine.low %v3167_v29, %v3174_v63  ;;  %v3210_v1 = vrot.slane %v3196_v30, %v4908_v55  ;;  %v2575_v43 = vmul.f32 0.48860252, %v5319_v13  ;;  %v5579_v63 = vpop.f32.mrf.mxu0  ;;  %v5581_v30 = vpop.f32.mrf.mxu1 }
 0x166   : > { %v3139_v28 = vcombine.high %v3138_v38, %v3138_v38  ;;  %3105 = vst.msk [vmem:[#allocation2 + $0x24] ss:$8 sm:$0xf] %vm4847_vm1, %v3103_v47  ;;  %v2549_v14 = vcombine.low %v2542_v39, %v2543_v11  ;;  %v2576_v45 = vmul.f32 0.48860252, %v5321_v50 }
 0x167   : > { %v2556_v9 = vrot.slane %v2548_v17, %v4908_v55  ;;  %v2577_v20 = vmul.f32 0.48860252, %v5323_v7  ;;  %v3182_v36 = vrot.slane %v3175_v58, %v4908_v55  ;;  %v3211_v56 = vcombine.low %v3203_v10, %v3210_v1 }
 0x168   : > { %3141 = vst.msk [vmem:[#allocation2 + $0x25] ss:$8 sm:$0xf] %vm4847_vm1, %v3139_v28  ;;  %v2578_v52 = vmul.f32 0.48860252, %v5325_v18  ;;  %v2563_v61 = vrot.slane %v2549_v14, %v4908_v55  ;;  %v2583_v54 = vcombine.low %v2575_v43, %v2576_v45 }
 0x169   : > { %v2626_v42 = vmul.f32 -1.0925485, %v5319_v13  ;;  %v2627_v4 = vmul.f32 -1.0925485, %v5321_v50  ;;  %v2628_v25 = vmul.f32 -1.0925485, %v5323_v7  ;;  %v3183_v51 = vcombine.high %v3182_v36, %v3182_v36  ;;  %v5609_v36 = vpop.f32.mrf.mxu1 }
 0x16a   : > { %v3218_v41 = vrot.slane %v3211_v56, %v4908_v55  ;;  %v2584_v26 = vcombine.low %v2577_v20, %v2578_v52  ;;  %v2629_v8 = vmul.f32 -1.0925485, %v5325_v18  ;;  %v2564_v29 = vcombine.high %v2556_v9, %v2563_v61  ;;  %v5607_v20 = vpop.f32.mrf.mxu0  ;;  %6292 = vst [vmem:[#allocation16_spill] sm:$0xff] %v5609_v36 }
 0x16b   : > { %v2591_v27 = vrot.slane %v2583_v54, %v4908_v55  ;;  %v2611_v49 = vcombine.low %v2556_v9, %v2563_v61  ;;  %v2666_v38 = vmul.f32 0.54627424, %v5370_v44  ;;  %3185 = vst.msk [vmem:[#allocation2 + $0x26] ss:$8 sm:$0xf] %vm4847_vm1, %v3183_v51  ;;  %v2709_v28 = vmul.f32 %v2701_v40, %v2626_v42  ;;  %6291 = vst [vmem:[#allocation15_spill] sm:$0xff] %v5607_v20 }
 0x16c   : > { %3220 = vst.msk [vmem:[#allocation2 + $0x27] ss:$8 sm:$0xf] %vm4847_vm1, %v3218_v41  ;;  %v2598_v39 = vrot.slane %v2584_v26, %v4908_v55  ;;  %v2667_v47 = vmul.f32 0.54627424, %v5372_v60  ;;  %v2571_v44 = vrot.slane %v2564_v29, %v4908_v55  ;;  %v2710_v58 = vmul.f32 %v2702_v62, %v2627_v4 }
 0x16d   : > { %v2668_v10 = vmul.f32 0.54627424, %v5374_v12  ;;  %v2669_v11 = vmul.f32 0.54627424, %v5385_v37  ;;  %v2618_v17 = vrot.slane %v2611_v49, %v4908_v55  ;;  %v6289_v9 = vrot.slane %v5323_v7, 7 }
 0x16e   : > { %v2599_v1 = vcombine.low %v2591_v27, %v2598_v39  ;;  %v2674_v43 = vcombine.low %v2666_v38, %v2667_v47  ;;  %2573 = vst.msk [vmem:[#allocation2 + $0x1] ss:$8 sm:$0xf] %vm4847_vm1, %v2571_v44  ;;  %v6290_v12 = vrot.slane %v5325_v18, 7  ;;  %v2717_v45 = vcombine.low %v2709_v28, %v2710_v58 }
 0x16f   : > { %v2675_v14 = vcombine.low %v2668_v10, %v2669_v11  ;;  %v2711_v60 = vmul.f32 %v6289_v9, %v2628_v25  ;;  %2620 = vst.msk [vmem:[#allocation2 + $0x3] ss:$8 sm:$0xf] %vm4847_vm1, %v2618_v17  ;;  %v2745_v40 = vmul.f32 0.9461747, %v5329_v19  ;;  %v6293_v47 = vrot.slane %v5319_v13, 6  ;;  %v5624_v17 = vpop.f32.mrf.mxu1 }
 0x170   : > { %v2712_v37 = vmul.f32 %v6290_v12, %v2629_v8  ;;  %v2746_v62 = vmul.f32 0.9461747, %v5333_v15  ;;  %v2606_v56 = vrot.slane %v2599_v1, %v4908_v55  ;;  %v2682_v52 = vrot.slane %v2674_v43, %v4908_v55  ;;  %6296 = vst [vmem:[#allocation18_spill] sm:$0xff] %v5624_v17 }
 0x171   : > { %v2689_v61 = vrot.slane %v2675_v14, %v4908_v55  ;;  %v2747_v54 = vmul.f32 0.9461747, %v5337_v35  ;;  %v2725_v41 = vrot.slane %v2717_v45, %v4908_v55  ;;  %v2748_v26 = vmul.f32 0.9461747, %v5341_v23  ;;  %v5622_v35 = vpop.f32.mrf.mxu0 }
 0x172   : > { %v2718_v51 = vcombine.low %v2711_v60, %v2712_v37  ;;  %v4385_v19 = vadd.f32 -0.31539157, %v2745_v40  ;;  %v2607_v29 = vcombine.high %v2606_v56, %v2606_v56  ;;  %v4386_v27 = vadd.f32 -0.31539157, %v2746_v62  ;;  %6295 = vst [vmem:[#allocation17_spill] sm:$0xff] %v5622_v35 }
 0x173   : > { %v2690_v15 = vcombine.low %v2682_v52, %v2689_v61  ;;  %v4387_v49 = vadd.f32 -0.31539157, %v2747_v54  ;;  %v4388_v39 = vadd.f32 -0.31539157, %v2748_v26  ;;  %v2793_v10 = vmul.f32 %v6293_v47, %v2626_v42 }
 0x174   : > { %v2732_v38 = vrot.slane %v2718_v51, %v4908_v55  ;;  %v6294_v11 = vrot.slane %v5321_v50, 6  ;;  %2609 = vst.msk [vmem:[#allocation2 + $0x2] ss:$8 sm:$0xf] %vm4847_vm1, %v2607_v29  ;;  %v2757_v28 = vcombine.low %v4385_v19, %v4386_v27  ;;  %v6297_v58 = vrot.slane %v5323_v7, 6  ;;  %v5639_v7 = vpop.f32.mrf.mxu0 }
 0x175   : > { %v2697_v23 = vrot.slane %v2690_v15, %v4908_v55  ;;  %v6298_v43 = vrot.slane %v5325_v18, 6  ;;  %v2758_v14 = vcombine.low %v4387_v49, %v4388_v39  ;;  %6299 = vst [vmem:[#allocation19_spill] sm:$0xff] %v5639_v7 }
 0x176   : > { %v2794_v44 = vmul.f32 %v6294_v11, %v2627_v4  ;;  %v2795_v1 = vmul.f32 %v6297_v58, %v2628_v25  ;;  %v2733_v42 = vcombine.low %v2725_v41, %v2732_v38  ;;  %v2765_v4 = vrot.slane %v2757_v28, %v4908_v55  ;;  %v5641_v25 = vpop.f32.mrf.mxu1  ;;  %v5647_v56 = vpop.f32.mrf.mxu0 }
 0x177   : > { %v2796_v13 = vmul.f32 %v6298_v43, %v2629_v8  ;;  %2699 = vst.msk [vmem:[#allocation2 + $0x4] ss:$8 sm:$0xf] %vm4847_vm1, %v2697_v23  ;;  %v2772_v12 = vrot.slane %v2758_v14, %v4908_v55  ;;  %6300 = vst [vmem:[#allocation20_spill] sm:$0xff] %v5641_v25 }
 0x178   : > { %v2801_v50 = vcombine.low %v2793_v10, %v2794_v44  ;;  %v2740_v60 = vrot.slane %v2733_v42, %v4908_v55  ;;  %6301 = vst [vmem:[#allocation21_spill] sm:$0xff] %v5647_v56  ;;  %v5649_v52 = vpop.f32.mrf.mxu1  ;;  %v5654_v41 = vpop.f32.mrf.mxu0 }
 0x179   : > { %v2802_v9 = vcombine.low %v2795_v1, %v2796_v13  ;;  %v2773_v45 = vcombine.low %v2765_v4, %v2772_v12  ;;  %6302 = vst [vmem:[#allocation22_spill] sm:$0xff] %v5649_v52  ;;  %6303 = vst [vmem:[#allocation23_spill] sm:$0xff] %v5654_v41 }
 0x17a   : > { %v2809_v37 = vrot.slane %v2801_v50, %v4908_v55  ;;  %v2741_v8 = vcombine.high %v2740_v60, %v2740_v60  ;;  %v5656_v26 = vpop.f32.mrf.mxu1  ;;  %v5660_v19 = vpop.f32.mrf.mxu0 }
 0x17b   : > { %v2816_v18 = vrot.slane %v2802_v9, %v4908_v55  ;;  %v2780_v62 = vrot.slane %v2773_v45, %v4908_v55  ;;  %6304 = vst [vmem:[#allocation24_spill] sm:$0xff] %v5656_v26  ;;  %6305 = vst [vmem:[#allocation25_spill] sm:$0xff] %v5660_v19 }
 0x17c   : > { %2743 = vst.msk [vmem:[#allocation2 + $0x5] ss:$8 sm:$0xf] %vm4847_vm1, %v2741_v8  ;;  %v5662_v29 = vpop.f32.mrf.mxu1  ;;  %v5664_v15 = vpop.f32.mrf.mxu0 }
 0x17d   : > { %v2817_v40 = vcombine.low %v2809_v37, %v2816_v18  ;;  %v2781_v54 = vcombine.high %v2780_v62, %v2780_v62  ;;  %6306 = vst [vmem:[#allocation26_spill] sm:$0xff] %v5662_v29  ;;  %6307 = vst [vmem:[#allocation27_spill] sm:$0xff] %v5664_v15 }
 0x17e   : > { %v5666_v27 = vpop.f32.mrf.mxu1 }
 0x17f   : > { %v2824_v61 = vrot.slane %v2817_v40, %v4908_v55  ;;  %2783 = vst.msk [vmem:[#allocation2 + $0x6] ss:$8 sm:$0xf] %vm4847_vm1, %v2781_v54  ;;  %6308 = vst [vmem:[#allocation28_spill] sm:$0xff] %v5666_v27  ;;  %v5668_v55 = vpop.f32.mrf.mxu0 }
 0x180   : > { %6309 = vst [vmem:[#allocation29_spill] sm:$0xff] %v5668_v55  ;;  %v5670_v49 = vpop.f32.mrf.mxu1 }
 0x181   : > { %v2825_v51 = vcombine.high %v2824_v61, %v2824_v61  ;;  %6310 = vst [vmem:[#allocation30_spill] sm:$0xff] %v5670_v49  ;;  %v5672_v38 = vpop.f32.mrf.mxu0 }
 0x182   : > { %6311 = vst [vmem:[#allocation31_spill] sm:$0xff] %v5672_v38  ;;  %v5674_v39 = vpop.f32.mrf.mxu1 }
 0x183   : > { %2827 = vst.msk [vmem:[#allocation2 + $0x7] ss:$8 sm:$0xf] %vm4847_vm1, %v2825_v51  ;;  %6312 = vst [vmem:[#allocation32_spill] sm:$0xff] %v5674_v39  ;;  %v1876_v51 = vpop.permute.xlu0 %1875 }
 0x1dc   : > { %v1638_v47 = vpop.f32.mrf.mxu0  ;;  %v1751_v10 = vpop.f32.mrf.mxu1 }
 0x1dd   : > { %v5677_v22 = vadd.f32 %v1638_v47, %v5473_v53  ;;  %v5680_v16 = vadd.f32 %v1751_v10, %v5475_v21 }
 0x1de   : > { %v1640_v57 = vpop.f32.mrf.mxu0  ;;  %v1753_v11 = vpop.f32.mrf.mxu1 }
 0x1df   : > { %v5683_v31 = vadd.f32 %v1640_v57, %v5489_v24  ;;  %v5686_v32 = vadd.f32 %v1753_v11, %v5491_v2 }
 0x1e0   : > { %v1644_v44 = vpop.f32.mrf.mxu0  ;;  %v1757_v23 = vpop.f32.mrf.mxu1 }
 0x1e1   : > { %v5689_v17 = vadd.f32 %v1644_v44, %v5509_v3  ;;  %v5692_v35 = vadd.f32 %v1757_v23, %v5511_v5 }
 0x1e2   : > { %v1646_v28 = vpop.f32.mrf.mxu0  ;;  %v1759_v58 = vpop.f32.mrf.mxu1 }
 0x1e3   : > { %v5695_v34 = vadd.f32 %v1646_v28, %v5530_v6  ;;  %v5698_v47 = vadd.f32 %v1759_v58, %v5532_v48 }
 0x1e4   : > { %v1650_v1 = vpop.f32.mrf.mxu0  ;;  %v1763_v43 = vpop.f32.mrf.mxu1 }
 0x1e5   : > { %v5701_v57 = vadd.f32 %v1650_v1, %v5547_v46  ;;  %v5704_v11 = vadd.f32 %v1763_v43, %v5549_v33 }
 0x1e6   : > { %v1652_v13 = vpop.f32.mrf.mxu0  ;;  %v1765_v42 = vpop.f32.mrf.mxu1 }
 0x1e7   : > { %v5707_v44 = vadd.f32 %v1652_v13, %v5563_v59  ;;  %v5710_v23 = vadd.f32 %v1765_v42, %v5565_v0 }
 0x1e8   : > { %v1656_v14 = vpop.f32.mrf.mxu0  ;;  %v1769_v50 = vpop.f32.mrf.mxu1 }
 0x1e9   : > { %v1810_v28 = vadd.f32 %v1656_v14, %v5579_v63  ;;  %v1812_v6 = vadd.f32 %v1769_v50, %v5581_v30 }
 0x1ea   : > { %v1658_v4 = vpop.f32.mrf.mxu0  ;;  %v1771_v9 = vpop.f32.mrf.mxu1 }
 0x1eb   : > { %v1811_v58 = vadd.f32 %v1658_v4, %v5607_v20  ;;  %v1813_v48 = vadd.f32 %v1771_v9, %v5609_v36 }
 0x1ec   : > { %v1662_v60 = vpop.f32.mrf.mxu0  ;;  %v1775_v12 = vpop.f32.mrf.mxu1 }
 0x1ee   : > { %v1664_v37 = vpop.f32.mrf.mxu0  ;;  %v1777_v18 = vpop.f32.mrf.mxu1 }
 0x1ef   : > { %v1815_v46 = vadd.f32 %v1664_v37, %v5639_v7  ;;  %v1817_v43 = vadd.f32 %v1777_v18, %v5641_v25  ;;  %v1861_v25 = vpop.permute.xlu0 %1860 }
 0x1f0   : > { %v1668_v8 = vpop.f32.mrf.mxu0  ;;  %v1781_v45 = vpop.f32.mrf.mxu1 }
 0x1f2   : > { %v1670_v40 = vpop.f32.mrf.mxu0  ;;  %v1783_v62 = vpop.f32.mrf.mxu1 }
 0x1f3   : > { %v1819_v36 = vadd.f32 %v1670_v40, %v5654_v41  ;;  %v1821_v37 = vadd.f32 %v1783_v62, %v5656_v26  ;;  %v6314_v40 = vld [vmem:[#allocation17_spill] sm:$0xff]  ;;  %v6315_v62 = vld [vmem:[#allocation18_spill] sm:$0xff] }
 0x1f4   : > { %v1674_v61 = vpop.f32.mrf.mxu0  ;;  %v1787_v54 = vpop.f32.mrf.mxu1  ;;  %v1816_v26 = vadd.f32 %v1775_v12, %v6315_v62 }
 0x1f5   : > { %v1822_v42 = vadd.f32 %v1674_v61, %v5660_v19  ;;  %v1824_v14 = vadd.f32 %v1787_v54, %v5662_v29  ;;  %v1820_v61 = vadd.f32 %v1781_v45, %v5649_v52  ;;  %v1814_v19 = vadd.f32 %v1662_v60, %v6314_v40 }
 0x1f6   : > { %v1676_v10 = vpop.f32.mrf.mxu0  ;;  %v1789_v21 = vpop.f32.mrf.mxu1  ;;  %v1897_v60 = vadd.f32 %v1861_v25, %v1817_v43 }
 0x1f7   : > { %v1823_v13 = vadd.f32 %v1676_v10, %v5664_v15  ;;  %v1825_v59 = vadd.f32 %v1789_v21, %v5666_v27  ;;  %v1818_v21 = vadd.f32 %v1668_v8, %v5647_v56 }
 0x1f8   : > { %v1680_v5 = vpop.f32.mrf.mxu0  ;;  %v1793_v1 = vpop.f32.mrf.mxu1 }
 0x1f9   : > { %v1826_v50 = vadd.f32 %v1680_v5, %v5668_v55  ;;  %v1828_v4 = vadd.f32 %v1793_v1, %v5670_v49  ;;  %v6313_v5 = vld [vmem:[#allocation5_spill] sm:$0xff] }
 0x1fa   : > { %v1682_v20 = vpop.f32.mrf.mxu0  ;;  %v1795_v9 = vpop.f32.mrf.mxu1  ;;  %v1903_v55 = vadd.f32 %v6313_v5, %v1823_v13  ;;  %v1905_v1 = vadd.f32 %v6313_v5, %v1825_v59 }
 0x1fb   : > { %v1827_v18 = vadd.f32 %v1682_v20, %v5672_v38  ;;  %v1829_v10 = vadd.f32 %v1795_v9, %v5674_v39  ;;  %v1906_v54 = vadd.f32 %v1876_v51, %v1826_v50  ;;  %v1908_v29 = vadd.f32 %v1876_v51, %v1828_v4  ;;  %v6316_v39 = vld [vmem:[#allocation6_spill] sm:$0xff] }
 0x1fc   : > { %v1902_v20 = vadd.f32 %v6313_v5, %v1822_v42  ;;  %v1904_v9 = vadd.f32 %v6313_v5, %v1824_v14  ;;  %v1899_v8 = vadd.f32 %v6316_v39, %v1819_v36  ;;  %v1901_v45 = vadd.f32 %v6316_v39, %v1821_v37  ;;  %v1851_v42 = vpop.permute.xlu0 %1850 }
 0x1fd   : > { %v1907_v49 = vadd.f32 %v1876_v51, %v1827_v18  ;;  %v1909_v27 = vadd.f32 %v1876_v51, %v1829_v10  ;;  %v1898_v13 = vadd.f32 %v6316_v39, %v1818_v21  ;;  %v1900_v59 = vadd.f32 %v6316_v39, %v1820_v61 }
 0x1fe   : > { %v1938_v18 = vmax.f32 %v1906_v54, 0.0  ;;  %v1940_v51 = vmax.f32 %v1908_v29, 0.0  ;;  %v1895_v10 = vadd.f32 %v1861_v25, %v1815_v46  ;;  %v1935_v38 = vmax.f32 %v1903_v55, 0.0 }
 0x1ff   : > { %v1939_v50 = vmax.f32 %v1907_v49, 0.0  ;;  %v1941_v4 = vmax.f32 %v1909_v27, 0.0  ;;  %v1937_v12 = vmax.f32 %v1905_v1, 0.0  ;;  %v1894_v14 = vadd.f32 %v1861_v25, %v1814_v19  ;;  %v6317_v27 = vld [vmem:[#allocation7_spill] sm:$0xff] }
 0x200   : > { %v1896_v5 = vadd.f32 %v1861_v25, %v1816_v26  ;;  %v1934_v36 = vmax.f32 %v1902_v20, 0.0  ;;  %v1936_v62 = vmax.f32 %v1904_v9, 0.0  ;;  %v1891_v49 = vadd.f32 %v6317_v27, %v1811_v58 }
 0x201   : > { %2039 = vmatprep.subr.mxu0 %v1939_v50  ;;  %2152 = vmatprep.subr.mxu1 %v1941_v4  ;;  %v1893_v37 = vadd.f32 %v6317_v27, %v1813_v48  ;;  %v1931_v39 = vmax.f32 %v1899_v8, 0.0  ;;  %v1933_v21 = vmax.f32 %v1901_v45, 0.0  ;;  %v1890_v46 = vadd.f32 %v6317_v27, %v1810_v28 }
 0x202   : > { %2040 = vmatpush1.msra.mxu0 %v1938_v18  ;;  %2153 = vmatpush1.msra.mxu1 %v1940_v51  ;;  %v1892_v29 = vadd.f32 %v6317_v27, %v1812_v6  ;;  %v1930_v55 = vmax.f32 %v1898_v13, 0.0  ;;  %v1932_v43 = vmax.f32 %v1900_v59, 0.0  ;;  %v1887_v25 = vadd.f32 %v1851_v42, %v5707_v44  ;;  %v6318_v6 = vld [vmem:[#allocation8_spill] sm:$0xff]  ;;  %v1948_v27 = vld [vmem:[%s6214_s6 + $0x30] sm:$0xff] }
 0x203   : > { %2041 = vmatprep.subr.mxu0 %v1935_v38  ;;  %2154 = vmatprep.subr.mxu1 %v1937_v12  ;;  %v1889_v26 = vadd.f32 %v1851_v42, %v5710_v23  ;;  %v1927_v19 = vmax.f32 %v1895_v10, 0.0  ;;  %v1929_v58 = vmax.f32 %v1897_v60, 0.0  ;;  %v1886_v48 = vadd.f32 %v1851_v42, %v5701_v57  ;;  %v1943_v12 = vld [vmem:[%s6214_s6 + $0x8] sm:$0xff] }
 0x204   : > { %2042 = vmatpush1.msra.mxu0 %v1934_v36  ;;  %2155 = vmatpush1.msra.mxu1 %v1936_v62  ;;  %v1888_v38 = vadd.f32 %v1851_v42, %v5704_v11  ;;  %v1926_v61 = vmax.f32 %v1894_v14, 0.0  ;;  %v1928_v28 = vmax.f32 %v1896_v5, 0.0  ;;  %v1883_v54 = vadd.f32 %v6318_v6, %v5695_v34  ;;  %v1841_v62 = vpop.permute.xlu0 %1840  ;;  %v1944_v42 = vld [vmem:[%s6214_s6 + $0x10] sm:$0xff]  ;;  %v1945_v14 = vld [vmem:[%s6214_s6 + $0x18] sm:$0xff]  ;;  %v1946_v5 = vld [vmem:[%s6214_s6 + $0x20] sm:$0xff] }
 0x205   : > { %2043 = vmatprep.subr.mxu0 %v1931_v39  ;;  %2156 = vmatprep.subr.mxu1 %v1933_v21  ;;  %v1885_v44 = vadd.f32 %v6318_v6, %v5698_v47  ;;  %v1923_v1 = vmax.f32 %v1891_v49, 0.0  ;;  %v1925_v23 = vmax.f32 %v1893_v37, 0.0  ;;  %v1882_v57 = vadd.f32 %v6318_v6, %v5689_v17  ;;  %v1947_v36 = vld [vmem:[%s6214_s6 + $0x28] sm:$0xff]  ;;  %v1949_v49 = vld [vmem:[%s6214_s6 + $0x38] sm:$0xff] }
 0x206   : > { %2044 = vmatpush1.msra.mxu0 %v1930_v55  ;;  %2157 = vmatpush1.msra.mxu1 %v1932_v43  ;;  %v1884_v11 = vadd.f32 %v6318_v6, %v5692_v35  ;;  %v1922_v20 = vmax.f32 %v1890_v46, 0.0  ;;  %v1924_v9 = vmax.f32 %v1892_v29, 0.0  ;;  %v1879_v34 = vadd.f32 %v1841_v62, %v5683_v31 }
 0x207   : > { %2045 = vmatprep.subr.mxu0 %v1927_v19  ;;  %2158 = vmatprep.subr.mxu1 %v1929_v58  ;;  %v1881_v8 = vadd.f32 %v1841_v62, %v5686_v32  ;;  %v1919_v47 = vmax.f32 %v1887_v25, 0.0  ;;  %v1921_v45 = vmax.f32 %v1889_v26, 0.0  ;;  %v1878_v50 = vadd.f32 %v1841_v62, %v5677_v22 }
 0x208   : > { %2046 = vmatpush1.msra.mxu0 %v1926_v61  ;;  %2159 = vmatpush1.msra.mxu1 %v1928_v28  ;;  %v1880_v4 = vadd.f32 %v1841_v62, %v5680_v16  ;;  %v1918_v17 = vmax.f32 %v1886_v48, 0.0  ;;  %v1920_v13 = vmax.f32 %v1888_v38, 0.0  ;;  %v1915_v35 = vmax.f32 %v1883_v54, 0.0  ;;  %v1942_v16 = vld [vmem:[%s6214_s6] sm:$0xff] }
 0x209   : > { %2047 = vmatprep.subr.mxu0 %v1923_v1  ;;  %2160 = vmatprep.subr.mxu1 %v1925_v23  ;;  %v1917_v59 = vmax.f32 %v1885_v44, 0.0  ;;  %v1914_v18 = vmax.f32 %v1882_v57, 0.0  ;;  %v1916_v31 = vmax.f32 %v1884_v11, 0.0  ;;  %v1911_v32 = vmax.f32 %v1879_v34, 0.0  ;;  %v1996_v11 = vpop.permute.xlu0 %1995  ;;  %v1991_v34 = vpop.permute.xlu1 %1990 }
 0x20a   : > { %2048 = vmatpush1.msra.mxu0 %v1922_v20  ;;  %2161 = vmatpush1.msra.mxu1 %v1924_v9  ;;  %v1913_v51 = vmax.f32 %v1881_v8, 0.0  ;;  %v1910_v10 = vmax.f32 %v1878_v50, 0.0  ;;  %v1912_v22 = vmax.f32 %v1880_v4, 0.0  ;;  %v6319_v60 = vmov 0.0  }
 0x20b   : > { %2049 = vmatprep.subr.mxu0 %v1919_v47  ;;  %2162 = vmatprep.subr.mxu1 %v1921_v45 }
 0x20c   : > { %2050 = vmatpush1.msra.mxu0 %v1918_v17  ;;  %2163 = vmatpush1.msra.mxu1 %v1920_v13 }
 0x20d   : > { %2051 = vmatprep.subr.mxu0 %v1915_v35  ;;  %2164 = vmatprep.subr.mxu1 %v1917_v59  ;;  %v1986_v4 = vpop.permute.xlu0 %1985  ;;  %v1981_v35 = vpop.permute.xlu1 %1980 }
 0x20e   : > { %2052 = vmatpush1.msra.mxu0 %v1914_v18  ;;  %2165 = vmatpush1.msra.mxu1 %v1916_v31 }
 0x20f   : > { %2053 = vmatprep.subr.mxu0 %v1911_v32  ;;  %2166 = vmatprep.subr.mxu1 %v1913_v51 }
 0x210   : > { %2054 = vmatpush1.msra.mxu0 %v1910_v10  ;;  %2167 = vmatpush1.msra.mxu1 %v1912_v22 }
 0x211   : > { %4362 = vmatmul.mubr.msk.f32.vlgmr.msra.gmra.mxu0 %vm1998_vm4, %v1942_v16  ;;  %4370 = vmatmul.mubr.msk.f32.vlgmr.msra.gmra.mxu1 %vm1998_vm4, %v1942_v16 }
 0x212   : > { %2093 = vmatprep.mubr.f32.mxu0 %v6319_v60  ;;  %2206 = vmatprep.mubr.f32.mxu1 %v6319_v60 }
 0x215   : > { %4363 = vmatmul.mubr.msk.f32.gmra.mxu0 %vm1998_vm4, %v1943_v12  ;;  %4371 = vmatmul.mubr.msk.f32.gmra.mxu1 %vm1998_vm4, %v1943_v12 }
 0x216   : > { %2099 = vmatprep.mubr.f32.mxu0 %v6319_v60  ;;  %2212 = vmatprep.mubr.f32.mxu1 %v6319_v60 }
 0x219   : > { %4364 = vmatmul.mubr.msk.f32.gmra.mxu0 %vm1998_vm4, %v1944_v42  ;;  %4372 = vmatmul.mubr.msk.f32.gmra.mxu1 %vm1998_vm4, %v1944_v42 }
 0x21a   : > { %2105 = vmatprep.mubr.f32.mxu0 %v6319_v60  ;;  %2218 = vmatprep.mubr.f32.mxu1 %v6319_v60 }
 0x21d   : > { %4365 = vmatmul.mubr.msk.f32.gmra.mxu0 %vm1998_vm4, %v1945_v14  ;;  %4373 = vmatmul.mubr.msk.f32.gmra.mxu1 %vm1998_vm4, %v1945_v14 }
 0x21e   : > { %2111 = vmatprep.mubr.f32.mxu0 %v6319_v60  ;;  %2224 = vmatprep.mubr.f32.mxu1 %v6319_v60 }
 0x221   : > { %4366 = vmatmul.mubr.msk.f32.gmra.mxu0 %vm1998_vm4, %v1946_v5  ;;  %4374 = vmatmul.mubr.msk.f32.gmra.mxu1 %vm1998_vm4, %v1946_v5 }
 0x222   : > { %2117 = vmatprep.mubr.f32.mxu0 %v6319_v60  ;;  %2230 = vmatprep.mubr.f32.mxu1 %v6319_v60 }
 0x225   : > { %4367 = vmatmul.mubr.msk.f32.gmra.mxu0 %vm1998_vm4, %v1947_v36  ;;  %4375 = vmatmul.mubr.msk.f32.gmra.mxu1 %vm1998_vm4, %v1947_v36 }
 0x226   : > { %2123 = vmatprep.mubr.f32.mxu0 %v6319_v60  ;;  %2236 = vmatprep.mubr.f32.mxu1 %v6319_v60 }
 0x229   : > { %4368 = vmatmul.mubr.msk.f32.gmra.mxu0 %vm1998_vm4, %v1948_v27  ;;  %4376 = vmatmul.mubr.msk.f32.gmra.mxu1 %vm1998_vm4, %v1948_v27 }
 0x22a   : > { %2129 = vmatprep.mubr.f32.mxu0 %v6319_v60  ;;  %2242 = vmatprep.mubr.f32.mxu1 %v6319_v60 }
 0x22d   : > { %4369 = vmatmul.mubr.msk.f32.gmra.mxu0 %vm1998_vm4, %v1949_v49  ;;  %4377 = vmatmul.mubr.msk.f32.gmra.mxu1 %vm1998_vm4, %v1949_v49  ;;  %v1976_v49 = vpop.permute.xlu0 %1975 }
 0x22e   : > { %2355 = vmatprep.mubr.f32.mxu0 %v6319_v60  ;;  %2426 = vmatprep.mubr.f32.mxu1 %v6319_v60 }
 0x2d1   : > { %v5816_v37 = vpop.f32.mrf.mxu0  ;;  %v5818_v39 = vpop.f32.mrf.mxu1 }
 0x2d3   : > { %v5820_v21 = vpop.f32.mrf.mxu0  ;;  %v5822_v46 = vpop.f32.mrf.mxu1 }
 0x2d5   : > { %v5824_v29 = vpop.f32.mrf.mxu0  ;;  %v5826_v55 = vpop.f32.mrf.mxu1 }
 0x2d7   : > { %v5828_v43 = vpop.f32.mrf.mxu0  ;;  %v5830_v25 = vpop.f32.mrf.mxu1 }
 0x2d9   : > { %v5832_v26 = vpop.f32.mrf.mxu0  ;;  %v5834_v19 = vpop.f32.mrf.mxu1 }
 0x2db   : > { %v5836_v58 = vpop.f32.mrf.mxu0  ;;  %v5838_v48 = vpop.f32.mrf.mxu1 }
 0x2dd   : > { %v2107_v38 = vpop.f32.mrf.mxu0  ;;  %v2220_v61 = vpop.f32.mrf.mxu1 }
 0x2df   : > { %v2109_v28 = vpop.f32.mrf.mxu0  ;;  %v2222_v6 = vpop.f32.mrf.mxu1 }
 0x2e1   : > { %v2113_v54 = vpop.f32.mrf.mxu0  ;;  %v2226_v44 = vpop.f32.mrf.mxu1 }
 0x2e3   : > { %v2115_v1 = vpop.f32.mrf.mxu0  ;;  %v2228_v23 = vpop.f32.mrf.mxu1 }
 0x2e4   : > { %v2116_v15 = vadd.f32 %v2115_v1, %v1981_v35  ;;  %v2221_v1 = vadd.f32 %v2220_v61, %v1976_v49 }
 0x2e5   : > { %v2119_v62 = vpop.f32.mrf.mxu0  ;;  %v2232_v57 = vpop.f32.mrf.mxu1 }
 0x2e6   : > { %v2120_v41 = vadd.f32 %v2119_v62, %v1986_v4  ;;  %v2233_v52 = vadd.f32 %v2232_v57, %v1986_v4  ;;  %v2108_v57 = vadd.f32 %v2107_v38, %v1976_v49 }
 0x2e7   : > { %v2121_v20 = vpop.f32.mrf.mxu0  ;;  %v2234_v9 = vpop.f32.mrf.mxu1 }
 0x2e8   : > { %v2122_v14 = vadd.f32 %v2121_v20, %v1986_v4  ;;  %v2235_v5 = vadd.f32 %v2234_v9, %v1986_v4  ;;  %v2110_v20 = vadd.f32 %v2109_v28, %v1976_v49  ;;  %v2223_v9 = vadd.f32 %v2222_v6, %v1976_v49  ;;  %v3231_v49 = vld [vmem:[#allocation2 + $0x8] sm:$0xff] }
 0x2e9   : > { %v2125_v8 = vpop.f32.mrf.mxu0  ;;  %v2238_v47 = vpop.f32.mrf.mxu1  ;;  %v2271_v4 = vmax.f32 %v2233_v52, 0.0 }
 0x2ea   : > { %v2126_v12 = vadd.f32 %v2125_v8, %v1991_v34  ;;  %v2239_v42 = vadd.f32 %v2238_v47, %v1991_v34  ;;  %v2270_v47 = vmax.f32 %v2122_v14, 0.0  ;;  %v2272_v62 = vmax.f32 %v2235_v5, 0.0  ;;  %v3235_v14 = vld [vmem:[#allocation2 + $0x28] sm:$0xff]  ;;  %v3237_v5 = vld [vmem:[#allocation2 + $0x38] sm:$0xff] }
 0x2eb   : > { %v2127_v45 = vpop.f32.mrf.mxu0  ;;  %v2240_v50 = vpop.f32.mrf.mxu1  ;;  %v2264_v61 = vmax.f32 %v2223_v9, 0.0  ;;  %v3227_v9 = vld [vmem:[%s6213_s5 + $0x28] sm:$0xff] }
 0x2ec   : > { %v2128_v51 = vadd.f32 %v2127_v45, %v1991_v34  ;;  %v2241_v10 = vadd.f32 %v2240_v50, %v1991_v34  ;;  %v1971_v45 = vpop.permute.xlu1 %1970  ;;  %v2114_v50 = vadd.f32 %v2113_v54, %v1981_v35  ;;  %v2273_v8 = vmax.f32 %v2126_v12, 0.0 }
 0x2ed   : > { %v2131_v17 = vpop.f32.mrf.mxu0  ;;  %v2244_v13 = vpop.f32.mrf.mxu1  ;;  %v2275_v34 = vmax.f32 %v2239_v42, 0.0  ;;  %v2217_v54 = vadd.f32 %v5838_v48, %v1971_v45  ;;  %v2215_v28 = vadd.f32 %v5834_v19, %v1971_v45 }
 0x2ee   : > { %v2132_v59 = vadd.f32 %v2131_v17, %v1996_v11  ;;  %v2245_v18 = vadd.f32 %v2244_v13, %v1996_v11  ;;  %v2229_v17 = vadd.f32 %v2228_v23, %v1981_v35  ;;  %v2274_v13 = vmax.f32 %v2128_v51, 0.0 }
 0x2ef   : > { %v2133_v31 = vpop.f32.mrf.mxu0  ;;  %v2246_v32 = vpop.f32.mrf.mxu1  ;;  %v2276_v40 = vmax.f32 %v2241_v10, 0.0  ;;  %v2269_v23 = vmax.f32 %v2120_v41, 0.0 }
 0x2f0   : > { %v2134_v22 = vadd.f32 %v2133_v31, %v1996_v11  ;;  %v2247_v16 = vadd.f32 %v2246_v32, %v1996_v11  ;;  %v2277_v56 = vmax.f32 %v2132_v59, 0.0  ;;  %v2279_v7 = vmax.f32 %v2245_v18, 0.0 }
 0x2f1   : > { %v2227_v11 = vadd.f32 %v2226_v44, %v1981_v35  ;;  %v2104_v59 = vadd.f32 %v5836_v58, %v1971_v45  ;;  %v2266_v44 = vmax.f32 %v2116_v15, 0.0  ;;  %v2268_v35 = vmax.f32 %v2229_v17, 0.0  ;;  %v1961_v15 = vpop.permute.xlu1 %1960  ;;  %v3233_v17 = vld [vmem:[#allocation2 + $0x18] sm:$0xff] }
 0x2f2   : > { %v2278_v36 = vmax.f32 %v2134_v22, 0.0  ;;  %v2280_v27 = vmax.f32 %v2247_v16, 0.0  ;;  %v2262_v58 = vmax.f32 %v2110_v20, 0.0  ;;  %v2263_v18 = vmax.f32 %v2221_v1, 0.0  ;;  %v3226_v20 = vld [vmem:[%s6213_s5 + $0x20] sm:$0xff] }
 0x2f3   : > { %v2267_v38 = vmax.f32 %v2227_v11, 0.0  ;;  %v2092_v19 = vadd.f32 %v5820_v21, %v1961_v15  ;;  %v2205_v31 = vadd.f32 %v5822_v46, %v1961_v15  ;;  %v2260_v32 = vmax.f32 %v2217_v54, 0.0  ;;  %v3223_v11 = vld [vmem:[%s6213_s5 + $0x8] sm:$0xff] }
 0x2f4   : > { %2307 = vmatprep.subr.mxu0 %v2278_v36  ;;  %2378 = vmatprep.subr.mxu1 %v2280_v27  ;;  %v2203_v51 = vadd.f32 %v5818_v39, %v1961_v15  ;;  %v2281_v39 = vld [vmem:[%s6216_s8] sm:$0x7]  ;;  %v3236_v27 = vld [vmem:[#allocation2 + $0x30] sm:$0xff] }
 0x2f5   : > { %2308 = vmatpush1.msra.mxu0 %v2277_v56  ;;  %2379 = vmatpush1.msra.mxu1 %v2279_v7  ;;  %v1966_v7 = vpop.permute.xlu0 %1965  ;;  %v2102_v56 = vadd.f32 %v5832_v26, %v1971_v45  ;;  %v2261_v26 = vmax.f32 %v2108_v57, 0.0  ;;  %v2250_v46 = vmax.f32 %v2092_v19, 0.0  ;;  %v2252_v12 = vmax.f32 %v2205_v31, 0.0  ;;  %v3234_v36 = vld [vmem:[#allocation2 + $0x20] sm:$0xff] }
 0x2f6   : > { %2309 = vmatprep.subr.mxu0 %v2274_v13  ;;  %2380 = vmatprep.subr.mxu1 %v2276_v40  ;;  %v2265_v40 = vmax.f32 %v2114_v50, 0.0  ;;  %v2098_v52 = vadd.f32 %v5828_v43, %v1966_v7  ;;  %v2211_v41 = vadd.f32 %v5830_v25, %v1966_v7  ;;  %v2096_v48 = vadd.f32 %v5824_v29, %v1966_v7  ;;  %v3230_v13 = vld [vmem:[#allocation2] sm:$0xff]  ;;  %v3232_v50 = vld [vmem:[#allocation2 + $0x10] sm:$0xff] }
 0x2f7   : > { %2310 = vmatpush1.msra.mxu0 %v2273_v8  ;;  %2381 = vmatpush1.msra.mxu1 %v2275_v34  ;;  %v2209_v6 = vadd.f32 %v5826_v55, %v1966_v7  ;;  %v2258_v43 = vmax.f32 %v2104_v59, 0.0  ;;  %v2090_v25 = vadd.f32 %v5816_v37, %v1961_v15  ;;  %v2257_v10 = vmax.f32 %v2102_v56, 0.0  ;;  %v3222_v45 = vld [vmem:[%s6213_s5] sm:$0xff]  ;;  %v3224_v8 = vld [vmem:[%s6213_s5 + $0x10] sm:$0xff]  ;;  %v3225_v34 = vld [vmem:[%s6213_s5 + $0x18] sm:$0xff] }
 0x2f8   : > { %2311 = vmatprep.subr.mxu0 %v2270_v47  ;;  %2382 = vmatprep.subr.mxu1 %v2272_v62  ;;  %v2259_v29 = vmax.f32 %v2215_v28, 0.0  ;;  %v2254_v55 = vmax.f32 %v2098_v52, 0.0  ;;  %v2256_v22 = vmax.f32 %v2211_v41, 0.0  ;;  %v2253_v16 = vmax.f32 %v2096_v48, 0.0  ;;  %v3228_v47 = vld [vmem:[%s6213_s5 + $0x30] sm:$0xff]  ;;  %v3229_v62 = vld [vmem:[%s6213_s5 + $0x38] sm:$0xff] }
 0x2f9   : > { %2312 = vmatpush1.msra.mxu0 %v2269_v23  ;;  %2383 = vmatpush1.msra.mxu1 %v2271_v4  ;;  %v2255_v21 = vmax.f32 %v2209_v6, 0.0  ;;  %v2249_v42 = vmax.f32 %v2090_v25, 0.0  ;;  %v2251_v37 = vmax.f32 %v2203_v51, 0.0  ;;  %v5915_v57 = vpop.permute.xlu0 %3566 }
 0x2fa   : > { %2313 = vmatprep.subr.mxu0 %v2266_v44  ;;  %2384 = vmatprep.subr.mxu1 %v2268_v35 }
 0x2fb   : > { %2314 = vmatpush1.msra.mxu0 %v2265_v40  ;;  %2385 = vmatpush1.msra.mxu1 %v2267_v38 }
 0x2fc   : > { %2315 = vmatprep.subr.mxu0 %v2262_v58  ;;  %2386 = vmatprep.subr.mxu1 %v2264_v61 }
 0x2fd   : > { %2316 = vmatpush1.msra.mxu0 %v2261_v26  ;;  %2387 = vmatpush1.msra.mxu1 %v2263_v18  ;;  %v5917_v1 = vpop.permute.xlu0 %3556 }
 0x2fe   : > { %2317 = vmatprep.subr.mxu0 %v2258_v43  ;;  %2388 = vmatprep.subr.mxu1 %v2260_v32 }
 0x2ff   : > { %2318 = vmatpush1.msra.mxu0 %v2257_v10  ;;  %2389 = vmatpush1.msra.mxu1 %v2259_v29 }
 0x300   : > { %2319 = vmatprep.subr.mxu0 %v2254_v55  ;;  %2390 = vmatprep.subr.mxu1 %v2256_v22 }
 0x301   : > { %2320 = vmatpush1.msra.mxu0 %v2253_v16  ;;  %2391 = vmatpush1.msra.mxu1 %v2255_v21  ;;  %v5919_v23 = vpop.permute.xlu0 %3546 }
 0x302   : > { %2321 = vmatprep.subr.mxu0 %v2250_v46  ;;  %2392 = vmatprep.subr.mxu1 %v2252_v12 }
 0x303   : > { %2322 = vmatpush1.msra.mxu0 %v2249_v42  ;;  %2393 = vmatpush1.msra.mxu1 %v2251_v37 }
 0x304   : > { %4378 = vmatmul.mubr.msk.f32.vlgmr.msra.gmra.mxu0 %vm1998_vm4, %v2281_v39  ;;  %4379 = vmatmul.mubr.msk.f32.vlgmr.msra.gmra.mxu1 %vm1998_vm4, %v2281_v39 }
 0x305   : > { %3290 = vmatprep.subr.mxu0 %v3235_v14  ;;  %3403 = vmatprep.subr.mxu1 %v3237_v5  ;;  %v5921_v4 = vpop.permute.xlu0 %3536 }
 0x306   : > { %3291 = vmatpush1.msra.mxu0 %v3234_v36  ;;  %3404 = vmatpush1.msra.mxu1 %v3236_v27 }
 0x307   : > { %3292 = vmatprep.subr.mxu0 %v3231_v49  ;;  %3405 = vmatprep.subr.mxu1 %v3233_v17 }
 0x308   : > { %3293 = vmatpush1.msra.mxu0 %v3230_v13  ;;  %3326 = vmatprep.mubr.f32.mxu0 %v6319_v60 }
 0x309   : > { %3406 = vmatpush1.msra.mxu1 %v3232_v50  ;;  %3439 = vmatprep.mubr.f32.mxu1 %v6319_v60  ;;  %v5923_v59 = vpop.permute.xlu0 %3686 }
 0x30a   : > { %4393 = vmatmul.mubr.msk.f32.vlgmr.msra.gmra.mxu0 %vm1547_vm3, %v3222_v45  ;;  %4401 = vmatmul.mubr.msk.f32.vlgmr.msra.gmra.mxu1 %vm1547_vm3, %v3222_v45 }
 0x30b   : > { %3332 = vmatprep.mubr.f32.mxu0 %v6319_v60  ;;  %3445 = vmatprep.mubr.f32.mxu1 %v6319_v60 }
 0x30d   : > { %v5925_v54 = vpop.permute.xlu0 %3676 }
 0x30e   : > { %4394 = vmatmul.mubr.msk.f32.gmra.mxu0 %vm1547_vm3, %v3223_v11  ;;  %4402 = vmatmul.mubr.msk.f32.gmra.mxu1 %vm1547_vm3, %v3223_v11 }
 0x30f   : > { %3338 = vmatprep.mubr.f32.mxu0 %v6319_v60  ;;  %3451 = vmatprep.mubr.f32.mxu1 %v6319_v60 }
 0x311   : > { %v5927_v44 = vpop.permute.xlu0 %3666 }
 0x312   : > { %4395 = vmatmul.mubr.msk.f32.gmra.mxu0 %vm1547_vm3, %v3224_v8  ;;  %4403 = vmatmul.mubr.msk.f32.gmra.mxu1 %vm1547_vm3, %v3224_v8  ;;  %6320 = vst [vmem:[#allocation5_spill] sm:$0xff] %v5927_v44  ;;  %v5934_v8 = vld [vmem:[%s4858_s25] sm:$0x38] }
 0x313   : > { %3344 = vmatprep.mubr.f32.mxu0 %v6319_v60  ;;  %3457 = vmatprep.mubr.f32.mxu1 %v6319_v60 }
 0x315   : > { %v5929_v35 = vpop.permute.xlu0 %3656 }
 0x316   : > { %4396 = vmatmul.mubr.msk.f32.gmra.mxu0 %vm1547_vm3, %v3225_v34  ;;  %4404 = vmatmul.mubr.msk.f32.gmra.mxu1 %vm1547_vm3, %v3225_v34  ;;  %6321 = vst [vmem:[#allocation6_spill] sm:$0xff] %v5929_v35  ;;  %v5937_v34 = vld [vmem:[%s4858_s25 + $0x10] sm:$0x38] }
 0x317   : > { %3350 = vmatprep.mubr.f32.mxu0 %v6319_v60  ;;  %3463 = vmatprep.mubr.f32.mxu1 %v6319_v60 }
 0x319   : > { %v2286_v7 = vpop.permute.xlu0 %2285 }
 0x31a   : > { %4397 = vmatmul.mubr.msk.f32.gmra.mxu0 %vm1547_vm3, %v3226_v20  ;;  %4405 = vmatmul.mubr.msk.f32.gmra.mxu1 %vm1547_vm3, %v3226_v20  ;;  %v5940_v20 = vld [vmem:[%s4858_s25 + $0x8] sm:$0x38] }
 0x31b   : > { %3356 = vmatprep.mubr.f32.mxu0 %v6319_v60  ;;  %3469 = vmatprep.mubr.f32.mxu1 %v6319_v60 }
 0x31e   : > { %4398 = vmatmul.mubr.msk.f32.gmra.mxu0 %vm1547_vm3, %v3227_v9  ;;  %4406 = vmatmul.mubr.msk.f32.gmra.mxu1 %vm1547_vm3, %v3227_v9  ;;  %v5943_v9 = vld [vmem:[%s4858_s25 + $0x18] sm:$0x38]  ;;  %s4319_s25 = sshll.u32 %s416_s19, 5 }
 0x31f   : > { %3362 = vmatprep.mubr.f32.mxu0 %v6319_v60  ;;  %3475 = vmatprep.mubr.f32.mxu1 %v6319_v60  ;;  %s6028_s13 = scalar_lea.vmem [#allocation4], %s4319_s25 }
 0x322   : > { %4399 = vmatmul.mubr.msk.f32.gmra.mxu0 %vm1547_vm3, %v3228_v47  ;;  %4407 = vmatmul.mubr.msk.f32.gmra.mxu1 %vm1547_vm3, %v3228_v47 }
 0x323   : > { %3368 = vmatprep.mubr.f32.mxu0 %v6319_v60  ;;  %3481 = vmatprep.mubr.f32.mxu1 %v6319_v60 }
 0x326   : > { %4400 = vmatmul.mubr.msk.f32.gmra.mxu0 %vm1547_vm3, %v3229_v62  ;;  %4408 = vmatmul.mubr.msk.f32.gmra.mxu1 %vm1547_vm3, %v3229_v62 }
 0x327   : > { %3777 = vmatprep.mubr.f32.mxu0 %v6319_v60  ;;  %3890 = vmatprep.mubr.f32.mxu1 %v6319_v60 }
 0x3c4   : > { %v2357_v56 = vpop.f32.mrf.mxu0  ;;  %v2428_v28 = vpop.f32.mrf.mxu1 }
 0x3c5   : > { %v2358_v40 = vadd.f32 %v2357_v56, %v2286_v7  ;;  %v2429_v38 = vadd.f32 %v2428_v28, %v2286_v7 }
 0x3c6   : > { %v2359_v52 = vpop.f32.mrf.mxu0  ;;  %v2430_v41 = vpop.f32.mrf.mxu1 }
 0x3c7   : > { %v4380_v58 = vmul.f32 -1.442695, %v2358_v40  ;;  %v4382_v61 = vmul.f32 -1.442695, %v2429_v38  ;;  %v2360_v15 = vadd.f32 %v2359_v52, %v2286_v7  ;;  %v2431_v48 = vadd.f32 %v2430_v41, %v2286_v7 }
 0x3c8   : > { %v6253_v7 = vrot.slane %v5934_v8, 3 }
 0x3c9   : > { %4510 = vpow2.f32 %v4380_v58  ;;  %v4381_v6 = vmul.f32 -1.442695, %v2360_v15  ;;  %v4383_v26 = vmul.f32 -1.442695, %v2431_v48  ;;  %v6322_v58 = vld [vmem:[#allocation9_spill] sm:$0xff] }
 0x3ca   : > { %4512 = vpow2.f32 %v4382_v61  ;;  %v3328_v18 = vpop.f32.mrf.mxu0  ;;  %v3441_v19 = vpop.f32.mrf.mxu1 }
 0x3cb   : > { %4514 = vpow2.f32 %v4381_v6  ;;  %v5950_v41 = vadd.f32 %v3328_v18, %v5473_v53  ;;  %v5953_v61 = vadd.f32 %v3441_v19, %v6322_v58  ;;  %v6324_v53 = vld [vmem:[#allocation11_spill] sm:$0xff]  ;;  %v6325_v19 = vld [vmem:[#allocation12_spill] sm:$0xff] }
 0x3cc   : > { %4516 = vpow2.f32 %v4383_v26  ;;  %v3330_v31 = vpop.f32.mrf.mxu0  ;;  %v3443_v43 = vpop.f32.mrf.mxu1  ;;  %v6323_v26 = vld [vmem:[#allocation10_spill] sm:$0xff]  ;;  %v6331_v58 = vld [vmem:[#allocation27_spill] sm:$0xff] }
 0x3cd   : > { %v5956_v15 = vadd.f32 %v3330_v31, %v5489_v24  ;;  %v5959_v48 = vadd.f32 %v3443_v43, %v5491_v2  ;;  %v6326_v24 = vld [vmem:[#allocation13_spill] sm:$0xff] }
 0x3ce   : > { %v3334_v32 = vpop.f32.mrf.mxu0  ;;  %v3447_v25 = vpop.f32.mrf.mxu1 }
 0x3cf   : > { %v5962_v6 = vadd.f32 %v3334_v32, %v5509_v3  ;;  %v6327_v3 = vld [vmem:[#allocation14_spill] sm:$0xff] }
 0x3d0   : > { %v3336_v51 = vpop.f32.mrf.mxu0  ;;  %v3449_v10 = vpop.f32.mrf.mxu1 }
 0x3d1   : > { %v5968_v18 = vadd.f32 %v3336_v51, %v6324_v53 }
 0x3d2   : > { %v3340_v29 = vpop.f32.mrf.mxu0  ;;  %v3453_v55 = vpop.f32.mrf.mxu1 }
 0x3d3   : > { %v5974_v31 = vadd.f32 %v3340_v29, %v6326_v24  ;;  %v5977_v2 = vadd.f32 %v3453_v55, %v5549_v33  ;;  %v6328_v29 = vld [vmem:[#allocation15_spill] sm:$0xff]  ;;  %v6329_v33 = vld [vmem:[#allocation16_spill] sm:$0xff] }
 0x3d4   : > { %v3342_v22 = vpop.f32.mrf.mxu0  ;;  %v3455_v16 = vpop.f32.mrf.mxu1 }
 0x3d5   : > { %v5980_v43 = vadd.f32 %v3342_v22, %v6327_v3  ;;  %v5983_v32 = vadd.f32 %v3455_v16, %v5565_v0  ;;  %v6330_v22 = vld [vmem:[#allocation17_spill] sm:$0xff] }
 0x3d6   : > { %v4511_v21 = vpop.eup %4510  ;;  %v3346_v46 = vpop.f32.mrf.mxu0 }
 0x3d7   : > { %v3459_v12 = vpop.f32.mrf.mxu1  ;;  %v4513_v42 = vpop.eup %4512  ;;  %v2445_v37 = vadd.f32 1.0, %v4511_v21  ;;  %v5965_v21 = vadd.f32 %v3447_v25, %v6323_v26  ;;  %v5986_v25 = vadd.f32 %v3346_v46, %v5579_v63  ;;  %v6332_v26 = vld [vmem:[#allocation19_spill] sm:$0xff]  ;;  %v6333_v46 = vld [vmem:[#allocation20_spill] sm:$0xff] }
 0x3d8   : > { %v4515_v39 = vpop.eup %4514  ;;  %v2447_v14 = vadd.f32 1.0, %v4513_v42  ;;  %v3348_v5 = vpop.f32.mrf.mxu0  ;;  %v5989_v51 = vadd.f32 %v3459_v12, %v5581_v30  ;;  %v6335_v12 = vld [vmem:[#allocation22_spill] sm:$0xff] }
 0x3d9   : > { %v3461_v36 = vpop.f32.mrf.mxu1  ;;  %v4517_v27 = vpop.eup %4516  ;;  %4518 = vrcp.f32 %v2445_v37  ;;  %v2446_v49 = vadd.f32 1.0, %v4515_v39 }
 0x3da   : > { %4520 = vrcp.f32 %v2447_v14  ;;  %v2448_v17 = vadd.f32 1.0, %v4517_v27  ;;  %v3352_v13 = vpop.f32.mrf.mxu0  ;;  %v3562_v39 = vpop.permute.xlu1 %3561  ;;  %v5971_v14 = vadd.f32 %v3449_v10, %v6325_v19  ;;  %v5995_v55 = vadd.f32 %v3461_v36, %v6329_v33  ;;  %v6334_v19 = vld [vmem:[#allocation21_spill] sm:$0xff]  ;;  %v6336_v36 = vld [vmem:[#allocation23_spill] sm:$0xff]  ;;  %v6337_v33 = vld [vmem:[#allocation24_spill] sm:$0xff] }
 0x3db   : > { %v5931_v45 = vpop.f32.mrf.mxu1  ;;  %4522 = vrcp.f32 %v2446_v49  ;;  %v5992_v49 = vadd.f32 %v3348_v5, %v6328_v29 }
 0x3dc   : > { %4524 = vrcp.f32 %v2448_v17  ;;  %v3354_v50 = vpop.f32.mrf.mxu0  ;;  %v3504_v17 = vadd.f32 %v3352_v13, %v6330_v22  ;;  %v6338_v22 = vld [vmem:[#allocation25_spill] sm:$0xff] }
 0x3dd   : > { %v3467_v11 = vpop.f32.mrf.mxu1  ;;  %v3505_v63 = vadd.f32 %v3354_v50, %v6332_v26 }
 0x3de   : > { %v3358_v47 = vpop.f32.mrf.mxu0  ;;  %v3507_v53 = vadd.f32 %v3467_v11, %v6333_v46 }
 0x3df   : > { %v3471_v62 = vpop.f32.mrf.mxu1  ;;  %v3508_v30 = vadd.f32 %v3358_v47, %v6334_v19  ;;  %v6340_v47 = vld [vmem:[#allocation26_spill] sm:$0xff] }
 0x3e0   : > { %v3360_v28 = vpop.f32.mrf.mxu0  ;;  %v3510_v24 = vadd.f32 %v3471_v62, %v6335_v12  ;;  %v6341_v62 = vld [vmem:[#allocation29_spill] sm:$0xff]  ;;  %v6342_v19 = vld [vmem:[#allocation30_spill] sm:$0xff] }
 0x3e1   : > { %v3473_v40 = vpop.f32.mrf.mxu1  ;;  %v3509_v29 = vadd.f32 %v3360_v28, %v6336_v36  ;;  %v6343_v28 = vrot.slane %v5940_v20, 3 }
 0x3e2   : > { %v3364_v42 = vpop.f32.mrf.mxu0  ;;  %v3511_v13 = vadd.f32 %v3473_v40, %v6337_v33 }
 0x3e3   : > { %v3477_v37 = vpop.f32.mrf.mxu1 }
 0x3e4   : > { %v3366_v10 = vpop.f32.mrf.mxu0  ;;  %v3514_v26 = vadd.f32 %v3477_v37, %v6340_v47  ;;  %v6347_v37 = vrot.slane %v5943_v9, 3 }
 0x3e5   : > { %v3479_v27 = vpop.f32.mrf.mxu1  ;;  %v3513_v0 = vadd.f32 %v3366_v10, %v6331_v58  ;;  %v3512_v10 = vadd.f32 %v3364_v42, %v6338_v22  ;;  %v6339_v58 = vld [vmem:[#allocation28_spill] sm:$0xff]  ;;  %v6344_v42 = vld [vmem:[#allocation31_spill] sm:$0xff] }
 0x3e6   : > { %v4519_v16 = vpop.eup %4518  ;;  %v3370_v3 = vpop.f32.mrf.mxu0  ;;  %v3515_v56 = vadd.f32 %v3479_v27, %v6339_v58  ;;  %v6345_v27 = vld [vmem:[#allocation32_spill] sm:$0xff] }
 0x3e7   : > { %v3483_v52 = vpop.f32.mrf.mxu1  ;;  %v4521_v5 = vpop.eup %4520  ;;  %v2469_v11 = vadd.f32 %v4519_v16, %v6253_v7  ;;  %v3516_v46 = vadd.f32 %v3370_v3, %v6341_v62  ;;  %v3594_v36 = vadd.f32 %v3562_v39, %v3513_v0  ;;  %v6346_v16 = vrot.slane %v5937_v34, 3 }
 0x3e8   : > { %v4523_v50 = vpop.eup %4522  ;;  %v3518_v12 = vadd.f32 %v3483_v52, %v6342_v19  ;;  %v3372_v38 = vpop.f32.mrf.mxu0  ;;  %v3596_v19 = vadd.f32 %v3562_v39, %v3515_v56 }
 0x3e9   : > { %v3485_v35 = vpop.f32.mrf.mxu1  ;;  %v4525_v44 = vpop.eup %4524  ;;  %v2470_v40 = vadd.f32 %v4523_v50, %v6343_v28  ;;  %v3517_v33 = vadd.f32 %v3372_v38, %v6344_v42  ;;  %v2471_v7 = vadd.f32 %v4521_v5, %v6346_v16  ;;  %v3597_v52 = vadd.f32 %v5915_v57, %v3516_v46  ;;  %v6348_v28 = vld [vmem:[#allocation18_spill] sm:$0xff] }
 0x3ea   : > { %v3519_v22 = vadd.f32 %v3485_v35, %v6345_v27  ;;  %v3552_v58 = vpop.permute.xlu1 %3551  ;;  %v2472_v3 = vadd.f32 %v4525_v44, %v6347_v37  ;;  %v3599_v47 = vadd.f32 %v5915_v57, %v3518_v12  ;;  %v3506_v35 = vadd.f32 %v5931_v45, %v6348_v28 }
 0x3eb   : > { %v2477_v62 = vcombine.low %v2469_v11, %v2470_v40  ;;  %v3598_v50 = vadd.f32 %v5915_v57, %v3517_v33  ;;  %v3593_v42 = vadd.f32 %v3562_v39, %v3512_v10  ;;  %v3595_v27 = vadd.f32 %v3562_v39, %v3514_v26 }
 0x3ec   : > { %v3600_v0 = vadd.f32 %v5915_v57, %v3519_v22  ;;  %v2478_v38 = vcombine.low %v2471_v7, %v2472_v3  ;;  %v3590_v44 = vadd.f32 %v5917_v1, %v3509_v29  ;;  %v3592_v5 = vadd.f32 %v5917_v1, %v3511_v13 }
 0x3ed   : > { %2481 = vst [vmem:[%s6028_s13] sm:$0x77] %v2477_v62  ;;  %v3630_v56 = vmax.f32 %v3598_v50, 0.0  ;;  %v3589_v57 = vadd.f32 %v5917_v1, %v3508_v30  ;;  %v3591_v7 = vadd.f32 %v5917_v1, %v3510_v24  ;;  %v3629_v46 = vmax.f32 %v3597_v52, 0.0 }
 0x3ee   : > { %v3632_v11 = vmax.f32 %v3600_v0, 0.0  ;;  %2482 = vst [vmem:[%s6028_s13 + $0x8] sm:$0x77] %v2478_v38  ;;  %v3631_v45 = vmax.f32 %v3599_v47, 0.0  ;;  %v3586_v10 = vadd.f32 %v3552_v58, %v3505_v63  ;;  %v3588_v39 = vadd.f32 %v3552_v58, %v3507_v53  ;;  %v3542_v40 = vpop.permute.xlu1 %3541 }
 0x3ef   : > { %v3626_v26 = vmax.f32 %v3594_v36, 0.0  ;;  %v3628_v12 = vmax.f32 %v3596_v19, 0.0  ;;  %3729 = vmatprep.subr.mxu0 %v3630_v56  ;;  %v3585_v33 = vadd.f32 %v3552_v58, %v3504_v17  ;;  %v3587_v29 = vadd.f32 %v3552_v58, %v3506_v35  ;;  %v3634_v56 = vld [vmem:[%s6214_s6 + $0x8] sm:$0xff] }
 0x3f0   : > { %3842 = vmatprep.subr.mxu1 %v3632_v11  ;;  %v3625_v22 = vmax.f32 %v3593_v42, 0.0  ;;  %v3627_v13 = vmax.f32 %v3595_v27, 0.0  ;;  %3730 = vmatpush1.msra.mxu0 %v3629_v46  ;;  %v3582_v30 = vadd.f32 %v5919_v23, %v5992_v49  ;;  %v3584_v1 = vadd.f32 %v5919_v23, %v5995_v55  ;;  %v3635_v11 = vld [vmem:[%s6214_s6 + $0x10] sm:$0xff]  ;;  %v3638_v46 = vld [vmem:[%s6214_s6 + $0x28] sm:$0xff] }
 0x3f1   : > { %3843 = vmatpush1.msra.mxu1 %v3631_v45  ;;  %v3622_v24 = vmax.f32 %v3590_v44, 0.0  ;;  %v3624_v63 = vmax.f32 %v3592_v5, 0.0  ;;  %3731 = vmatprep.subr.mxu0 %v3626_v26  ;;  %v3581_v53 = vadd.f32 %v5919_v23, %v5986_v25  ;;  %v3583_v17 = vadd.f32 %v5919_v23, %v5989_v51  ;;  %v3639_v45 = vld [vmem:[%s6214_s6 + $0x30] sm:$0xff] }
 0x3f2   : > { %3844 = vmatprep.subr.mxu1 %v3628_v12  ;;  %v3621_v36 = vmax.f32 %v3589_v57, 0.0  ;;  %v3623_v58 = vmax.f32 %v3591_v7, 0.0  ;;  %3732 = vmatpush1.msra.mxu0 %v3625_v22  ;;  %v3578_v16 = vadd.f32 %v3542_v40, %v5980_v43  ;;  %v3580_v49 = vadd.f32 %v3542_v40, %v5983_v32  ;;  %v3532_v62 = vpop.permute.xlu1 %3531  ;;  %v3636_v57 = vld [vmem:[%s6214_s6 + $0x18] sm:$0xff]  ;;  %v3637_v7 = vld [vmem:[%s6214_s6 + $0x20] sm:$0xff] }
 0x3f3   : > { %3845 = vmatpush1.msra.mxu1 %v3627_v13  ;;  %v3618_v37 = vmax.f32 %v3586_v10, 0.0  ;;  %v3620_v55 = vmax.f32 %v3588_v39, 0.0  ;;  %3733 = vmatprep.subr.mxu0 %v3622_v24  ;;  %v3577_v3 = vadd.f32 %v3542_v40, %v5974_v31  ;;  %v3579_v52 = vadd.f32 %v3542_v40, %v5977_v2  ;;  %v3640_v10 = vld [vmem:[%s6214_s6 + $0x38] sm:$0xff] }
 0x3f4   : > { %3846 = vmatprep.subr.mxu1 %v3624_v63  ;;  %v3617_v25 = vmax.f32 %v3585_v33, 0.0  ;;  %v3619_v47 = vmax.f32 %v3587_v29, 0.0  ;;  %3734 = vmatpush1.msra.mxu0 %v3621_v36  ;;  %v3574_v23 = vadd.f32 %v5921_v4, %v5968_v18  ;;  %v3576_v43 = vadd.f32 %v5921_v4, %v5971_v14 }
 0x3f5   : > { %3847 = vmatpush1.msra.mxu1 %v3623_v58  ;;  %v3614_v51 = vmax.f32 %v3582_v30, 0.0  ;;  %v3616_v32 = vmax.f32 %v3584_v1, 0.0  ;;  %3735 = vmatprep.subr.mxu0 %v3618_v37  ;;  %v3573_v31 = vadd.f32 %v5921_v4, %v5962_v6  ;;  %v3575_v2 = vadd.f32 %v5921_v4, %v5965_v21 }
 0x3f6   : > { %3848 = vmatprep.subr.mxu1 %v3620_v55  ;;  %v3613_v19 = vmax.f32 %v3581_v53, 0.0  ;;  %v3615_v50 = vmax.f32 %v3583_v17, 0.0  ;;  %3736 = vmatpush1.msra.mxu0 %v3617_v25  ;;  %v3570_v18 = vadd.f32 %v3532_v62, %v5956_v15  ;;  %v3572_v0 = vadd.f32 %v3532_v62, %v5959_v48 }
 0x3f7   : > { %3849 = vmatpush1.msra.mxu1 %v3619_v47  ;;  %v3610_v14 = vmax.f32 %v3578_v16, 0.0  ;;  %v3612_v38 = vmax.f32 %v3580_v49, 0.0  ;;  %3737 = vmatprep.subr.mxu0 %v3614_v51  ;;  %v3569_v28 = vadd.f32 %v3532_v62, %v5950_v41  ;;  %v3571_v35 = vadd.f32 %v3532_v62, %v5953_v61  ;;  %v3633_v61 = vld [vmem:[%s6214_s6] sm:$0xff]  ;;  %v3682_v47 = vpop.permute.xlu1 %3681 }
 0x3f8   : > { %3850 = vmatprep.subr.mxu1 %v3616_v32  ;;  %v3609_v6 = vmax.f32 %v3577_v3, 0.0  ;;  %v3611_v42 = vmax.f32 %v3579_v52, 0.0  ;;  %3738 = vmatpush1.msra.mxu0 %v3613_v19  ;;  %v3606_v4 = vmax.f32 %v3574_v23, 0.0  ;;  %v3608_v21 = vmax.f32 %v3576_v43, 0.0 }
 0x3f9   : > { %3851 = vmatpush1.msra.mxu1 %v3615_v50  ;;  %3739 = vmatprep.subr.mxu0 %v3610_v14  ;;  %v3605_v27 = vmax.f32 %v3573_v31, 0.0  ;;  %v3607_v15 = vmax.f32 %v3575_v2, 0.0  ;;  %v3602_v48 = vmax.f32 %v3570_v18, 0.0  ;;  %v3604_v44 = vmax.f32 %v3572_v0, 0.0 }
 0x3fa   : > { %3852 = vmatprep.subr.mxu1 %v3612_v38  ;;  %3740 = vmatpush1.msra.mxu0 %v3609_v6  ;;  %v3601_v5 = vmax.f32 %v3569_v28, 0.0  ;;  %v3603_v41 = vmax.f32 %v3571_v35, 0.0 }
 0x3fb   : > { %3853 = vmatpush1.msra.mxu1 %v3611_v42  ;;  %3741 = vmatprep.subr.mxu0 %v3606_v4  ;;  %v3672_v2 = vpop.permute.xlu1 %3671 }
 0x3fc   : > { %3854 = vmatprep.subr.mxu1 %v3608_v21  ;;  %3742 = vmatpush1.msra.mxu0 %v3605_v27 }
 0x3fd   : > { %3855 = vmatpush1.msra.mxu1 %v3607_v15  ;;  %3743 = vmatprep.subr.mxu0 %v3602_v48 }
 0x3fe   : > { %3856 = vmatprep.subr.mxu1 %v3604_v44  ;;  %3744 = vmatpush1.msra.mxu0 %v3601_v5 }
 0x3ff   : > { %3857 = vmatpush1.msra.mxu1 %v3603_v41  ;;  %4417 = vmatmul.mubr.msk.f32.vlgmr.msra.gmra.mxu0 %vm1998_vm4, %v3633_v61 }
 0x400   : > { %4425 = vmatmul.mubr.msk.f32.vlgmr.msra.gmra.mxu1 %vm1998_vm4, %v3633_v61  ;;  %3783 = vmatprep.mubr.f32.mxu0 %v6319_v60 }
 0x401   : > { %3896 = vmatprep.mubr.f32.mxu1 %v6319_v60 }
 0x403   : > { %4418 = vmatmul.mubr.msk.f32.gmra.mxu0 %vm1998_vm4, %v3634_v56 }
 0x404   : > { %4426 = vmatmul.mubr.msk.f32.gmra.mxu1 %vm1998_vm4, %v3634_v56  ;;  %3789 = vmatprep.mubr.f32.mxu0 %v6319_v60 }
 0x405   : > { %3902 = vmatprep.mubr.f32.mxu1 %v6319_v60 }
 0x407   : > { %4419 = vmatmul.mubr.msk.f32.gmra.mxu0 %vm1998_vm4, %v3635_v11 }
 0x408   : > { %4427 = vmatmul.mubr.msk.f32.gmra.mxu1 %vm1998_vm4, %v3635_v11  ;;  %3795 = vmatprep.mubr.f32.mxu0 %v6319_v60 }
 0x409   : > { %3908 = vmatprep.mubr.f32.mxu1 %v6319_v60 }
 0x40b   : > { %4420 = vmatmul.mubr.msk.f32.gmra.mxu0 %vm1998_vm4, %v3636_v57 }
 0x40c   : > { %4428 = vmatmul.mubr.msk.f32.gmra.mxu1 %vm1998_vm4, %v3636_v57  ;;  %3801 = vmatprep.mubr.f32.mxu0 %v6319_v60 }
 0x40d   : > { %3914 = vmatprep.mubr.f32.mxu1 %v6319_v60 }
 0x40f   : > { %4421 = vmatmul.mubr.msk.f32.gmra.mxu0 %vm1998_vm4, %v3637_v7 }
 0x410   : > { %4429 = vmatmul.mubr.msk.f32.gmra.mxu1 %vm1998_vm4, %v3637_v7  ;;  %3807 = vmatprep.mubr.f32.mxu0 %v6319_v60 }
 0x411   : > { %3920 = vmatprep.mubr.f32.mxu1 %v6319_v60 }
 0x413   : > { %4422 = vmatmul.mubr.msk.f32.gmra.mxu0 %vm1998_vm4, %v3638_v46 }
 0x414   : > { %4430 = vmatmul.mubr.msk.f32.gmra.mxu1 %vm1998_vm4, %v3638_v46  ;;  %3813 = vmatprep.mubr.f32.mxu0 %v6319_v60 }
 0x415   : > { %3926 = vmatprep.mubr.f32.mxu1 %v6319_v60 }
 0x417   : > { %4423 = vmatmul.mubr.msk.f32.gmra.mxu0 %vm1998_vm4, %v3639_v45 }
 0x418   : > { %4431 = vmatmul.mubr.msk.f32.gmra.mxu1 %vm1998_vm4, %v3639_v45  ;;  %3819 = vmatprep.mubr.f32.mxu0 %v6319_v60 }
 0x419   : > { %3932 = vmatprep.mubr.f32.mxu1 %v6319_v60 }
 0x41b   : > { %4424 = vmatmul.mubr.msk.f32.gmra.mxu0 %vm1998_vm4, %v3640_v10 }
 0x41c   : > { %4432 = vmatmul.mubr.msk.f32.gmra.mxu1 %vm1998_vm4, %v3640_v10  ;;  %4045 = vmatprep.mubr.f32.mxu0 %v6319_v60 }
 0x41d   : > { %4116 = vmatprep.mubr.f32.mxu1 %v6319_v60 }
 0x4bf   : > { %v6116_v39 = vpop.f32.mrf.mxu0 }
 0x4c0   : > { %v6118_v26 = vpop.f32.mrf.mxu1 }
 0x4c1   : > { %v6120_v12 = vpop.f32.mrf.mxu0 }
 0x4c2   : > { %v6122_v40 = vpop.f32.mrf.mxu1 }
 0x4c3   : > { %v6124_v33 = vpop.f32.mrf.mxu0 }
 0x4c4   : > { %v6126_v29 = vpop.f32.mrf.mxu1 }
 0x4c5   : > { %v6128_v22 = vpop.f32.mrf.mxu0 }
 0x4c6   : > { %v6130_v13 = vpop.f32.mrf.mxu1 }
 0x4c7   : > { %v6132_v30 = vpop.f32.mrf.mxu0 }
 0x4c8   : > { %v6134_v1 = vpop.f32.mrf.mxu1 }
 0x4c9   : > { %v6136_v60 = vpop.f32.mrf.mxu0 }
 0x4ca   : > { %v6138_v24 = vpop.f32.mrf.mxu1 }
 0x4cb   : > { %v3797_v63 = vpop.f32.mrf.mxu0 }
 0x4cc   : > { %v3910_v53 = vpop.f32.mrf.mxu1 }
 0x4cd   : > { %v3799_v17 = vpop.f32.mrf.mxu0 }
 0x4ce   : > { %v3912_v36 = vpop.f32.mrf.mxu1 }
 0x4cf   : > { %v3803_v58 = vpop.f32.mrf.mxu0 }
 0x4d0   : > { %v3916_v16 = vpop.f32.mrf.mxu1  ;;  %v3804_v7 = vadd.f32 %v3803_v58, %v3672_v2 }
 0x4d1   : > { %v3805_v49 = vpop.f32.mrf.mxu0  ;;  %v3917_v46 = vadd.f32 %v3916_v16, %v3672_v2 }
 0x4d2   : > { %v3918_v37 = vpop.f32.mrf.mxu1  ;;  %v3806_v61 = vadd.f32 %v3805_v49, %v3672_v2 }
 0x4d3   : > { %v3809_v55 = vpop.f32.mrf.mxu0  ;;  %v3919_v56 = vadd.f32 %v3918_v37, %v3672_v2 }
 0x4d4   : > { %v3922_v3 = vpop.f32.mrf.mxu1  ;;  %v3810_v48 = vadd.f32 %v3809_v55, %v5925_v54 }
 0x4d5   : > { %v3811_v52 = vpop.f32.mrf.mxu0  ;;  %v3923_v44 = vadd.f32 %v3922_v3, %v5925_v54 }
 0x4d6   : > { %v3924_v25 = vpop.f32.mrf.mxu1  ;;  %v3812_v4 = vadd.f32 %v3811_v52, %v5925_v54  ;;  %v6349_v52 = vld [vmem:[#allocation5_spill] sm:$0xff] }
 0x4d7   : > { %v3815_v23 = vpop.f32.mrf.mxu0  ;;  %v3925_v21 = vadd.f32 %v3924_v25, %v5925_v54  ;;  %v3800_v25 = vadd.f32 %v3799_v17, %v6349_v52  ;;  %v3913_v55 = vadd.f32 %v3912_v36, %v6349_v52  ;;  %v3798_v49 = vadd.f32 %v3797_v63, %v6349_v52 }
 0x4d8   : > { %v3928_v43 = vpop.f32.mrf.mxu1  ;;  %v3816_v6 = vadd.f32 %v3815_v23, %v3682_v47  ;;  %v3960_v54 = vmax.f32 %v3812_v4, 0.0  ;;  %v3911_v37 = vadd.f32 %v3910_v53, %v6349_v52  ;;  %v3961_v23 = vmax.f32 %v3923_v44, 0.0  ;;  %v6350_v53 = vld [vmem:[#allocation6_spill] sm:$0xff] }
 0x4d9   : > { %v3817_v51 = vpop.f32.mrf.mxu0  ;;  %v3929_v42 = vadd.f32 %v3928_v43, %v3682_v47  ;;  %v3962_v3 = vmax.f32 %v3925_v21, 0.0  ;;  %v3956_v43 = vmax.f32 %v3806_v61, 0.0  ;;  %v3958_v17 = vmax.f32 %v3919_v56, 0.0 }
 0x4da   : > { %v3930_v32 = vpop.f32.mrf.mxu1  ;;  %v3818_v14 = vadd.f32 %v3817_v51, %v3682_v47  ;;  %v3963_v45 = vmax.f32 %v3816_v6, 0.0  ;;  %v3957_v63 = vmax.f32 %v3917_v46, 0.0 }
 0x4db   : > { %v3821_v62 = vpop.f32.mrf.mxu0  ;;  %v3931_v38 = vadd.f32 %v3930_v32, %v3682_v47  ;;  %v3965_v10 = vmax.f32 %v3929_v42, 0.0  ;;  %v3959_v47 = vmax.f32 %v3810_v48, 0.0  ;;  %v3955_v32 = vmax.f32 %v3804_v7, 0.0 }
 0x4dc   : > { %v3934_v31 = vpop.f32.mrf.mxu1  ;;  %v3822_v19 = vadd.f32 %v3821_v62, %v5923_v59  ;;  %v3964_v11 = vmax.f32 %v3818_v14, 0.0  ;;  %v3788_v62 = vadd.f32 %v6128_v22, %v6350_v53 }
 0x4dd   : > { %v3935_v50 = vadd.f32 %v3934_v31, %v5923_v59  ;;  %v3823_v18 = vpop.f32.mrf.mxu0  ;;  %v3966_v57 = vmax.f32 %v3931_v38, 0.0  ;;  %v3952_v31 = vmax.f32 %v3800_v25, 0.0 }
 0x4de   : > { %v3936_v0 = vpop.f32.mrf.mxu1  ;;  %v3824_v28 = vadd.f32 %v3823_v18, %v5923_v59  ;;  %v3967_v5 = vmax.f32 %v3822_v19, 0.0  ;;  %v3951_v19 = vmax.f32 %v3798_v49, 0.0 }
 0x4df   : > { %v3937_v35 = vadd.f32 %v3936_v0, %v5923_v59  ;;  %v3969_v41 = vmax.f32 %v3935_v50, 0.0  ;;  %v3662_v59 = vpop.permute.xlu1 %3661  ;;  %v3953_v50 = vmax.f32 %v3911_v37, 0.0 }
 0x4e0   : > { %v3968_v27 = vmax.f32 %v3824_v28, 0.0  ;;  %v3794_v58 = vadd.f32 %v6136_v60, %v3662_v59  ;;  %v3907_v16 = vadd.f32 %v6138_v24, %v3662_v59  ;;  %v3792_v36 = vadd.f32 %v6132_v30, %v3662_v59 }
 0x4e1   : > { %v3970_v15 = vmax.f32 %v3937_v35, 0.0  ;;  %v3905_v51 = vadd.f32 %v6134_v1, %v3662_v59  ;;  %v3901_v60 = vadd.f32 %v6130_v13, %v6350_v53  ;;  %v3954_v24 = vmax.f32 %v3913_v55, 0.0 }
 0x4e2   : > { %3997 = vmatprep.subr.mxu0 %v3968_v27  ;;  %v3786_v30 = vadd.f32 %v6124_v33, %v6350_v53  ;;  %v3899_v1 = vadd.f32 %v6126_v29, %v6350_v53  ;;  %v3948_v13 = vmax.f32 %v3794_v58, 0.0  ;;  %v3950_v0 = vmax.f32 %v3907_v16, 0.0 }
 0x4e3   : > { %4068 = vmatprep.subr.mxu1 %v3970_v15  ;;  %3998 = vmatpush1.msra.mxu0 %v3967_v5  ;;  %v3652_v2 = vpop.permute.xlu1 %3651  ;;  %v3947_v33 = vmax.f32 %v3792_v36, 0.0  ;;  %v3949_v28 = vmax.f32 %v3905_v51, 0.0  ;;  %v3944_v29 = vmax.f32 %v3788_v62, 0.0  ;;  %v3946_v35 = vmax.f32 %v3901_v60, 0.0 }
 0x4e4   : > { %4069 = vmatpush1.msra.mxu1 %v3969_v41  ;;  %3999 = vmatprep.subr.mxu0 %v3964_v11  ;;  %v3782_v22 = vadd.f32 %v6120_v12, %v3652_v2  ;;  %v3895_v18 = vadd.f32 %v6122_v40, %v3652_v2  ;;  %v3780_v14 = vadd.f32 %v6116_v39, %v3652_v2  ;;  %v3943_v6 = vmax.f32 %v3786_v30, 0.0 }
 0x4e5   : > { %4070 = vmatprep.subr.mxu1 %v3966_v57  ;;  %4000 = vmatpush1.msra.mxu0 %v3963_v45  ;;  %v3893_v38 = vadd.f32 %v6118_v26, %v3652_v2  ;;  %v3945_v12 = vmax.f32 %v3899_v1, 0.0  ;;  %v3971_v26 = vld [vmem:[%s6216_s8] sm:$0x7]  ;;  %v6351_v58 = vrot.slane %v5934_v8, 3  ;;  %v6353_v36 = vrot.slane %v5937_v34, 3 }
 0x4e6   : > { %4071 = vmatpush1.msra.mxu1 %v3965_v10  ;;  %4001 = vmatprep.subr.mxu0 %v3960_v54  ;;  %v3940_v40 = vmax.f32 %v3782_v22, 0.0  ;;  %v3942_v42 = vmax.f32 %v3895_v18, 0.0  ;;  %v3939_v4 = vmax.f32 %v3780_v14, 0.0  ;;  %v4187_v8 = vld [vmem:[%s6028_s13] sm:$0xff] (%p4676_p6) }
 0x4e7   : > { %4072 = vmatprep.subr.mxu1 %v3962_v3  ;;  %4002 = vmatpush1.msra.mxu0 %v3959_v47  ;;  %v3941_v39 = vmax.f32 %v3893_v38, 0.0  ;;  %v3976_v21 = vpop.permute.xlu1 %3975  ;;  %4188 = vst [vmem:[%s4174_s12] sm:$0xff] (%p4676_p6), %v4187_v8 }
 0x4e8   : > { %4073 = vmatpush1.msra.mxu1 %v3961_v23  ;;  %4003 = vmatprep.subr.mxu0 %v3956_v43  ;;  %v6352_v43 = vrot.slane %v5940_v20, 3  ;;  %v4189_v20 = vld [vmem:[%s6028_s13 + $0x8] sm:$0xff] (%p4676_p6) }
 0x4e9   : > { %4074 = vmatprep.subr.mxu1 %v3958_v17  ;;  %4004 = vmatpush1.msra.mxu0 %v3955_v32  ;;  %v6354_v32 = vrot.slane %v5943_v9, 3  ;;  %4190 = vst [vmem:[%s4174_s12 + $0x8] sm:$0xff] (%p4676_p6), %v4189_v20 }
 0x4ea   : > { %4075 = vmatpush1.msra.mxu1 %v3957_v63  ;;  %4005 = vmatprep.subr.mxu0 %v3952_v31 }
 0x4eb   : > { %4076 = vmatprep.subr.mxu1 %v3954_v24  ;;  %4006 = vmatpush1.msra.mxu0 %v3951_v19 }
 0x4ec   : > { %4077 = vmatpush1.msra.mxu1 %v3953_v50  ;;  %4007 = vmatprep.subr.mxu0 %v3948_v13 }
 0x4ed   : > { %4078 = vmatprep.subr.mxu1 %v3950_v0  ;;  %4008 = vmatpush1.msra.mxu0 %v3947_v33 }
 0x4ee   : > { %4079 = vmatpush1.msra.mxu1 %v3949_v28  ;;  %4009 = vmatprep.subr.mxu0 %v3944_v29 }
 0x4ef   : > { %4080 = vmatprep.subr.mxu1 %v3946_v35  ;;  %4010 = vmatpush1.msra.mxu0 %v3943_v6 }
 0x4f0   : > { %4081 = vmatpush1.msra.mxu1 %v3945_v12  ;;  %4011 = vmatprep.subr.mxu0 %v3940_v40 }
 0x4f1   : > { %4082 = vmatprep.subr.mxu1 %v3942_v42  ;;  %4012 = vmatpush1.msra.mxu0 %v3939_v4 }
 0x4f2   : > { %4083 = vmatpush1.msra.mxu1 %v3941_v39  ;;  %4433 = vmatmul.mubr.msk.f32.vlgmr.msra.gmra.mxu0 %vm1998_vm4, %v3971_v26 }
 0x4f3   : > { %4434 = vmatmul.mubr.msk.f32.vlgmr.msra.gmra.mxu1 %vm1998_vm4, %v3971_v26 }
 0x5b2   : > { %v4047_v27 = vpop.f32.mrf.mxu0 }
 0x5b3   : > { %v4118_v15 = vpop.f32.mrf.mxu1  ;;  %v4048_v48 = vadd.f32 %v4047_v27, %v3976_v21 }
 0x5b4   : > { %v4119_v44 = vadd.f32 %v4118_v15, %v3976_v21  ;;  %v4049_v5 = vpop.f32.mrf.mxu0 }
 0x5b5   : > { %v4120_v41 = vpop.f32.mrf.mxu1  ;;  %v4435_v61 = vmul.f32 -1.442695, %v4048_v48  ;;  %v4050_v11 = vadd.f32 %v4049_v5, %v3976_v21 }
 0x5b6   : > { %v4437_v56 = vmul.f32 -1.442695, %v4119_v44  ;;  %v4121_v57 = vadd.f32 %v4120_v41, %v3976_v21 }
 0x5b7   : > { %4526 = vpow2.f32 %v4435_v61  ;;  %v4436_v59 = vmul.f32 -1.442695, %v4050_v11 }
 0x5b8   : > { %v4438_v7 = vmul.f32 -1.442695, %v4121_v57  ;;  %4528 = vpow2.f32 %v4437_v56 }
 0x5b9   : > { %4530 = vpow2.f32 %v4436_v59 }
 0x5ba   : > { %4532 = vpow2.f32 %v4438_v7 }
 0x5c4   : > { %v4527_v46 = vpop.eup %4526 }
 0x5c5   : > { %v4529_v45 = vpop.eup %4528  ;;  %v4135_v10 = vadd.f32 1.0, %v4527_v46 }
 0x5c6   : > { %v4531_v52 = vpop.eup %4530  ;;  %v4137_v25 = vadd.f32 1.0, %v4529_v45 }
 0x5c7   : > { %v4533_v55 = vpop.eup %4532  ;;  %4534 = vrcp.f32 %v4135_v10  ;;  %v4136_v54 = vadd.f32 1.0, %v4531_v52 }
 0x5c8   : > { %4536 = vrcp.f32 %v4137_v25  ;;  %v4138_v3 = vadd.f32 1.0, %v4533_v55 }
 0x5c9   : > { %4538 = vrcp.f32 %v4136_v54 }
 0x5ca   : > { %4540 = vrcp.f32 %v4138_v3 }
 0x5d4   : > { %v4535_v49 = vpop.eup %4534 }
 0x5d5   : > { %v4537_v37 = vpop.eup %4536  ;;  %v4147_v16 = vadd.f32 %v4535_v49, %v6351_v58 }
 0x5d6   : > { %v4539_v47 = vpop.eup %4538  ;;  %v4149_v51 = vadd.f32 %v4537_v37, %v6353_v36 }
 0x5d7   : > { %v4541_v23 = vpop.eup %4540  ;;  %v4148_v17 = vadd.f32 %v4539_v47, %v6352_v43 }
 0x5d8   : > { %v4150_v63 = vadd.f32 %v4541_v23, %v6354_v32  ;;  %4168 = sbr.rel (!%p4676_p6) target bundleno = 1509 (0x5e5), region = 87 }
 0x5d9   : > { %v4155_v53 = vcombine.low %v4147_v16, %v4148_v17 }
 0x5da   : > { %v4156_v62 = vcombine.low %v4149_v51, %v4150_v63 }
 0x5db   : > { %4439 = vst [vmem:[%s6028_s13 + $0x10] sm:$0x77] %v4155_v53 }
 0x5dc   : > { %4440 = vst [vmem:[%s6028_s13 + $0x18] sm:$0x77] %v4156_v62 }
 0x5e2   : > { %v4191_v34 = vld [vmem:[%s6028_s13 + $0x10] sm:$0xff] }
 0x5e3   : > { %v4193_v9 = vld [vmem:[%s6028_s13 + $0x18] sm:$0xff]  ;;  %4192 = vst [vmem:[%s4174_s12 + $0x20] sm:$0xff] %v4191_v34 }
 0x5e4   : > { %4194 = vst [vmem:[%s4174_s12 + $0x28] sm:$0xff] %v4193_v9 }
 0x5e5 PF: > { %s20_s17 = sadd.s32 1, %s4580_s17   ;;  %s6355_s13 = smov %s4568_s14 }
 0x5e6   : > { %p17_p12 = scmp.ge.s32.totalorder %s20_s17, 4   ;;  %s6356_s14 = smov %s4681_s23 }
 0x5e7   : > { %s6357_s15 = smov %s4576_s16  ;;  %s6358_s16 = smov %s6360_s18 }
 0x5e8   :  { %19 = sbr.rel (!%p17_p12) target bundleno = 3 (0x3), region = 168 }

</bundles_post_ra>
